<compile_context>
chip_gen: v7x
topology: tpu7x:2x2x1
jax: 0.10.0
libtpu: 0.0.40
codegen_flags: <defaults>
</compile_context>

<pallas_src>
import functools

import jax
import jax.numpy as jnp
from jax import lax
from jax.experimental import pallas as pl
from jax.experimental.pallas import tpu as pltpu

EPS = 1e-5  # PyTorch GroupNorm default eps


def _res_unch_kernel(num_tiles, th, W, K, Cin, Cout, group_size, hw, *refs):
    if group_size > 1:
        (xt_ref, w_ref, b_ref, gamma_ref, beta_ref, gmat_ref,
         xres_ref, o_ref, patch_ref, s_ref, sq_ref, scale_ref, shift_ref) = refs
    else:
        (xt_ref, w_ref, b_ref, gamma_ref, beta_ref,
         xres_ref, o_ref, patch_ref, s_ref, sq_ref, scale_ref, shift_ref) = refs
        gmat_ref = None

    p = pl.program_id(1)          # pass: 0 = conv + stats, 1 = normalize + swish + residual
    t = pl.program_id(2)          # spatial (row) tile
    thw = th * W

    @pl.when(jnp.logical_and(p == 0, t == 0))
    def _init():
        s_ref[...] = jnp.zeros_like(s_ref)
        sq_ref[...] = jnp.zeros_like(sq_ref)

    # ---- in-kernel im2col: build the (th*W, K*K*Cin) patch slab from the halo tile ----
    # xt_ref: (th + K - 1, W + K - 1, Cin); column blocks ordered (kh, kw)-major, Cin-minor
    # to match the flattened weight.  W % 8 == 0 keeps the reshape a free sublane collapse.
    for kh in range(K):
        for kw in range(K):
            j = kh * K + kw
            sl = xt_ref[kh:kh + th, kw:kw + W, :]                 # (th, W, Cin)
            patch_ref[:, j * Cin:(j + 1) * Cin] = sl.reshape(thw, Cin)

    # Deep-KKC conv matmul on the MXU, f32 accumulation.  Bias is NOT added here:
    # it is folded into the GroupNorm shift (saves a VALU add/elem and keeps the
    # accumulated sums bias-free).
    z = jnp.dot(patch_ref[...], w_ref[...],
                preferred_element_type=jnp.float32)               # (th*W, Cout) f32

    @pl.when(p == 0)
    def _stats():
        s_ref[...] += jnp.sum(z, axis=0, keepdims=True)           # (1, Cout)
        sq_ref[...] += jnp.sum(z * z, axis=0, keepdims=True)      # (1, Cout)

    @pl.when(jnp.logical_and(p == 0, t == num_tiles - 1))
    def _finalize_stats():
        b = b_ref[...]                                            # (1, Cout)
        # Exact per-channel stats of y = z + b, reconstructed from bias-free sums.
        sum_y = s_ref[...] + hw * b
        sq_y = sq_ref[...] + 2.0 * b * s_ref[...] + hw * (b * b)
        if group_size > 1:
            # Reduce channels within each group (and broadcast back) via an indicator
            # matmul; skipped entirely for GroupNorm(32, 32) where group_size == 1.
            sum_y = jnp.dot(sum_y, gmat_ref[...], preferred_element_type=jnp.float32)
            sq_y = jnp.dot(sq_y, gmat_ref[...], preferred_element_type=jnp.float32)
        cnt = float(hw * group_size)
        mean = sum_y / cnt
        var = sq_y / cnt - mean * mean                            # biased var (PyTorch)
        inv = lax.rsqrt(var + EPS)
        scale = inv * gamma_ref[...]
        scale_ref[...] = scale
        shift_ref[...] = beta_ref[...] + (b - mean) * scale       # folded bias + affine

    @pl.when(p == 1)
    def _apply():
        yn = z * scale_ref[...] + shift_ref[...]
        # Swish: x * sigmoid(x); exp + reciprocal both issue on the EUP slot.
        sig = pl.reciprocal(1.0 + jnp.exp(-yn), approx=True)
        o_ref[...] = (yn * sig + xres_ref[...].astype(jnp.float32)).astype(o_ref.dtype)


def _pick_tile_rows(H, W, Cin, Cout, K, itemsize, budget_bytes):
    """Largest row-tile (divisor of H) whose per-step VMEM footprint fits the budget."""
    Wp = W + (K - 1)
    kkc = Cin * K * K
    for th in range(H, 0, -1):
        if H % th:
            continue
        if (th * W) % 8 and th != H:          # block sublane dim must be 8-aligned
            continue
        thw = th * W
        est = (thw * kkc * itemsize                          # im2col slab scratch
               + 2 * (th + K - 1) * Wp * Cin * itemsize      # double-buffered halo tile
               + 4 * thw * Cout * 4                          # 2x residual + 2x out blocks
               + 2 * kkc * Cout * itemsize)                  # resident weight
        if est <= budget_bytes:
            return th
    return 1


def res_unch_block(x, weight, bias, gamma, beta, *, num_groups=32, kernel_size=5,
                   tile_rows=None, compute_dtype=jnp.bfloat16,
                   vmem_limit_bytes=64 * 1024 * 1024):
    """x: (N, Cin, H, W) NCHW; weight: (Cout, Cin, K, K) — PyTorch conventions.

    compute_dtype: MXU input dtype for the conv (default bf16; accumulation is f32).
    vmem_limit_bytes: 64 MiB default is v7x-safe; raise to ~96 MiB on v5e/v6e.
    """
    N, Cin, H, W = x.shape
    Cout = weight.shape[0]
    K = kernel_size
    pad = K // 2
    assert Cin == Cout, "residual add requires in_chan == out_chan"
    assert Cout % num_groups == 0, "GroupNorm requires Cout % num_groups == 0"
    group_size = Cout // num_groups
    HW = H * W
    KKC = Cin * K * K
    Wp = W + 2 * pad

    cdtype = jnp.dtype(compute_dtype) if compute_dtype is not None else jnp.dtype(x.dtype)
    if tile_rows is None:
        tile_rows = _pick_tile_rows(H, W, Cin, Cout, K, cdtype.itemsize,
                                    budget_bytes=max(vmem_limit_bytes // 2, 8 << 20))
    th = tile_rows
    assert H % th == 0
    num_tiles = H // th
    thw = th * W

    # Channels-last so C sits on lanes and the in-kernel (h, w) -> rows collapse is free.
    x_nhwc = jnp.transpose(x, (0, 2, 3, 1))                               # (N, H, W, C)
    xp = jnp.pad(x_nhwc, ((0, 0), (pad, pad), (pad, pad), (0, 0)), mode="reflect")
    # Overlapping row tiles (halo of K-1 rows): ~(th+K-1)/th HBM duplication — nothing
    # like the old 25x im2col — and BlockSpec auto-pipelines one halo tile per step.
    xtiles = jnp.stack([xp[:, t * th: t * th + th + 2 * pad] for t in range(num_tiles)],
                       axis=1).astype(cdtype)              # (N, T, th+2p, Wp, Cin)

    # Weight flattened (kh, kw, c)-major so patch columns are contiguous Cin blocks.
    w_mat = jnp.transpose(weight, (2, 3, 1, 0)).reshape(KKC, Cout).astype(cdtype)
    x_res = x_nhwc.reshape(N, HW, Cout)                    # tile-sized residual blocks

    def vec(v):
        return v.reshape(1, Cout).astype(jnp.float32)

    inputs = [xtiles, w_mat, vec(bias), vec(gamma), vec(beta)]
    in_specs = [
        # NOTE(v5e): add pipeline_mode=pl.Buffered(3) here if the halo-tile DMA is exposed.
        pl.BlockSpec((None, None, th + 2 * pad, Wp, Cin),
                     lambda n, p, t: (n, t, 0, 0, 0)),
        pl.BlockSpec((KKC, Cout), lambda n, p, t: (0, 0)),     # resident conv weight
        pl.BlockSpec((1, Cout), lambda n, p, t: (0, 0)),       # bias
        pl.BlockSpec((1, Cout), lambda n, p, t: (0, 0)),       # gamma
        pl.BlockSpec((1, Cout), lambda n, p, t: (0, 0)),       # beta
    ]
    if group_size > 1:
        gidx = jnp.arange(Cout) // group_size
        gmat = (gidx[:, None] == gidx[None, :]).astype(jnp.float32)
        inputs.append(gmat)
        in_specs.append(pl.BlockSpec((Cout, Cout), lambda n, p, t: (0, 0)))
    inputs.append(x_res)
    # Residual / output blocks are tile-sized; during pass 0 they pin block (n, 0)
    # (p * t == 0), so nothing stale is ever written back and VMEM stays O(tile).
    in_specs.append(pl.BlockSpec((None, thw, Cout), lambda n, p, t: (n, p * t, 0)))

    kernel = functools.partial(_res_unch_kernel, num_tiles, th, W, K, Cin, Cout,
                               group_size, float(HW))

    out = pl.pallas_call(
        kernel,
        out_shape=jax.ShapeDtypeStruct((N, HW, Cout), x.dtype),
        grid=(N, 2, num_tiles),
        in_specs=in_specs,
        out_specs=pl.BlockSpec((None, thw, Cout), lambda n, p, t: (n, p * t, 0)),
        scratch_shapes=[
            pltpu.VMEM((thw, KKC), cdtype),        # im2col slab for the current tile
            pltpu.VMEM((1, Cout), jnp.float32),    # per-channel sum(z)
            pltpu.VMEM((1, Cout), jnp.float32),    # per-channel sum(z^2)
            pltpu.VMEM((1, Cout), jnp.float32),    # folded GroupNorm scale
            pltpu.VMEM((1, Cout), jnp.float32),    # folded GroupNorm shift
        ],
        compiler_params=pltpu.CompilerParams(
            dimension_semantics=("parallel", "arbitrary", "arbitrary"),
            vmem_limit_bytes=vmem_limit_bytes),
    )(*inputs)

    return jnp.transpose(out.reshape(N, H, W, Cout), (0, 3, 1, 2))


def reference(x, weight, bias, gamma, beta, *, num_groups=32, kernel_size=5):
    """Pure-JAX reference matching the PyTorch module (correctness check)."""
    pad = kernel_size // 2
    xp = jnp.pad(x, ((0, 0), (0, 0), (pad, pad), (pad, pad)), mode="reflect")
    y = lax.conv_general_dilated(
        xp, weight, window_strides=(1, 1), padding="VALID",
        dimension_numbers=("NCHW", "OIHW", "NCHW"))
    y = y + bias[None, :, None, None]
    N, C, H, W = y.shape
    cg = C // num_groups
    yg = y.reshape(N, num_groups, cg * H * W)
    mean = yg.mean(-1, keepdims=True)
    var = yg.var(-1, keepdims=True)
    yn = ((yg - mean) / jnp.sqrt(var + EPS)).reshape(N, C, H, W)
    yn = yn * gamma[None, :, None, None] + beta[None, :, None, None]
    return yn * jax.nn.sigmoid(yn) + x


if __name__ == "__main__":
    N, C, H, W, K = 2, 32, 16, 16, 5     # GroupNorm(32, C) requires C % 32 == 0

    key = jax.random.PRNGKey(0)
    kx, kw, kb = jax.random.split(key, 3)
    x = jax.random.normal(kx, (N, C, H, W), dtype=jnp.float32)
    weight = 0.05 * jax.random.normal(kw, (C, C, K, K), dtype=jnp.float32)
    bias = 0.1 * jax.random.normal(kb, (C,), dtype=jnp.float32)
    gamma = jnp.ones((C,), dtype=jnp.float32)    # PyTorch GroupNorm default init
    beta = jnp.zeros((C,), dtype=jnp.float32)

    ref = jax.block_until_ready(
        reference(x, weight, bias, gamma, beta, num_groups=32, kernel_size=K))

    # f32 MXU path, forced multi-tile (tile_rows=4 -> 4 row tiles) so the streamed-stats
    # + two-pass normalize structure is exercised at this small size.
    out_f32 = jax.block_until_ready(
        res_unch_block(x, weight, bias, gamma, beta, num_groups=32, kernel_size=K,
                       tile_rows=4, compute_dtype=jnp.float32))
    assert out_f32.shape == (N, C, H, W)
    err_f32 = float(jnp.max(jnp.abs(out_f32 - ref)))
    assert err_f32 < 2e-2, f"f32 path max|err| = {err_f32}"   # margin for approx reciprocal

    # Default path: bf16 MXU inputs, automatic tile picker (single tile at this size).
    out_bf16 = jax.block_until_ready(
        res_unch_block(x, weight, bias, gamma, beta, num_groups=32, kernel_size=K))
    assert out_bf16.shape == (N, C, H, W)
    err_bf16 = float(jnp.max(jnp.abs(out_bf16 - ref)))
    assert err_bf16 < 8e-2, f"bf16 path max|err| = {err_bf16}"

    print("KERNEL_OK")
</pallas_src>

<mosaic_0001>
module attributes {stable_mosaic.version = 11 : i64} {
  func.func @_res_unch_kernel(%arg0: i32, %arg1: i32, %arg2: i32, %arg3: memref<1x1x8x20x32xf32, #tpu.memory_space<vmem>>, %arg4: memref<800x32xf32, #tpu.memory_space<vmem>>, %arg5: memref<1x32xf32, #tpu.memory_space<vmem>>, %arg6: memref<1x32xf32, #tpu.memory_space<vmem>>, %arg7: memref<1x32xf32, #tpu.memory_space<vmem>>, %arg8: memref<1x64x32xf32, #tpu.memory_space<vmem>>, %arg9: memref<1x64x32xf32, #tpu.memory_space<vmem>>, %arg10: memref<64x800xf32, #tpu.memory_space<vmem>>, %arg11: memref<1x32xf32, #tpu.memory_space<vmem>>, %arg12: memref<1x32xf32, #tpu.memory_space<vmem>>, %arg13: memref<1x32xf32, #tpu.memory_space<vmem>>, %arg14: memref<1x32xf32, #tpu.memory_space<vmem>>) attributes {dimension_semantics = [#tpu.dimension_semantics<parallel>, #tpu.dimension_semantics<arbitrary>, #tpu.dimension_semantics<arbitrary>], iteration_bounds = array<i64: 2, 2, 4>, scalar_prefetch = 0 : i64, scratch_operands = 5 : i64, tpu.core_type = #tpu.core_type<tc>, window_params = [{transform_indices = @transform_0, window_bounds = array<i64: 1, 1, 8, 20, 32>}, {pipeline_mode = #tpu.pipeline_mode<synchronous>, transform_indices = @transform_1, window_bounds = array<i64: 800, 32>}, {pipeline_mode = #tpu.pipeline_mode<synchronous>, transform_indices = @transform_2, window_bounds = array<i64: 1, 32>}, {pipeline_mode = #tpu.pipeline_mode<synchronous>, transform_indices = @transform_3, window_bounds = array<i64: 1, 32>}, {pipeline_mode = #tpu.pipeline_mode<synchronous>, transform_indices = @transform_4, window_bounds = array<i64: 1, 32>}, {transform_indices = @transform_5, window_bounds = array<i64: 1, 64, 32>}, {transform_indices = @transform_6, window_bounds = array<i64: 1, 64, 32>}]} {
    %c0_i32 = arith.constant 0 : i32
    %0 = arith.cmpi eq, %arg1, %c0_i32 : i32
    %c0_i32_0 = arith.constant 0 : i32
    %1 = arith.cmpi eq, %arg2, %c0_i32_0 : i32
    %2 = arith.andi %0, %1 : i1
    %3 = arith.extui %2 : i1 to i32
    %c0_i32_1 = arith.constant 0 : i32
    %4 = arith.cmpi ne, %3, %c0_i32_1 : i32
    scf.if %4 {
      %cst_157 = arith.constant 0.000000e+00 : f32
      %119 = vector.broadcast %cst_157 : f32 to vector<1x32xf32>
      %c0_158 = arith.constant 0 : index
      %c0_159 = arith.constant 0 : index
      %120 = vector.load %arg11[%c0_158, %c0_159] : memref<1x32xf32, #tpu.memory_space<vmem>>, vector<1x32xf32>
      tpu.vector_store %arg11[%c0_158, %c0_159], %119 {strides = array<i32>} : memref<1x32xf32, #tpu.memory_space<vmem>>, vector<1x32xf32>,
      %cst_160 = arith.constant 0.000000e+00 : f32
      %121 = vector.broadcast %cst_160 : f32 to vector<1x32xf32>
      %c0_161 = arith.constant 0 : index
      %c0_162 = arith.constant 0 : index
      %122 = vector.load %arg12[%c0_161, %c0_162] : memref<1x32xf32, #tpu.memory_space<vmem>>, vector<1x32xf32>
      tpu.vector_store %arg12[%c0_161, %c0_162], %121 {strides = array<i32>} : memref<1x32xf32, #tpu.memory_space<vmem>>, vector<1x32xf32>,
    } else {
    }
    %c0 = arith.constant 0 : index
    %c0_2 = arith.constant 0 : index
    %c0_3 = arith.constant 0 : index
    %c0_4 = arith.constant 0 : index
    %c0_5 = arith.constant 0 : index
    %5 = vector.load %arg3[%c0, %c0_2, %c0_3, %c0_4, %c0_5] : memref<1x1x8x20x32xf32, #tpu.memory_space<vmem>>, vector<1x1x4x16x32xf32>
    %6 = vector.shape_cast %5 : vector<1x1x4x16x32xf32> to vector<4x16x32xf32>
    %7 = vector.shape_cast %6 : vector<4x16x32xf32> to vector<64x32xf32>
    %c0_6 = arith.constant 0 : index
    %c0_7 = arith.constant 0 : index
    %8 = vector.load %arg10[%c0_6, %c0_7] : memref<64x800xf32, #tpu.memory_space<vmem>>, vector<64x32xf32>
    tpu.vector_store %arg10[%c0_6, %c0_7], %7 {strides = array<i32>} : memref<64x800xf32, #tpu.memory_space<vmem>>, vector<64x32xf32>,
    %c0_8 = arith.constant 0 : index
    %c0_9 = arith.constant 0 : index
    %c0_10 = arith.constant 0 : index
    %c1 = arith.constant 1 : index
    %c0_11 = arith.constant 0 : index
    %9 = vector.load %arg3[%c0_8, %c0_9, %c0_10, %c1, %c0_11] : memref<1x1x8x20x32xf32, #tpu.memory_space<vmem>>, vector<1x1x4x16x32xf32>
    %10 = vector.shape_cast %9 : vector<1x1x4x16x32xf32> to vector<4x16x32xf32>
    %11 = vector.shape_cast %10 : vector<4x16x32xf32> to vector<64x32xf32>
    %c0_12 = arith.constant 0 : index
    %c32 = arith.constant 32 : index
    %12 = vector.load %arg10[%c0_12, %c32] : memref<64x800xf32, #tpu.memory_space<vmem>>, vector<64x32xf32>
    tpu.vector_store %arg10[%c0_12, %c32], %11 {strides = array<i32>} : memref<64x800xf32, #tpu.memory_space<vmem>>, vector<64x32xf32>,
    %c0_13 = arith.constant 0 : index
    %c0_14 = arith.constant 0 : index
    %c0_15 = arith.constant 0 : index
    %c2 = arith.constant 2 : index
    %c0_16 = arith.constant 0 : index
    %13 = vector.load %arg3[%c0_13, %c0_14, %c0_15, %c2, %c0_16] : memref<1x1x8x20x32xf32, #tpu.memory_space<vmem>>, vector<1x1x4x16x32xf32>
    %14 = vector.shape_cast %13 : vector<1x1x4x16x32xf32> to vector<4x16x32xf32>
    %15 = vector.shape_cast %14 : vector<4x16x32xf32> to vector<64x32xf32>
    %c0_17 = arith.constant 0 : index
    %c64 = arith.constant 64 : index
    %16 = vector.load %arg10[%c0_17, %c64] : memref<64x800xf32, #tpu.memory_space<vmem>>, vector<64x32xf32>
    tpu.vector_store %arg10[%c0_17, %c64], %15 {strides = array<i32>} : memref<64x800xf32, #tpu.memory_space<vmem>>, vector<64x32xf32>,
    %c0_18 = arith.constant 0 : index
    %c0_19 = arith.constant 0 : index
    %c0_20 = arith.constant 0 : index
    %c3 = arith.constant 3 : index
    %c0_21 = arith.constant 0 : index
    %17 = vector.load %arg3[%c0_18, %c0_19, %c0_20, %c3, %c0_21] : memref<1x1x8x20x32xf32, #tpu.memory_space<vmem>>, vector<1x1x4x16x32xf32>
    %18 = vector.shape_cast %17 : vector<1x1x4x16x32xf32> to vector<4x16x32xf32>
    %19 = vector.shape_cast %18 : vector<4x16x32xf32> to vector<64x32xf32>
    %c0_22 = arith.constant 0 : index
    %c96 = arith.constant 96 : index
    %20 = vector.load %arg10[%c0_22, %c96] : memref<64x800xf32, #tpu.memory_space<vmem>>, vector<64x32xf32>
    tpu.vector_store %arg10[%c0_22, %c96], %19 {strides = array<i32>} : memref<64x800xf32, #tpu.memory_space<vmem>>, vector<64x32xf32>,
    %c0_23 = arith.constant 0 : index
    %c0_24 = arith.constant 0 : index
    %c0_25 = arith.constant 0 : index
    %c4 = arith.constant 4 : index
    %c0_26 = arith.constant 0 : index
    %21 = vector.load %arg3[%c0_23, %c0_24, %c0_25, %c4, %c0_26] : memref<1x1x8x20x32xf32, #tpu.memory_space<vmem>>, vector<1x1x4x16x32xf32>
    %22 = vector.shape_cast %21 : vector<1x1x4x16x32xf32> to vector<4x16x32xf32>
    %23 = vector.shape_cast %22 : vector<4x16x32xf32> to vector<64x32xf32>
    %c0_27 = arith.constant 0 : index
    %c128 = arith.constant 128 : index
    %24 = vector.load %arg10[%c0_27, %c128] : memref<64x800xf32, #tpu.memory_space<vmem>>, vector<64x32xf32>
    tpu.vector_store %arg10[%c0_27, %c128], %23 {strides = array<i32>} : memref<64x800xf32, #tpu.memory_space<vmem>>, vector<64x32xf32>,
    %c0_28 = arith.constant 0 : index
    %c0_29 = arith.constant 0 : index
    %c1_30 = arith.constant 1 : index
    %c0_31 = arith.constant 0 : index
    %c0_32 = arith.constant 0 : index
    %25 = vector.load %arg3[%c0_28, %c0_29, %c1_30, %c0_31, %c0_32] : memref<1x1x8x20x32xf32, #tpu.memory_space<vmem>>, vector<1x1x4x16x32xf32>
    %26 = vector.shape_cast %25 : vector<1x1x4x16x32xf32> to vector<4x16x32xf32>
    %27 = vector.shape_cast %26 : vector<4x16x32xf32> to vector<64x32xf32>
    %c0_33 = arith.constant 0 : index
    %c160 = arith.constant 160 : index
    %28 = vector.load %arg10[%c0_33, %c160] : memref<64x800xf32, #tpu.memory_space<vmem>>, vector<64x32xf32>
    tpu.vector_store %arg10[%c0_33, %c160], %27 {strides = array<i32>} : memref<64x800xf32, #tpu.memory_space<vmem>>, vector<64x32xf32>,
    %c0_34 = arith.constant 0 : index
    %c0_35 = arith.constant 0 : index
    %c1_36 = arith.constant 1 : index
    %c1_37 = arith.constant 1 : index
    %c0_38 = arith.constant 0 : index
    %29 = vector.load %arg3[%c0_34, %c0_35, %c1_36, %c1_37, %c0_38] : memref<1x1x8x20x32xf32, #tpu.memory_space<vmem>>, vector<1x1x4x16x32xf32>
    %30 = vector.shape_cast %29 : vector<1x1x4x16x32xf32> to vector<4x16x32xf32>
    %31 = vector.shape_cast %30 : vector<4x16x32xf32> to vector<64x32xf32>
    %c0_39 = arith.constant 0 : index
    %c192 = arith.constant 192 : index
    %32 = vector.load %arg10[%c0_39, %c192] : memref<64x800xf32, #tpu.memory_space<vmem>>, vector<64x32xf32>
    tpu.vector_store %arg10[%c0_39, %c192], %31 {strides = array<i32>} : memref<64x800xf32, #tpu.memory_space<vmem>>, vector<64x32xf32>,
    %c0_40 = arith.constant 0 : index
    %c0_41 = arith.constant 0 : index
    %c1_42 = arith.constant 1 : index
    %c2_43 = arith.constant 2 : index
    %c0_44 = arith.constant 0 : index
    %33 = vector.load %arg3[%c0_40, %c0_41, %c1_42, %c2_43, %c0_44] : memref<1x1x8x20x32xf32, #tpu.memory_space<vmem>>, vector<1x1x4x16x32xf32>
    %34 = vector.shape_cast %33 : vector<1x1x4x16x32xf32> to vector<4x16x32xf32>
    %35 = vector.shape_cast %34 : vector<4x16x32xf32> to vector<64x32xf32>
    %c0_45 = arith.constant 0 : index
    %c224 = arith.constant 224 : index
    %36 = vector.load %arg10[%c0_45, %c224] : memref<64x800xf32, #tpu.memory_space<vmem>>, vector<64x32xf32>
    tpu.vector_store %arg10[%c0_45, %c224], %35 {strides = array<i32>} : memref<64x800xf32, #tpu.memory_space<vmem>>, vector<64x32xf32>,
    %c0_46 = arith.constant 0 : index
    %c0_47 = arith.constant 0 : index
    %c1_48 = arith.constant 1 : index
    %c3_49 = arith.constant 3 : index
    %c0_50 = arith.constant 0 : index
    %37 = vector.load %arg3[%c0_46, %c0_47, %c1_48, %c3_49, %c0_50] : memref<1x1x8x20x32xf32, #tpu.memory_space<vmem>>, vector<1x1x4x16x32xf32>
    %38 = vector.shape_cast %37 : vector<1x1x4x16x32xf32> to vector<4x16x32xf32>
    %39 = vector.shape_cast %38 : vector<4x16x32xf32> to vector<64x32xf32>
    %c0_51 = arith.constant 0 : index
    %c256 = arith.constant 256 : index
    %40 = vector.load %arg10[%c0_51, %c256] : memref<64x800xf32, #tpu.memory_space<vmem>>, vector<64x32xf32>
    tpu.vector_store %arg10[%c0_51, %c256], %39 {strides = array<i32>} : memref<64x800xf32, #tpu.memory_space<vmem>>, vector<64x32xf32>,
    %c0_52 = arith.constant 0 : index
    %c0_53 = arith.constant 0 : index
    %c1_54 = arith.constant 1 : index
    %c4_55 = arith.constant 4 : index
    %c0_56 = arith.constant 0 : index
    %41 = vector.load %arg3[%c0_52, %c0_53, %c1_54, %c4_55, %c0_56] : memref<1x1x8x20x32xf32, #tpu.memory_space<vmem>>, vector<1x1x4x16x32xf32>
    %42 = vector.shape_cast %41 : vector<1x1x4x16x32xf32> to vector<4x16x32xf32>
    %43 = vector.shape_cast %42 : vector<4x16x32xf32> to vector<64x32xf32>
    %c0_57 = arith.constant 0 : index
    %c288 = arith.constant 288 : index
    %44 = vector.load %arg10[%c0_57, %c288] : memref<64x800xf32, #tpu.memory_space<vmem>>, vector<64x32xf32>
    tpu.vector_store %arg10[%c0_57, %c288], %43 {strides = array<i32>} : memref<64x800xf32, #tpu.memory_space<vmem>>, vector<64x32xf32>,
    %c0_58 = arith.constant 0 : index
    %c0_59 = arith.constant 0 : index
    %c2_60 = arith.constant 2 : index
    %c0_61 = arith.constant 0 : index
    %c0_62 = arith.constant 0 : index
    %45 = vector.load %arg3[%c0_58, %c0_59, %c2_60, %c0_61, %c0_62] : memref<1x1x8x20x32xf32, #tpu.memory_space<vmem>>, vector<1x1x4x16x32xf32>
    %46 = vector.shape_cast %45 : vector<1x1x4x16x32xf32> to vector<4x16x32xf32>
    %47 = vector.shape_cast %46 : vector<4x16x32xf32> to vector<64x32xf32>
    %c0_63 = arith.constant 0 : index
    %c320 = arith.constant 320 : index
    %48 = vector.load %arg10[%c0_63, %c320] : memref<64x800xf32, #tpu.memory_space<vmem>>, vector<64x32xf32>
    tpu.vector_store %arg10[%c0_63, %c320], %47 {strides = array<i32>} : memref<64x800xf32, #tpu.memory_space<vmem>>, vector<64x32xf32>,
    %c0_64 = arith.constant 0 : index
    %c0_65 = arith.constant 0 : index
    %c2_66 = arith.constant 2 : index
    %c1_67 = arith.constant 1 : index
    %c0_68 = arith.constant 0 : index
    %49 = vector.load %arg3[%c0_64, %c0_65, %c2_66, %c1_67, %c0_68] : memref<1x1x8x20x32xf32, #tpu.memory_space<vmem>>, vector<1x1x4x16x32xf32>
    %50 = vector.shape_cast %49 : vector<1x1x4x16x32xf32> to vector<4x16x32xf32>
    %51 = vector.shape_cast %50 : vector<4x16x32xf32> to vector<64x32xf32>
    %c0_69 = arith.constant 0 : index
    %c352 = arith.constant 352 : index
    %52 = vector.load %arg10[%c0_69, %c352] : memref<64x800xf32, #tpu.memory_space<vmem>>, vector<64x32xf32>
    tpu.vector_store %arg10[%c0_69, %c352], %51 {strides = array<i32>} : memref<64x800xf32, #tpu.memory_space<vmem>>, vector<64x32xf32>,
    %c0_70 = arith.constant 0 : index
    %c0_71 = arith.constant 0 : index
    %c2_72 = arith.constant 2 : index
    %c2_73 = arith.constant 2 : index
    %c0_74 = arith.constant 0 : index
    %53 = vector.load %arg3[%c0_70, %c0_71, %c2_72, %c2_73, %c0_74] : memref<1x1x8x20x32xf32, #tpu.memory_space<vmem>>, vector<1x1x4x16x32xf32>
    %54 = vector.shape_cast %53 : vector<1x1x4x16x32xf32> to vector<4x16x32xf32>
    %55 = vector.shape_cast %54 : vector<4x16x32xf32> to vector<64x32xf32>
    %c0_75 = arith.constant 0 : index
    %c384 = arith.constant 384 : index
    %56 = vector.load %arg10[%c0_75, %c384] : memref<64x800xf32, #tpu.memory_space<vmem>>, vector<64x32xf32>
    tpu.vector_store %arg10[%c0_75, %c384], %55 {strides = array<i32>} : memref<64x800xf32, #tpu.memory_space<vmem>>, vector<64x32xf32>,
    %c0_76 = arith.constant 0 : index
    %c0_77 = arith.constant 0 : index
    %c2_78 = arith.constant 2 : index
    %c3_79 = arith.constant 3 : index
    %c0_80 = arith.constant 0 : index
    %57 = vector.load %arg3[%c0_76, %c0_77, %c2_78, %c3_79, %c0_80] : memref<1x1x8x20x32xf32, #tpu.memory_space<vmem>>, vector<1x1x4x16x32xf32>
    %58 = vector.shape_cast %57 : vector<1x1x4x16x32xf32> to vector<4x16x32xf32>
    %59 = vector.shape_cast %58 : vector<4x16x32xf32> to vector<64x32xf32>
    %c0_81 = arith.constant 0 : index
    %c416 = arith.constant 416 : index
    %60 = vector.load %arg10[%c0_81, %c416] : memref<64x800xf32, #tpu.memory_space<vmem>>, vector<64x32xf32>
    tpu.vector_store %arg10[%c0_81, %c416], %59 {strides = array<i32>} : memref<64x800xf32, #tpu.memory_space<vmem>>, vector<64x32xf32>,
    %c0_82 = arith.constant 0 : index
    %c0_83 = arith.constant 0 : index
    %c2_84 = arith.constant 2 : index
    %c4_85 = arith.constant 4 : index
    %c0_86 = arith.constant 0 : index
    %61 = vector.load %arg3[%c0_82, %c0_83, %c2_84, %c4_85, %c0_86] : memref<1x1x8x20x32xf32, #tpu.memory_space<vmem>>, vector<1x1x4x16x32xf32>
    %62 = vector.shape_cast %61 : vector<1x1x4x16x32xf32> to vector<4x16x32xf32>
    %63 = vector.shape_cast %62 : vector<4x16x32xf32> to vector<64x32xf32>
    %c0_87 = arith.constant 0 : index
    %c448 = arith.constant 448 : index
    %64 = vector.load %arg10[%c0_87, %c448] : memref<64x800xf32, #tpu.memory_space<vmem>>, vector<64x32xf32>
    tpu.vector_store %arg10[%c0_87, %c448], %63 {strides = array<i32>} : memref<64x800xf32, #tpu.memory_space<vmem>>, vector<64x32xf32>,
    %c0_88 = arith.constant 0 : index
    %c0_89 = arith.constant 0 : index
    %c3_90 = arith.constant 3 : index
    %c0_91 = arith.constant 0 : index
    %c0_92 = arith.constant 0 : index
    %65 = vector.load %arg3[%c0_88, %c0_89, %c3_90, %c0_91, %c0_92] : memref<1x1x8x20x32xf32, #tpu.memory_space<vmem>>, vector<1x1x4x16x32xf32>
    %66 = vector.shape_cast %65 : vector<1x1x4x16x32xf32> to vector<4x16x32xf32>
    %67 = vector.shape_cast %66 : vector<4x16x32xf32> to vector<64x32xf32>
    %c0_93 = arith.constant 0 : index
    %c480 = arith.constant 480 : index
    %68 = vector.load %arg10[%c0_93, %c480] : memref<64x800xf32, #tpu.memory_space<vmem>>, vector<64x32xf32>
    tpu.vector_store %arg10[%c0_93, %c480], %67 {strides = array<i32>} : memref<64x800xf32, #tpu.memory_space<vmem>>, vector<64x32xf32>,
    %c0_94 = arith.constant 0 : index
    %c0_95 = arith.constant 0 : index
    %c3_96 = arith.constant 3 : index
    %c1_97 = arith.constant 1 : index
    %c0_98 = arith.constant 0 : index
    %69 = vector.load %arg3[%c0_94, %c0_95, %c3_96, %c1_97, %c0_98] : memref<1x1x8x20x32xf32, #tpu.memory_space<vmem>>, vector<1x1x4x16x32xf32>
    %70 = vector.shape_cast %69 : vector<1x1x4x16x32xf32> to vector<4x16x32xf32>
    %71 = vector.shape_cast %70 : vector<4x16x32xf32> to vector<64x32xf32>
    %c0_99 = arith.constant 0 : index
    %c512 = arith.constant 512 : index
    %72 = vector.load %arg10[%c0_99, %c512] : memref<64x800xf32, #tpu.memory_space<vmem>>, vector<64x32xf32>
    tpu.vector_store %arg10[%c0_99, %c512], %71 {strides = array<i32>} : memref<64x800xf32, #tpu.memory_space<vmem>>, vector<64x32xf32>,
    %c0_100 = arith.constant 0 : index
    %c0_101 = arith.constant 0 : index
    %c3_102 = arith.constant 3 : index
    %c2_103 = arith.constant 2 : index
    %c0_104 = arith.constant 0 : index
    %73 = vector.load %arg3[%c0_100, %c0_101, %c3_102, %c2_103, %c0_104] : memref<1x1x8x20x32xf32, #tpu.memory_space<vmem>>, vector<1x1x4x16x32xf32>
    %74 = vector.shape_cast %73 : vector<1x1x4x16x32xf32> to vector<4x16x32xf32>
    %75 = vector.shape_cast %74 : vector<4x16x32xf32> to vector<64x32xf32>
    %c0_105 = arith.constant 0 : index
    %c544 = arith.constant 544 : index
    %76 = vector.load %arg10[%c0_105, %c544] : memref<64x800xf32, #tpu.memory_space<vmem>>, vector<64x32xf32>
    tpu.vector_store %arg10[%c0_105, %c544], %75 {strides = array<i32>} : memref<64x800xf32, #tpu.memory_space<vmem>>, vector<64x32xf32>,
    %c0_106 = arith.constant 0 : index
    %c0_107 = arith.constant 0 : index
    %c3_108 = arith.constant 3 : index
    %c3_109 = arith.constant 3 : index
    %c0_110 = arith.constant 0 : index
    %77 = vector.load %arg3[%c0_106, %c0_107, %c3_108, %c3_109, %c0_110] : memref<1x1x8x20x32xf32, #tpu.memory_space<vmem>>, vector<1x1x4x16x32xf32>
    %78 = vector.shape_cast %77 : vector<1x1x4x16x32xf32> to vector<4x16x32xf32>
    %79 = vector.shape_cast %78 : vector<4x16x32xf32> to vector<64x32xf32>
    %c0_111 = arith.constant 0 : index
    %c576 = arith.constant 576 : index
    %80 = vector.load %arg10[%c0_111, %c576] : memref<64x800xf32, #tpu.memory_space<vmem>>, vector<64x32xf32>
    tpu.vector_store %arg10[%c0_111, %c576], %79 {strides = array<i32>} : memref<64x800xf32, #tpu.memory_space<vmem>>, vector<64x32xf32>,
    %c0_112 = arith.constant 0 : index
    %c0_113 = arith.constant 0 : index
    %c3_114 = arith.constant 3 : index
    %c4_115 = arith.constant 4 : index
    %c0_116 = arith.constant 0 : index
    %81 = vector.load %arg3[%c0_112, %c0_113, %c3_114, %c4_115, %c0_116] : memref<1x1x8x20x32xf32, #tpu.memory_space<vmem>>, vector<1x1x4x16x32xf32>
    %82 = vector.shape_cast %81 : vector<1x1x4x16x32xf32> to vector<4x16x32xf32>
    %83 = vector.shape_cast %82 : vector<4x16x32xf32> to vector<64x32xf32>
    %c0_117 = arith.constant 0 : index
    %c608 = arith.constant 608 : index
    %84 = vector.load %arg10[%c0_117, %c608] : memref<64x800xf32, #tpu.memory_space<vmem>>, vector<64x32xf32>
    tpu.vector_store %arg10[%c0_117, %c608], %83 {strides = array<i32>} : memref<64x800xf32, #tpu.memory_space<vmem>>, vector<64x32xf32>,
    %c0_118 = arith.constant 0 : index
    %c0_119 = arith.constant 0 : index
    %c4_120 = arith.constant 4 : index
    %c0_121 = arith.constant 0 : index
    %c0_122 = arith.constant 0 : index
    %85 = vector.load %arg3[%c0_118, %c0_119, %c4_120, %c0_121, %c0_122] : memref<1x1x8x20x32xf32, #tpu.memory_space<vmem>>, vector<1x1x4x16x32xf32>
    %86 = vector.shape_cast %85 : vector<1x1x4x16x32xf32> to vector<4x16x32xf32>
    %87 = vector.shape_cast %86 : vector<4x16x32xf32> to vector<64x32xf32>
    %c0_123 = arith.constant 0 : index
    %c640 = arith.constant 640 : index
    %88 = vector.load %arg10[%c0_123, %c640] : memref<64x800xf32, #tpu.memory_space<vmem>>, vector<64x32xf32>
    tpu.vector_store %arg10[%c0_123, %c640], %87 {strides = array<i32>} : memref<64x800xf32, #tpu.memory_space<vmem>>, vector<64x32xf32>,
    %c0_124 = arith.constant 0 : index
    %c0_125 = arith.constant 0 : index
    %c4_126 = arith.constant 4 : index
    %c1_127 = arith.constant 1 : index
    %c0_128 = arith.constant 0 : index
    %89 = vector.load %arg3[%c0_124, %c0_125, %c4_126, %c1_127, %c0_128] : memref<1x1x8x20x32xf32, #tpu.memory_space<vmem>>, vector<1x1x4x16x32xf32>
    %90 = vector.shape_cast %89 : vector<1x1x4x16x32xf32> to vector<4x16x32xf32>
    %91 = vector.shape_cast %90 : vector<4x16x32xf32> to vector<64x32xf32>
    %c0_129 = arith.constant 0 : index
    %c672 = arith.constant 672 : index
    %92 = vector.load %arg10[%c0_129, %c672] : memref<64x800xf32, #tpu.memory_space<vmem>>, vector<64x32xf32>
    tpu.vector_store %arg10[%c0_129, %c672], %91 {strides = array<i32>} : memref<64x800xf32, #tpu.memory_space<vmem>>, vector<64x32xf32>,
    %c0_130 = arith.constant 0 : index
    %c0_131 = arith.constant 0 : index
    %c4_132 = arith.constant 4 : index
    %c2_133 = arith.constant 2 : index
    %c0_134 = arith.constant 0 : index
    %93 = vector.load %arg3[%c0_130, %c0_131, %c4_132, %c2_133, %c0_134] : memref<1x1x8x20x32xf32, #tpu.memory_space<vmem>>, vector<1x1x4x16x32xf32>
    %94 = vector.shape_cast %93 : vector<1x1x4x16x32xf32> to vector<4x16x32xf32>
    %95 = vector.shape_cast %94 : vector<4x16x32xf32> to vector<64x32xf32>
    %c0_135 = arith.constant 0 : index
    %c704 = arith.constant 704 : index
    %96 = vector.load %arg10[%c0_135, %c704] : memref<64x800xf32, #tpu.memory_space<vmem>>, vector<64x32xf32>
    tpu.vector_store %arg10[%c0_135, %c704], %95 {strides = array<i32>} : memref<64x800xf32, #tpu.memory_space<vmem>>, vector<64x32xf32>,
    %c0_136 = arith.constant 0 : index
    %c0_137 = arith.constant 0 : index
    %c4_138 = arith.constant 4 : index
    %c3_139 = arith.constant 3 : index
    %c0_140 = arith.constant 0 : index
    %97 = vector.load %arg3[%c0_136, %c0_137, %c4_138, %c3_139, %c0_140] : memref<1x1x8x20x32xf32, #tpu.memory_space<vmem>>, vector<1x1x4x16x32xf32>
    %98 = vector.shape_cast %97 : vector<1x1x4x16x32xf32> to vector<4x16x32xf32>
    %99 = vector.shape_cast %98 : vector<4x16x32xf32> to vector<64x32xf32>
    %c0_141 = arith.constant 0 : index
    %c736 = arith.constant 736 : index
    %100 = vector.load %arg10[%c0_141, %c736] : memref<64x800xf32, #tpu.memory_space<vmem>>, vector<64x32xf32>
    tpu.vector_store %arg10[%c0_141, %c736], %99 {strides = array<i32>} : memref<64x800xf32, #tpu.memory_space<vmem>>, vector<64x32xf32>,
    %c0_142 = arith.constant 0 : index
    %c0_143 = arith.constant 0 : index
    %c4_144 = arith.constant 4 : index
    %c4_145 = arith.constant 4 : index
    %c0_146 = arith.constant 0 : index
    %101 = vector.load %arg3[%c0_142, %c0_143, %c4_144, %c4_145, %c0_146] : memref<1x1x8x20x32xf32, #tpu.memory_space<vmem>>, vector<1x1x4x16x32xf32>
    %102 = vector.shape_cast %101 : vector<1x1x4x16x32xf32> to vector<4x16x32xf32>
    %103 = vector.shape_cast %102 : vector<4x16x32xf32> to vector<64x32xf32>
    %c0_147 = arith.constant 0 : index
    %c768 = arith.constant 768 : index
    %104 = vector.load %arg10[%c0_147, %c768] : memref<64x800xf32, #tpu.memory_space<vmem>>, vector<64x32xf32>
    tpu.vector_store %arg10[%c0_147, %c768], %103 {strides = array<i32>} : memref<64x800xf32, #tpu.memory_space<vmem>>, vector<64x32xf32>,
    %c0_148 = arith.constant 0 : index
    %c0_149 = arith.constant 0 : index
    %105 = vector.load %arg10[%c0_148, %c0_149] : memref<64x800xf32, #tpu.memory_space<vmem>>, vector<64x800xf32>
    %c0_150 = arith.constant 0 : index
    %c0_151 = arith.constant 0 : index
    %106 = vector.load %arg4[%c0_150, %c0_151] : memref<800x32xf32, #tpu.memory_space<vmem>>, vector<800x32xf32>
    %cst = arith.constant dense<0.000000e+00> : vector<64x32xf32>
    %107 = tpu.matmul %105, %106, %cst {dimension_numbers = #tpu.dot_dimension_numbers<[1], [0], [0], [1], [0, 0, 1, 1], [], []>} : vector<64x800xf32>, vector<800x32xf32>, vector<64x32xf32> -> vector<64x32xf32>
    %c0_i32_152 = arith.constant 0 : i32
    %108 = arith.cmpi eq, %arg1, %c0_i32_152 : i32
    %109 = arith.extui %108 : i1 to i32
    %c0_i32_153 = arith.constant 0 : i32
    %110 = arith.cmpi ne, %109, %c0_i32_153 : i32
    scf.if %110 {
      %c0_157 = arith.constant 0 : index
      %c0_158 = arith.constant 0 : index
      %119 = vector.load %arg11[%c0_157, %c0_158] : memref<1x32xf32, #tpu.memory_space<vmem>>, vector<1x32xf32>
      %cst_159 = arith.constant dense<0.000000e+00> : vector<32xf32>
      %120 = vector.multi_reduction <add>, %107, %cst_159 [0] : vector<64x32xf32> to vector<32xf32>
      %121 = vector.shape_cast %120 : vector<32xf32> to vector<1x32xf32>
      %122 = arith.addf %119, %121 : vector<1x32xf32>
      %c0_160 = arith.constant 0 : index
      %c0_161 = arith.constant 0 : index
      %123 = vector.load %arg11[%c0_160, %c0_161] : memref<1x32xf32, #tpu.memory_space<vmem>>, vector<1x32xf32>
      tpu.vector_store %arg11[%c0_160, %c0_161], %122 {strides = array<i32>} : memref<1x32xf32, #tpu.memory_space<vmem>>, vector<1x32xf32>,
      %c0_162 = arith.constant 0 : index
      %c0_163 = arith.constant 0 : index
      %124 = vector.load %arg12[%c0_162, %c0_163] : memref<1x32xf32, #tpu.memory_space<vmem>>, vector<1x32xf32>
      %125 = arith.mulf %107, %107 : vector<64x32xf32>
      %cst_164 = arith.constant dense<0.000000e+00> : vector<32xf32>
      %126 = vector.multi_reduction <add>, %125, %cst_164 [0] : vector<64x32xf32> to vector<32xf32>
      %127 = vector.shape_cast %126 : vector<32xf32> to vector<1x32xf32>
      %128 = arith.addf %124, %127 : vector<1x32xf32>
      %c0_165 = arith.constant 0 : index
      %c0_166 = arith.constant 0 : index
      %129 = vector.load %arg12[%c0_165, %c0_166] : memref<1x32xf32, #tpu.memory_space<vmem>>, vector<1x32xf32>
      tpu.vector_store %arg12[%c0_165, %c0_166], %128 {strides = array<i32>} : memref<1x32xf32, #tpu.memory_space<vmem>>, vector<1x32xf32>,
    } else {
    }
    %c0_i32_154 = arith.constant 0 : i32
    %111 = arith.cmpi eq, %arg1, %c0_i32_154 : i32
    %c3_i32 = arith.constant 3 : i32
    %112 = arith.cmpi eq, %arg2, %c3_i32 : i32
    %113 = arith.andi %111, %112 : i1
    %114 = arith.extui %113 : i1 to i32
    %c0_i32_155 = arith.constant 0 : i32
    %115 = arith.cmpi ne, %114, %c0_i32_155 : i32
    scf.if %115 {
      %c0_157 = arith.constant 0 : index
      %c0_158 = arith.constant 0 : index
      %119 = vector.load %arg5[%c0_157, %c0_158] : memref<1x32xf32, #tpu.memory_space<vmem>>, vector<1x32xf32>
      %c0_159 = arith.constant 0 : index
      %c0_160 = arith.constant 0 : index
      %120 = vector.load %arg11[%c0_159, %c0_160] : memref<1x32xf32, #tpu.memory_space<vmem>>, vector<1x32xf32>
      %cst_161 = arith.constant 2.560000e+02 : f32
      %121 = vector.broadcast %cst_161 : f32 to vector<1x32xf32>
      %122 = arith.mulf %121, %119 : vector<1x32xf32>
      %123 = arith.addf %120, %122 : vector<1x32xf32>
      %c0_162 = arith.constant 0 : index
      %c0_163 = arith.constant 0 : index
      %124 = vector.load %arg12[%c0_162, %c0_163] : memref<1x32xf32, #tpu.memory_space<vmem>>, vector<1x32xf32>
      %cst_164 = arith.constant 2.000000e+00 : f32
      %125 = vector.broadcast %cst_164 : f32 to vector<1x32xf32>
      %126 = arith.mulf %125, %119 : vector<1x32xf32>
      %c0_165 = arith.constant 0 : index
      %c0_166 = arith.constant 0 : index
      %127 = vector.load %arg11[%c0_165, %c0_166] : memref<1x32xf32, #tpu.memory_space<vmem>>, vector<1x32xf32>
      %128 = arith.mulf %126, %127 : vector<1x32xf32>
      %129 = arith.addf %124, %128 : vector<1x32xf32>
      %130 = arith.mulf %119, %119 : vector<1x32xf32>
      %cst_167 = arith.constant 2.560000e+02 : f32
      %131 = vector.broadcast %cst_167 : f32 to vector<1x32xf32>
      %132 = arith.mulf %131, %130 : vector<1x32xf32>
      %133 = arith.addf %129, %132 : vector<1x32xf32>
      %cst_168 = arith.constant 2.560000e+02 : f32
      %134 = vector.broadcast %cst_168 : f32 to vector<1x32xf32>
      %135 = arith.divf %123, %134 : vector<1x32xf32>
      %cst_169 = arith.constant 2.560000e+02 : f32
      %136 = vector.broadcast %cst_169 : f32 to vector<1x32xf32>
      %137 = arith.divf %133, %136 : vector<1x32xf32>
      %138 = arith.mulf %135, %135 : vector<1x32xf32>
      %139 = arith.subf %137, %138 : vector<1x32xf32>
      %cst_170 = arith.constant 9.99999974E-6 : f32
      %140 = vector.broadcast %cst_170 : f32 to vector<1x32xf32>
      %141 = arith.addf %139, %140 : vector<1x32xf32>
      %142 = math.rsqrt %141 : vector<1x32xf32>
      %c0_171 = arith.constant 0 : index
      %c0_172 = arith.constant 0 : index
      %143 = vector.load %arg6[%c0_171, %c0_172] : memref<1x32xf32, #tpu.memory_space<vmem>>, vector<1x32xf32>
      %144 = arith.mulf %142, %143 : vector<1x32xf32>
      %c0_173 = arith.constant 0 : index
      %c0_174 = arith.constant 0 : index
      %145 = vector.load %arg13[%c0_173, %c0_174] : memref<1x32xf32, #tpu.memory_space<vmem>>, vector<1x32xf32>
      tpu.vector_store %arg13[%c0_173, %c0_174], %144 {strides = array<i32>} : memref<1x32xf32, #tpu.memory_space<vmem>>, vector<1x32xf32>,
      %c0_175 = arith.constant 0 : index
      %c0_176 = arith.constant 0 : index
      %146 = vector.load %arg7[%c0_175, %c0_176] : memref<1x32xf32, #tpu.memory_space<vmem>>, vector<1x32xf32>
      %147 = arith.subf %119, %135 : vector<1x32xf32>
      %148 = arith.mulf %147, %144 : vector<1x32xf32>
      %149 = arith.addf %146, %148 : vector<1x32xf32>
      %c0_177 = arith.constant 0 : index
      %c0_178 = arith.constant 0 : index
      %150 = vector.load %arg14[%c0_177, %c0_178] : memref<1x32xf32, #tpu.memory_space<vmem>>, vector<1x32xf32>
      tpu.vector_store %arg14[%c0_177, %c0_178], %149 {strides = array<i32>} : memref<1x32xf32, #tpu.memory_space<vmem>>, vector<1x32xf32>,
    } else {
    }
    %c1_i32 = arith.constant 1 : i32
    %116 = arith.cmpi eq, %arg1, %c1_i32 : i32
    %117 = arith.extui %116 : i1 to i32
    %c0_i32_156 = arith.constant 0 : i32
    %118 = arith.cmpi ne, %117, %c0_i32_156 : i32
    scf.if %118 {
      %c0_157 = arith.constant 0 : index
      %c0_158 = arith.constant 0 : index
      %119 = vector.load %arg13[%c0_157, %c0_158] : memref<1x32xf32, #tpu.memory_space<vmem>>, vector<1x32xf32>
      %120 = vector.broadcast %119 : vector<1x32xf32> to vector<64x32xf32>
      %121 = arith.mulf %107, %120 : vector<64x32xf32>
      %c0_159 = arith.constant 0 : index
      %c0_160 = arith.constant 0 : index
      %122 = vector.load %arg14[%c0_159, %c0_160] : memref<1x32xf32, #tpu.memory_space<vmem>>, vector<1x32xf32>
      %123 = vector.broadcast %122 : vector<1x32xf32> to vector<64x32xf32>
      %124 = arith.addf %121, %123 : vector<64x32xf32>
      %cst_161 = arith.constant 0.000000e+00 : f32
      %125 = vector.broadcast %cst_161 : f32 to vector<64x32xf32>
      %126 = arith.subf %125, %124 : vector<64x32xf32>
      %127 = math.exp %126 : vector<64x32xf32>
      %cst_162 = arith.constant 1.000000e+00 : f32
      %128 = vector.broadcast %cst_162 : f32 to vector<64x32xf32>
      %129 = arith.addf %128, %127 : vector<64x32xf32>
      %130 = tpu.reciprocal %129 {approx = true} : vector<64x32xf32> -> vector<64x32xf32>
      %131 = arith.mulf %124, %130 : vector<64x32xf32>
      %c0_163 = arith.constant 0 : index
      %c0_164 = arith.constant 0 : index
      %c0_165 = arith.constant 0 : index
      %132 = vector.load %arg8[%c0_163, %c0_164, %c0_165] : memref<1x64x32xf32, #tpu.memory_space<vmem>>, vector<1x64x32xf32>
      %133 = vector.shape_cast %132 : vector<1x64x32xf32> to vector<64x32xf32>
      %134 = arith.addf %131, %133 : vector<64x32xf32>
      %c0_166 = arith.constant 0 : index
      %c0_167 = arith.constant 0 : index
      %c0_168 = arith.constant 0 : index
      %135 = vector.load %arg9[%c0_166, %c0_167, %c0_168] : memref<1x64x32xf32, #tpu.memory_space<vmem>>, vector<1x64x32xf32>
      %136 = vector.shape_cast %135 : vector<1x64x32xf32> to vector<64x32xf32>
      %137 = vector.shape_cast %134 : vector<64x32xf32> to vector<1x64x32xf32>
      tpu.vector_store %arg9[%c0_166, %c0_167, %c0_168], %137 {strides = array<i32>} : memref<1x64x32xf32, #tpu.memory_space<vmem>>, vector<1x64x32xf32>,
    } else {
    }
    return
  }
  func.func @transform_0(%arg0: i32, %arg1: i32, %arg2: i32) -> (i32, i32, i32, i32, i32) {
    %c0_i32 = arith.constant 0 : i32
    %c0_i32_0 = arith.constant 0 : i32
    %c0_i32_1 = arith.constant 0 : i32
    %c0_i32_2 = arith.constant 0 : i32
    return %arg0, %arg2, %c0_i32, %c0_i32_0, %c0_i32_1 : i32, i32, i32, i32, i32
  }
  func.func @transform_1(%arg0: i32, %arg1: i32, %arg2: i32) -> (i32, i32) {
    %c0_i32 = arith.constant 0 : i32
    %c0_i32_0 = arith.constant 0 : i32
    %c0_i32_1 = arith.constant 0 : i32
    return %c0_i32, %c0_i32_0 : i32, i32
  }
  func.func @transform_2(%arg0: i32, %arg1: i32, %arg2: i32) -> (i32, i32) {
    %c0_i32 = arith.constant 0 : i32
    %c0_i32_0 = arith.constant 0 : i32
    %c0_i32_1 = arith.constant 0 : i32
    return %c0_i32, %c0_i32_0 : i32, i32
  }
  func.func @transform_3(%arg0: i32, %arg1: i32, %arg2: i32) -> (i32, i32) {
    %c0_i32 = arith.constant 0 : i32
    %c0_i32_0 = arith.constant 0 : i32
    %c0_i32_1 = arith.constant 0 : i32
    return %c0_i32, %c0_i32_0 : i32, i32
  }
  func.func @transform_4(%arg0: i32, %arg1: i32, %arg2: i32) -> (i32, i32) {
    %c0_i32 = arith.constant 0 : i32
    %c0_i32_0 = arith.constant 0 : i32
    %c0_i32_1 = arith.constant 0 : i32
    return %c0_i32, %c0_i32_0 : i32, i32
  }
  func.func @transform_5(%arg0: i32, %arg1: i32, %arg2: i32) -> (i32, i32, i32) {
    %0 = arith.muli %arg1, %arg2 : i32
    %c0_i32 = arith.constant 0 : i32
    %c0_i32_0 = arith.constant 0 : i32
    return %arg0, %0, %c0_i32 : i32, i32, i32
  }
  func.func @transform_6(%arg0: i32, %arg1: i32, %arg2: i32) -> (i32, i32, i32) {
    %0 = arith.muli %arg1, %arg2 : i32
    %c0_i32 = arith.constant 0 : i32
    %c0_i32_0 = arith.constant 0 : i32
    return %arg0, %0, %c0_i32 : i32, i32, i32
  }
}

</mosaic_0001>

<bundles_post_ra>
// kernel: tpu_custom_call.1
= control target key start
LH: loop header
LB: loop body
LE: loop exit
PB: predicated region body
PF: predicated region fallthrough
CT: control target
= control target key end

     0   :  { %s4784_s0 = inlined_call_operand.hbm [shape: f32[2,4,8,20,32], index: 0, kind: input, shape index: {}]   ;;  %s4785_s1 = inlined_call_operand.hbm [shape: f32[800,32], index: 1, kind: input, shape index: {}]   ;;  %s4786_s2 = inlined_call_operand.hbm [shape: f32[1,32], index: 2, kind: input, shape index: {}]   ;;  %s4787_s3 = inlined_call_operand.hbm [shape: f32[1,32], index: 3, kind: input, shape index: {}]   ;;  %s4788_s4 = inlined_call_operand.hbm [shape: f32[1,32], index: 4, kind: input, shape index: {}]   ;;  %s4789_s5 = inlined_call_operand.hbm [shape: f32[2,256,32], index: 5, kind: input, shape index: {}]   ;;  %s4790_s6 = inlined_call_operand.hbm [shape: f32[2,256,32], index: 6, kind: output, shape index: {}]  }
   0x1   :  { %4810 = sst [smem:[#allocation34_spill]] %s4784_s0 }
   0x2   :  { %4811 = sst [smem:[#allocation35_spill]] %s4785_s1 }
   0x3   :  { %4812 = sst [smem:[#allocation36_spill]] %s4786_s2 }
   0x4   :  { %4813 = sst [smem:[#allocation37_spill]] %s4787_s3 }
   0x5   :  { %4814 = sst [smem:[#allocation38_spill]] %s4788_s4 }
   0x6   :  { %4815 = sst [smem:[#allocation39_spill]] %s4789_s5 }
   0x7   :  { %4816 = sst [smem:[#allocation40_spill]] %s4790_s6 }
   0x8   :  { %11 = vsyncpa [#allocation8], 0 }
   0x9   :  { %13 = vsyncpa [#allocation8 + $0x1], 0 }
   0xa   :  { %14 = vsyncpa [#allocation11], 0 }
   0xb   :  { %15 = vsyncpa [#allocation14], 0 }
   0xc   :  { %16 = vsyncpa [#allocation17], 0 }
   0xd   :  { %18 = vsyncpa [#allocation17 + $0x1], 0 }
   0xe   :  { %19 = vsyncpa [#allocation9], 0 }
   0xf   :  { %21 = vsyncpa [#allocation9 + $0x1], 0  ;;  %s3470_s21 = smov 0   ;;  %s3472_s22 = smov 0  }
  0x10   :  { %s3474_s23 = smov 0   ;;  %s3476_s24 = smov 0  }
  0x11   :  { %s3478_s25 = smov 0   ;;  %s3480_s26 = smov 0  }
  0x12   :  { %s3482_s27 = smov 0   ;;  %s3484_s28 = smov 0  }
  0x13   :  { %s3486_s29 = smov 0   ;;  %s3488_s30 = smov 0  }
  0x14   :  { %s3490_s7 = smov 0   ;;  %s3492_s8 = smov 0  }
  0x15   :  { %s3494_s9 = smov 0  }
  0x16 LB: > { %4817 = sst [smem:[#allocation24_spill]] %s3370_s21  ;;  %s2368_s10 = sadd.s32 4294967295, %s3418_s9   ;;  %s3418_s9 = sphi %s3494_s9, %s27_s9   ;;  %s3414_s8 = sphi %s3492_s8, %s4885_s8   ;;  %s3410_s7 = sphi %s3490_s7, %s4876_s7   ;;  %s3406_s30 = sphi %s3488_s30, %s4875_s30   ;;  %s3402_s29 = sphi %s3486_s29, %s4884_s29   ;;  %s3398_s28 = sphi %s3484_s28, %s4874_s28   ;;  %s3394_s27 = sphi %s3482_s27, %s4873_s27   ;;  %s3390_s26 = sphi %s3480_s26, %s4883_s26   ;;  %s3386_s25 = sphi %s3478_s25, %s4882_s25   ;;  %s3382_s24 = sphi %s3476_s24, %s4881_s24   ;;  %s3378_s23 = sphi %s3474_s23, %s4880_s23   ;;  %s3374_s22 = sphi %s3472_s22, %s4879_s22   ;;  %s3370_s21 = sphi %s3470_s21, %s4878_s21  }
  0x17   : > { %4818 = sst [smem:[#allocation25_spill]] %s3394_s27  ;;  %p2370_p0 = scmp.ge.s32.totalorder %s3418_s9, 1 }
  0x18   : > { %4819 = sst [smem:[#allocation26_spill]] %s3398_s28  ;;  %p3537_p1 = scmp.eq.s32.totalorder %s2368_s10, 0 }
  0x19   : > { %4820 = sst [smem:[#allocation27_spill]] %s3402_s29  ;;  %p3541_p2 = scmp.eq.s32.totalorder %s2368_s10, 15 }
  0x1a   : > { %4821 = sst [smem:[#allocation28_spill]] %s3406_s30  ;;  %p223_p3 = scmp.lt.s32.totalorder %s3418_s9, 17 }
  0x1b   : > { %4822 = sst [smem:[#allocation29_spill]] %s3410_s7  ;;  %s3420_s14 = smov [#allocation10]  }
  0x1c   : > { %s4823_s11 = scalar_select %p3537_p1, 1, 0 }
  0x1d   : > { %s4824_s12 = scalar_select %p3541_p2, 1, 0 }
  0x1e   : > { %p3546_p4 = pnand %p2370_p0, %p223_p3  ;;  %s235_s15 = sshll.u32 %s3420_s14, 4  ;;  %s3550_s15 = int_to_ptr.vmem [resolvable:$true] %s235_s15 }
  0x1f   : > { %4825 = sst [smem:[#allocation30_spill]] %s4824_s12  ;;  %s3421_s17 = smov [#allocation13]  }
  0x20   : > { %s4826_s13 = scalar_select %p3546_p4, 1, 0 }
  0x21   : > { %p2912_p5 = pneg %p3546_p4  ;;  %s260_s18 = sshll.u32 %s3421_s17, 4  ;;  %s3560_s18 = int_to_ptr.vmem [resolvable:$true] %s260_s18 }
  0x22   : > { %4827 = sst [smem:[#allocation31_spill]] %s4826_s13  ;;  %s3422_s19 = smov [#allocation12]  }
  0x23   : > { %p3556_p6 = pnand %p2912_p5, %p3537_p1  ;;  %s249_s20 = sshll.u32 %s3422_s19, 4  ;;  %s3562_s20 = int_to_ptr.vmem [resolvable:$true] %s249_s20 }
  0x24   : > { %s4829_s1 = sld [smem:[#allocation35_spill]] }
  0x25   : > { %p3572_p8 = pneg %p3556_p6 }
  0x2a   : > { %s3096_s6 = scalar_lea.hbm %s4829_s1, 12800 }
  0x2b   : > { %p3097_p7 = scmp.ne.s32.totalorder %s4829_s1, %s3096_s6  ;;  %p3103_p11 = scmp.lt.u32.totalorder %s3096_s6, %s4829_s1 }
  0x2d   : > { %p3099_p9 = pnand %p3572_p8, %p3097_p7 }
  0x2f   : > { %p3100_p10 = pneg %p3099_p9 }
  0x31   : > { %p3105_p12 = pnand %p3103_p11, %p3100_p10 }
  0x33   : > { %3108 = shalt.err (!%p3105_p12)
}
  0x34   : > { %s3109_s27 = scalar_lea.vmem %s3550_s15, 12800  ;;  %p3117_p5 = scmp.lt.s32.totalorder %s3550_s15, %s3550_s15 }
  0x35   : > { %p3110_p13 = scmp.ne.s32.totalorder %s3550_s15, %s3109_s27  ;;  %p3118_p4 = scmp.lt.s32.totalorder %s3109_s27, %s3109_s27 }
  0x37   : > { %p3112_p0 = pnand %p3110_p13, %p3572_p8  ;;  %p3119_p7 = por %p3118_p4, %p3117_p5 }
  0x39   : > { %p3113_p3 = pneg %p3112_p0 }
  0x3b   : > { %p3120_p9 = pnand %p3119_p7, %p3113_p3 }
  0x3d   : > { %3123 = shalt.err (!%p3120_p9)
}
  0x3e   : > { %s4803_s29 = smov 128   ;;  %s4804_s6 = smov 8  }
  0x3f   : > { %2915 = dma.hbm_to_vmem [thread:$0]  (!%p3556_p6), %s4829_s1, 12800, %s3550_s15, [#allocation11], %s4803_s29, %s4803_s29, %s4804_s6  }
  0x40   : > { %s4831_s3 = sld [smem:[#allocation37_spill]] }
  0x46   : > { %s3124_s27 = scalar_lea.hbm %s4831_s3, 16 }
  0x47   : > { %p3125_p4 = scmp.ne.s32.totalorder %s4831_s3, %s3124_s27  ;;  %p3131_p12 = scmp.lt.u32.totalorder %s3124_s27, %s4831_s3 }
  0x49   : > { %p3127_p10 = pnand %p3125_p4, %p3572_p8 }
  0x4b   : > { %p3128_p11 = pneg %p3127_p10 }
  0x4d   : > { %p3133_p13 = pnand %p3131_p12, %p3128_p11 }
  0x4f   : > { %3136 = shalt.err (!%p3133_p13)
}
  0x50   : > { %s3137_s15 = scalar_lea.vmem %s3560_s18, 16  ;;  %s3144_s5 = scalar_lea.vmem %s3560_s18, 32 }
  0x51   : > { %p3138_p0 = scmp.ne.s32.totalorder %s3560_s18, %s3137_s15  ;;  %p3145_p7 = scmp.lt.s32.totalorder %s3560_s18, %s3560_s18 }
  0x52   : > { %p3146_p9 = scmp.lt.s32.totalorder %s3144_s5, %s3137_s15 }
  0x53   : > { %p3140_p3 = pnand %p3138_p0, %p3572_p8 }
  0x54   : > { %p3147_p4 = por %p3146_p9, %p3145_p7 }
  0x55   : > { %p3141_p5 = pneg %p3140_p3 }
  0x57   : > { %p3148_p10 = pnand %p3147_p4, %p3141_p5 }
  0x59   : > { %3151 = shalt.err (!%p3148_p10)
}
  0x5a   : > { %2921 = dma.hbm_to_vmem [thread:$0]  (!%p3556_p6), %s4831_s3, 16, %s3560_s18, [#allocation14]  }
  0x5b   : > { %s4832_s2 = sld [smem:[#allocation36_spill]] }
  0x61   : > { %s3152_s14 = scalar_lea.hbm %s4832_s2, 16 }
  0x62   : > { %p3153_p11 = scmp.ne.s32.totalorder %s4832_s2, %s3152_s14  ;;  %p3159_p0 = scmp.lt.u32.totalorder %s3152_s14, %s4832_s2 }
  0x64   : > { %p3155_p12 = pnand %p3153_p11, %p3572_p8 }
  0x66   : > { %p3156_p13 = pneg %p3155_p12 }
  0x68   : > { %p3161_p3 = pnand %p3159_p0, %p3156_p13 }
  0x6a   : > { %3164 = shalt.err (!%p3161_p3)
}
  0x6b   : > { %s3165_s18 = scalar_lea.vmem %s3562_s20, 16  ;;  %s3172_s5 = scalar_lea.vmem %s3562_s20, 32 }
  0x6c   : > { %p3166_p5 = scmp.ne.s32.totalorder %s3562_s20, %s3165_s18  ;;  %p3173_p4 = scmp.lt.s32.totalorder %s3562_s20, %s3562_s20 }
  0x6d   : > { %p3174_p10 = scmp.lt.s32.totalorder %s3172_s5, %s3165_s18 }
  0x6e   : > { %p3168_p7 = pnand %p3166_p5, %p3572_p8 }
  0x6f   : > { %p3175_p11 = por %p3174_p10, %p3173_p4 }
  0x70   : > { %p3169_p9 = pneg %p3168_p7 }
  0x72   : > { %p3176_p12 = pnand %p3175_p11, %p3169_p9 }
  0x74   : > { %3179 = shalt.err (!%p3176_p12)
}
  0x75   : > { %2918 = dma.hbm_to_vmem [thread:$0]  (!%p3556_p6), %s4832_s2, 16, %s3562_s20, [#allocation11]  }
  0x76   : > { %s3425_s13 = smov [#allocation15]   ;;  %s4833_s4 = sld [smem:[#allocation38_spill]] }
  0x77   : > { %s271_s10 = sshll.u32 %s3425_s13, 4  ;;  %s272_s10 = int_to_ptr.vmem [resolvable:$true] %s271_s10 }
  0x7c   : > { %s3180_s19 = scalar_lea.hbm %s4833_s4, 16 }
  0x7d   : > { %p3181_p13 = scmp.ne.s32.totalorder %s4833_s4, %s3180_s19  ;;  %p3187_p5 = scmp.lt.u32.totalorder %s3180_s19, %s4833_s4 }
  0x7f   : > { %p3183_p0 = pnand %p3181_p13, %p3572_p8 }
  0x81   : > { %p3184_p3 = pneg %p3183_p0 }
  0x83   : > { %p3189_p7 = pnand %p3187_p5, %p3184_p3 }
  0x85   : > { %3192 = shalt.err (!%p3189_p7)
}
  0x86   : > { %s3193_s20 = scalar_lea.vmem %s272_s10, 16  ;;  %s3200_s21 = scalar_lea.vmem %s272_s10, 32 }
  0x87   : > { %p3194_p9 = scmp.ne.s32.totalorder %s272_s10, %s3193_s20  ;;  %p3201_p11 = scmp.lt.s32.totalorder %s272_s10, %s272_s10 }
  0x88   : > { %p3202_p12 = scmp.lt.s32.totalorder %s3200_s21, %s3193_s20 }
  0x89   : > { %p3196_p4 = pnand %p3194_p9, %p3572_p8 }
  0x8a   : > { %p3203_p2 = por %p3202_p12, %p3201_p11 }
  0x8b   : > { %p3197_p10 = pneg %p3196_p4 }
  0x8d   : > { %p3204_p1 = pnand %p3203_p2, %p3197_p10 }
  0x8f   : > { %3207 = shalt.err (!%p3204_p1)
}
  0x90   : > { %2924 = dma.hbm_to_vmem [thread:$0]  (!%p3556_p6), %s4833_s4, 16, %s272_s10, [#allocation14]  }
  0x91   : > { %p62_p1 = scmp.ne.s32.totalorder %s3390_s26, %s3386_s25  ;;  %p4801_p2 = scmp.eq.s32.totalorder %s3418_s9, 0 }
  0x92   : > { %p68_p8 = scmp.ne.s32.totalorder %s3386_s25, %s3382_s24  ;;  %p4800_p13 = scmp.lt.s32.totalorder %s3418_s9, 16 }
  0x93   : > { %p64_p0 = por %p4801_p2, %p62_p1  ;;  %s282_s16 = sand.u32 1, %s3390_s26  }
  0x94   : > { %p4834_p3 = scmp.ne.s32.totalorder %s4823_s11, 0  ;;  %s2886_s17 = smul.u32 192, %s282_s16 }
  0x95   : > { %p3680_p7 = pnand %p4800_p13, %p64_p0  ;;  %s2887_s10 = smul.u32 24, %s3406_s30 }
  0x96   : > { %p3674_p5 = por %p4834_p3, %p68_p8  ;;  %s2888_s27 = smul.u32 96, %s3414_s8 }
  0x97   : > { %s286_s24 = scalar_lea.vmem [#allocation7], %s2886_s17  ;;  %s4837_s0 = sld [smem:[#allocation34_spill]] }
  0x98   : > { %s4835_s14 = scalar_select %p3674_p5, 1, 0 }
  0x99   : > { %s295_s15 = sshll.u32 %s286_s24, 4  ;;  %s292_s18 = sadd.s32 %s2888_s27, %s2887_s10  ;;  %s3686_s15 = int_to_ptr.vmem [resolvable:$true] %s295_s15 }
  0x9a   : > { %s2376_s5 = sshll.u32 %s292_s18, 7  ;;  %s3693_s13 = scalar_lea.sflag [#allocation8], %s282_s16 }
  0x9b   : > { %p3210_p9 = pneg %p3680_p7 }
  0x9d   : > { %s3691_s12 = scalar_lea.hbm %s4837_s0, %s2376_s5  ;;  %s3213_s27 = scalar_lea.hbm %s4837_s0, 24576 }
  0x9e   : > { %s3208_s28 = scalar_lea.hbm %s3691_s12, 3072  ;;  %p3214_p11 = scmp.lt.u32.totalorder %s3691_s12, %s4837_s0 }
  0x9f   : > { %p3209_p6 = scmp.ne.s32.totalorder %s3691_s12, %s3208_s28  ;;  %p3215_p12 = scmp.lt.u32.totalorder %s3213_s27, %s3208_s28 }
  0xa0   : > { %p3217_p8 = scmp.lt.u32.totalorder %s3208_s28, %s3691_s12 }
  0xa1   : > { %p3211_p4 = pnand %p3210_p9, %p3209_p6  ;;  %p3216_p1 = por %p3215_p12, %p3214_p11 }
  0xa3   : > { %p3212_p10 = pneg %p3211_p4  ;;  %p3218_p0 = por %p3217_p8, %p3216_p1 }
  0xa5   : > { %p3219_p13 = pnand %p3218_p0, %p3212_p10 }
  0xa7   : > { %3222 = shalt.err (!%p3219_p13)
}
  0xa8   : > { %s3223_s16 = scalar_lea.vmem %s3686_s15, 3072  ;;  %s3426_s5 = smov [#allocation7]  }
  0xa9   : > { %p3224_p6 = scmp.ne.s32.totalorder %s3686_s15, %s3223_s16  ;;  %s3228_s20 = sshll.u32 %s3426_s5, 4  ;;  %s3229_s20 = int_to_ptr.vmem [resolvable:$false] %s3228_s20 }
  0xaa   : > { %s3230_s21 = scalar_lea.vmem %s3229_s20, 6144  ;;  %p3231_p5 = scmp.lt.s32.totalorder %s3686_s15, %s3229_s20 }
  0xab   : > { %p3226_p4 = pnand %p3224_p6, %p3210_p9  ;;  %p3232_p11 = scmp.lt.s32.totalorder %s3230_s21, %s3223_s16 }
  0xad   : > { %p3227_p2 = pneg %p3226_p4  ;;  %p3233_p12 = por %p3232_p11, %p3231_p5 }
  0xaf   : > { %p3234_p1 = pnand %p3233_p12, %p3227_p2 }
  0xb1   : > { %3237 = shalt.err (!%p3234_p1)
}
  0xb2   : > { %s4838_s28 = sld [smem:[#allocation24_spill]]  ;;  %s4839_s19 = sld [smem:[#allocation30_spill]] }
  0xb3   : > { %2928 = dma.hbm_to_vmem [thread:$0]  (!%p3680_p7), %s3691_s12, 3072, %s3686_s15, %s3693_s13, %s4803_s29, %s4803_s29, %s4804_s6  }
  0xb4   : > { %s2369_s17 = sadd.s32 4294967294, %s3418_s9   ;;  %s39_s10 = sadd.s32 1, %s3406_s30 }
  0xb5   : > { %s42_s27 = sadd.s32 1, %s3410_s7  ;;  %p40_p2 = scmp.ge.s32.totalorder %s39_s10, 4 }
  0xb6   : > { %s46_s24 = sadd.s32 1, %s3414_s8  ;;  %s3730_s18 = smul.u32 %s3406_s30, %s3410_s7 }
  0xb7   : > { %s169_s16 = sadd.s32 1, %s3378_s23  ;;  %s4887_s10 = smov (%p40_p2, %s39_s10), 0 }
  0xb8   : > { %4840 = sst [smem:[#allocation32_spill]] %s4887_s10  ;;  %s4889_s27 = smov (!%p40_p2, %s42_s27), %s3410_s7 }
  0xb9   : > { %s51_s5 = ssub.s32 %s3406_s30, %s4887_s10  ;;  %p176_p13 = scmp.ne.s32.totalorder %s3378_s23, %s3374_s22 }
  0xba   : > { %p44_p5 = scmp.ge.s32.totalorder %s4889_s27, 2  ;;  %p182_p7 = scmp.ne.s32.totalorder %s3374_s22, %s4838_s28 }
  0xbb   : > { %p4841_p9 = scmp.eq.s32.totalorder %s3418_s9, 0  ;;  %p4843_p8 = scmp.ne.s32.totalorder %s4839_s19, 0 }
  0xbc   : > { %s4891_s27 = smov (%p44_p5, %s4889_s27), 0  ;;  %s4893_s24 = smov (!%p44_p5, %s46_s24), %s3414_s8 }
  0xbd   : > { %p3744_p10 = por %p176_p13, %p4841_p9  ;;  %p3750_p0 = por %p4843_p8, %p176_p13 }
  0xbe   : > { %4845 = sst [smem:[#allocation33_spill]] %s4891_s27  ;;  %s163_s13 = smul.u32 %s4891_s27, %s4887_s10 }
  0xbf   : > { %s4844_s12 = scalar_select %p3750_p0, 1, 0 }
  0xc0   : > { %p3761_p6 = por %p182_p7, %p4834_p3  ;;  %p48_p4 = scmp.ge.s32.totalorder %s4893_s24, 2 }
  0xc1   : > { %p216_p11 = scmp.eq.s32.totalorder %s2369_s17, 15  ;;  %s165_s21 = ssub.s32 %s3730_s18, %s163_s13 }
  0xc2   : > { %s305_s28 = sand.u32 1, %s3378_s23   ;;  %s4895_s24 = smov (%p48_p4, %s4893_s24), 0 }
  0xc3   : > { %p3769_p12 = por %p216_p11, %p182_p7  ;;  %s50_s29 = ssub.s32 %s3414_s8, %s4895_s24 }
  0xc4   : > { %s2377_s6 = sshll.u32 %s305_s28, 6  ;;  %s52_s0 = sor.u32 %s51_s5, %s50_s29 }
  0xc5   : > { %s4847_s19 = scalar_select %p3769_p12, 1, 0 }
  0xc6   : > { %s166_s1 = sor.u32 %s165_s21, %s50_s29  ;;  %p53_p3 = scmp.eq.s32.totalorder %s52_s0, 0 }
  0xc7   : > { %p167_p1 = scmp.eq.s32.totalorder %s166_s1, 0  ;;  %s2378_s2 = sshll.u32 %s3730_s18, 3 }
  0xc8   : > { %s4848_s3 = sadd.s32 1, %s3390_s26  ;;  %s2379_s4 = sshll.u32 %s3414_s8, 5 }
  0xc9   : > { %s3779_s17 = scalar_select %p53_p3, %s3390_s26, %s4848_s3  }
  0xca   : > { %s3782_s13 = scalar_select %p167_p1, %s3378_s23, %s169_s16  }
  0xcb   : > { %s309_s27 = scalar_lea.vmem [#allocation16], %s2377_s6  ;;  %s316_s7 = sadd.s32 %s2379_s4, %s2378_s2 }
  0xcc   : > { %s319_s10 = sshll.u32 %s309_s27, 4  ;;  %s2380_s30 = sshll.u32 %s316_s7, 7  ;;  %s3785_s10 = int_to_ptr.vmem [resolvable:$true] %s319_s10 }
  0xcd   : > { %p4849_p2 = scmp.lt.s32.totalorder %s3418_s9, 16  ;;  %s4851_s29 = sld [smem:[#allocation39_spill]] }
  0xce   : > { %s3800_s2 = scalar_lea.sflag [#allocation17], %s305_s28 }
  0xcf   : > { %p3791_p13 = pnand %p4849_p2, %p3744_p10 }
  0xd1   : > { %p3240_p7 = pneg %p3791_p13 }
  0xd3   : > { %s4852_s18 = smov %s4851_s29  ;;  %s3798_s3 = scalar_lea.hbm %s4851_s29, %s2380_s30 }
  0xd4   : > { %s3238_s4 = scalar_lea.hbm %s3798_s3, 1024  ;;  %s3243_s27 = scalar_lea.hbm %s4852_s18, 8192 }
  0xd5   : > { %p3239_p5 = scmp.ne.s32.totalorder %s3798_s3, %s3238_s4  ;;  %p3244_p8 = scmp.lt.u32.totalorder %s3798_s3, %s4852_s18 }
  0xd6   : > { %p3245_p4 = scmp.lt.u32.totalorder %s3243_s27, %s3238_s4  ;;  %p3247_p3 = scmp.lt.u32.totalorder %s3238_s4, %s3798_s3 }
  0xd7   : > { %p3241_p9 = pnand %p3240_p7, %p3239_p5 }
  0xd8   : > { %p3246_p11 = por %p3245_p4, %p3244_p8 }
  0xd9   : > { %p3242_p10 = pneg %p3241_p9 }
  0xda   : > { %p3248_p1 = por %p3247_p3, %p3246_p11 }
  0xdc   : > { %p3249_p2 = pnand %p3248_p1, %p3242_p10 }
  0xde   : > { %3252 = shalt.err (!%p3249_p2)
}
  0xdf   : > { %s3253_s15 = scalar_lea.vmem %s3785_s10, 1024  ;;  %s3427_s21 = smov [#allocation16]  }
  0xe0   : > { %p3254_p5 = scmp.ne.s32.totalorder %s3785_s10, %s3253_s15  ;;  %s3258_s28 = sshll.u32 %s3427_s21, 4  ;;  %s3259_s28 = int_to_ptr.vmem [resolvable:$false] %s3258_s28 }
  0xe1   : > { %s3260_s0 = scalar_lea.vmem %s3259_s28, 2048  ;;  %p3261_p0 = scmp.lt.s32.totalorder %s3785_s10, %s3259_s28 }
  0xe2   : > { %p3256_p9 = pnand %p3254_p5, %p3240_p7  ;;  %p3262_p8 = scmp.lt.s32.totalorder %s3260_s0, %s3253_s15 }
  0xe4   : > { %p3257_p12 = pneg %p3256_p9  ;;  %p3263_p4 = por %p3262_p8, %p3261_p0 }
  0xe6   : > { %p3264_p11 = pnand %p3263_p4, %p3257_p12 }
  0xe8   : > { %3267 = shalt.err (!%p3264_p11)
}
  0xe9   : > { %s4853_s1 = smov 8   ;;  %s4854_s29 = smov 128  }
  0xea   : > { %2931 = dma.hbm_to_vmem [thread:$0]  (!%p3791_p13), %s3798_s3, 1024, %s3785_s10, %s3800_s2, %s4854_s29, %s4854_s29, %s4853_s1  }
  0xeb   : > { %s4855_s4 = sld [smem:[#allocation31_spill]] }
  0xf1   : > { %p4856_p7 = scmp.ne.s32.totalorder %s4855_s4, 0 }
  0xf2   : > { %s333_s7 = sand.u32 (!%p4856_p7), 1, %s3386_s25   ;;  %p4857_p0 = scmp.ne.s32.totalorder (!%p4856_p7), %s4835_s14, 0 }
  0xf3   : > { %331 = sbr.rel (%p4856_p7) target bundleno = 1058 (0x422), region = 44  ;;  %s334_s27 = scalar_lea.sflag (!%p4856_p7), [#allocation8], %s333_s7 }
  0xf4   : > { %s2889_s6 = smul.u32 (!%p4856_p7), 192, %s333_s7 }
  0xf6   : > { %s3834_s30 = scalar_lea.vmem (!%p4856_p7), [#allocation7], %s2889_s6 }
  0xfa   : > { %3349 = dma.done.wait (%p4857_p0), %s334_s27, 3072  }
  0xfb   : > { %3351 = vsyncadd (%p4857_p0), %s334_s27, 4294964224  ;;  %p4858_p12 = scmp.ne.s32.totalorder %s4823_s11, 0 }
  0xfd   : > { %3353 = dma.done.wait (%p4858_p12), [#allocation11], 12816  }
  0xfe   : > { %3355 = vsyncadd (%p4858_p12), [#allocation11], 4294954480 }
  0xff   : > { %3357 = dma.done.wait (%p4858_p12), [#allocation14], 32  }
 0x100   : > { %3359 = vsyncadd (%p4858_p12), [#allocation14], 4294967264  ;;  %s3849_s10 = sand.u32 1, %s3374_s22  }
 0x101   : > { %s2386_s14 = sshll.u32 %s3849_s10, 6  ;;  %s359_s5 = scalar_lea.sflag [#allocation17], %s3849_s10 }
 0x102   : > { %s3853_s3 = scalar_lea.vmem [#allocation16], %s2386_s14 }
 0x103   : > { %3361 = dma.done.wait (%p3761_p6), %s359_s5, 1024  }
 0x104   : > { %3363 = vsyncadd (%p3761_p6), %s359_s5, 4294966272  ;;  %s4859_s2 = sld [smem:[#allocation26_spill]]  ;;  %s4860_s16 = sld [smem:[#allocation25_spill]] }
 0x105   : > { %s3863_s11 = scalar_lea.vmem [#allocation18], %s2386_s14 }
 0x10a   : > { %p400_p13 = scmp.eq.s32.totalorder %s4859_s2, 0  ;;  %p401_p10 = scmp.eq.s32.totalorder %s4860_s16, 0 }
 0x10c   : > { %p402_p3 = pnand %p401_p10, %p400_p13 }
 0x10d   : > { %vm406_vm0 = vcmask (!%p402_p3), 253952   ;;  %v3428_v0 = vmov (!%p402_p3), 0.0  }
 0x10e   : > { %405 = sbr.rel (%p402_p3) target bundleno = 277 (0x115), region = 72  ;;  %407 = vst.msk [vmem:[#allocation3] sm:$0x1] (!%p402_p3), %vm406_vm0, %v3428_v0  ;;  %408 = vst.msk [vmem:[#allocation4] sm:$0x1] (!%p402_p3), %vm406_vm0, %v3428_v0 }
 0x115 PF: > { %v3866_v1 = vld [vmem:[%s3834_s30 + $0x19] sm:$0xff]  ;;  %s3429_s20 = smov 64   ;;  %s3430_s15 = smov 32   ;;  %v475_v3 = vld [vmem:[%s3834_s30 + $0x2] sm:$0xff]  ;;  %vm417_vm1 = vcmask 261120   ;;  %v3893_v10 = vld [vmem:[%s3834_s30 + $0x30] sm:$0xff] }
 0x116   : > { %v2388_v2 = vld [vmem:[%s3834_s30 + $0x18] sm:$0xff]  ;;  %654 = vrot.lane.b32.xlu1 %v3866_v1, %s3429_s20  ;;  %v426_v4 = vld [vmem:[%s3834_s30 + $0x1] sm:$0xff]  ;;  %422 = vst.msk [vmem:[#allocation2 + $0xe0] sm:$0xff] %vm417_vm1, %v3893_v10  ;;  %s3431_s21 = smov 96   ;;  %v3933_v21 = vld [vmem:[%s3834_s30 + $0x4b] sm:$0xff]  ;;  %vm466_vm2 = vcmask 523520  }
 0x117   : > { %606 = vrot.lane.b32.xlu0 %v2388_v2, %s3430_s15  ;;  %v3875_v5 = vld [vmem:[%s3834_s30 + $0x33] sm:$0xff]  ;;  %v2389_v6 = vld [vmem:[%s3834_s30 + $0x20] sm:$0xff]  ;;  %420 = vst.msk [vmem:[#allocation2 + $0x70] sm:$0xff] %vm417_vm1, %v2388_v2  ;;  %v1466_v11 = vld [vmem:[#allocation10 + $0x88] sm:$0xff]  ;;  %vm515_vm3 = vcmask 785920   ;;  %vm564_vm4 = vcmask 1048320  }
 0x118   : > { %v3880_v7 = vld [vmem:[%s3834_s30 + $0x34] sm:$0xff]  ;;  %v1465_v8 = vld [vmem:[#allocation10 + $0x80] sm:$0xff]  ;;  %421 = vst.msk [vmem:[#allocation2 + $0xa8] sm:$0xff] %vm417_vm1, %v2389_v6  ;;  %744 = vst.msk [vmem:[#allocation2 + $0x80] sm:$0xff] %vm417_vm1, %v3875_v5  ;;  %s4861_s28 = sld [smem:[#allocation26_spill]] }
 0x119   : > { %v3886_v9 = vld [vmem:[%s3834_s30 + $0x1c] sm:$0xff]  ;;  %585 = vst.msk [vmem:[#allocation2 + $0xe8] sm:$0xff] %vm417_vm1, %v3880_v7  ;;  %v2766_v15 = vpack.c.bf16 %v1466_v11, %v1465_v8  ;;  %v3910_v17 = vld [vmem:[%s3834_s30 + $0x24] sm:$0xff]  ;;  %v3913_v18 = vld [vmem:[%s3834_s30 + $0x32] sm:$0xff] }
 0x11a   : > { %491 = vrot.lane.b32.xlu1 %v475_v3, %s3429_s20  ;;  %583 = vst.msk [vmem:[#allocation2 + $0x78] sm:$0xff] %vm417_vm1, %v3886_v9  ;;  %v524_v12 = vld [vmem:[%s3834_s30 + $0x3] sm:$0xff]  ;;  %v3899_v13 = vld [vmem:[%s3834_s30 + $0x1a] sm:$0xff]  ;;  %903 = vst.msk [vmem:[#allocation2 + $0x18] sm:$0xff] %vm417_vm1, %v3913_v18 }
 0x11b   : > { %442 = vrot.lane.b32.xlu0 %v426_v4, %s3430_s15  ;;  %v3902_v14 = vld [vmem:[%s3834_s30 + $0x3b] sm:$0xff]  ;;  %2767 = vmatprep.subr.bf16.mxu0 %v2766_v15  ;;  %584 = vst.msk [vmem:[#allocation2 + $0xb0] sm:$0xff] %vm417_vm1, %v3910_v17  ;;  %746 = vst.msk [vmem:[#allocation2 + $0xf0] sm:$0xff] %vm417_vm1, %v3933_v21  ;;  %v3945_v23 = vld [vmem:[%s3834_s30 + $0x23] sm:$0xff] }
 0x11c   : > { %v3907_v16 = vld [vmem:[%s3834_s30 + $0x3c] sm:$0xff]  ;;  %745 = vst.msk [vmem:[#allocation2 + $0xb8] sm:$0xff] %vm417_vm1, %v3902_v14  ;;  %v3953_v26 = vld [vmem:[%s3834_s30 + $0x4a] sm:$0xff]  ;;  %743 = vst.msk [vmem:[#allocation2 + $0x48] sm:$0xff] %vm417_vm1, %v3945_v23 }
 0x11d   : > { %v3918_v19 = vld [vmem:[%s3834_s30 + $0x38] sm:$0xff]  ;;  %586 = vst.msk [vmem:[#allocation2 + $0x120] sm:$0xff] %vm417_vm1, %v3907_v16  ;;  %v1449_v24 = vld [vmem:[#allocation10] sm:$0xff]  ;;  %v1450_v27 = vld [vmem:[#allocation10 + $0x8] sm:$0xff] }
 0x11e   : > { %540 = vrot.lane.b32.xlu1 %v524_v12, %s3431_s21  ;;  %v3930_v20 = vld [vmem:[%s3834_s30 + $0x1b] sm:$0xff]  ;;  %423 = vst.msk [vmem:[#allocation2 + $0x118] sm:$0xff] %vm417_vm1, %v3918_v19  ;;  %v1467_v28 = vld [vmem:[#allocation10 + $0x90] sm:$0xff]  ;;  %905 = vst.msk [vmem:[#allocation2 + $0x88] sm:$0xff] %vm417_vm1, %v3953_v26  ;;  %v2768_v31 = vpack.c.bf16 %v1450_v27, %v1449_v24  ;;  %p2556_p6 = scmp.ne.s32.totalorder %s4861_s28, 0 }
 0x11f   : > { %702 = vrot.lane.b32.xlu0 %v3899_v13, %s3431_s21  ;;  %v3938_v22 = vld [vmem:[%s3834_s30 + $0x3a] sm:$0xff]  ;;  %742 = vst.msk [vmem:[#allocation2 + $0x10] sm:$0xff] %vm417_vm1, %v3930_v20  ;;  %v427_v30 = vld [vmem:[%s3834_s30 + $0x9] sm:$0xff]  ;;  %v3979_v50 = vld [vmem:[%s3834_s30 + $0x52] sm:$0xff]  ;;  %vm2019_vm5 = vcmask (!%p2556_p6), 253952  }
 0x120   : > { %904 = vst.msk [vmem:[#allocation2 + $0x50] sm:$0xff] %vm417_vm1, %v3938_v22  ;;  %v3950_v25 = vld [vmem:[%s3834_s30 + $0x21] sm:$0xff]  ;;  %v1468_v29 = vld [vmem:[#allocation10 + $0x98] sm:$0xff]  ;;  %v1451_v33 = vld [vmem:[#allocation10 + $0x10] sm:$0xff]  ;;  %2769 = vmatpush3.bf16.msra.mxu0 %v2768_v31 }
 0x121   : > { %v2770_v32 = vpack.c.bf16 %v1468_v29, %v1467_v28  ;;  %v1452_v34 = vld [vmem:[#allocation10 + $0x18] sm:$0xff]  ;;  %v1469_v35 = vld [vmem:[#allocation10 + $0xa0] sm:$0xff]  ;;  %v1470_v36 = vld [vmem:[#allocation10 + $0xa8] sm:$0xff]  ;;  %906 = vst.msk [vmem:[#allocation2 + $0xc0] sm:$0xff] %vm417_vm1, %v3979_v50 }
 0x122   : > { %927 = vrot.lane.b32.xlu1 %v3875_v5, %s3430_s15  ;;  %v2772_v37 = vpack.c.bf16 %v1452_v34, %v1451_v33  ;;  %v1453_v38 = vld [vmem:[#allocation10 + $0x20] sm:$0xff]  ;;  %v1454_v39 = vld [vmem:[#allocation10 + $0x28] sm:$0xff]  ;;  %v2774_v40 = vpack.c.bf16 %v1470_v36, %v1469_v35  ;;  %v1471_v42 = vld [vmem:[#allocation10 + $0xb0] sm:$0xff] }
 0x123   : > { %608 = vrot.lane.b32.xlu0 %v2389_v6, %s3430_s15  ;;  %2771 = vmatprep.subr.bf16.mxu0 %v2770_v32  ;;  %v573_v41 = vld [vmem:[%s3834_s30 + $0x4] sm:$0xff]  ;;  %v1472_v43 = vld [vmem:[#allocation10 + $0xb8] sm:$0xff]  ;;  %v2776_v46 = vpack.c.bf16 %v1454_v39, %v1453_v38  ;;  %v1455_v48 = vld [vmem:[#allocation10 + $0x30] sm:$0xff] }
 0x124   : > { %581 = vst.msk [vmem:[#allocation2 + $0x8] sm:$0xff] %vm417_vm1, %v573_v41  ;;  %v3969_v44 = vld [vmem:[%s3834_s30 + $0x22] sm:$0xff]  ;;  %v476_v45 = vld [vmem:[%s3834_s30 + $0xa] sm:$0xff]  ;;  %2773 = vmatpush3.bf16.msra.mxu0 %v2772_v37  ;;  %v1456_v49 = vld [vmem:[#allocation10 + $0x38] sm:$0xff]  ;;  %v2778_v51 = vpack.c.bf16 %v1472_v43, %v1471_v42 }
 0x125   : > { %v409_v47 = vld [vmem:[%s3834_s30] sm:$0xff]  ;;  %2775 = vmatprep.subr.bf16.mxu0 %v2774_v40  ;;  %v1498_v54 = vld [vmem:[#allocation10 + $0x188] sm:$0xff]  ;;  %v2780_v59 = vpack.c.bf16 %v1456_v49, %v1455_v48  ;;  %v1499_v0 = vld [vmem:[#allocation10 + $0x190] sm:$0xff] }
 0x126   : > { %656 = vrot.lane.b32.xlu1 %v3950_v25, %s3429_s20  ;;  %418 = vst.msk [vmem:[#allocation2] sm:$0xff] %vm417_vm1, %v409_v47  ;;  %v1473_v52 = vld [vmem:[#allocation10 + $0xc0] sm:$0xff]  ;;  %v1474_v55 = vld [vmem:[#allocation10 + $0xc8] sm:$0xff]  ;;  %v1500_v2 = vld [vmem:[#allocation10 + $0x198] sm:$0xff] }
 0x127   : > { %444 = vrot.lane.b32.xlu0 %v427_v30, %s3430_s15  ;;  %v1497_v53 = vld [vmem:[#allocation10 + $0x180] sm:$0xff]  ;;  %v1482_v58 = vld [vmem:[#allocation10 + $0x108] sm:$0xff]  ;;  %v2782_v4 = vpack.c.bf16 %v1474_v55, %v1473_v52  ;;  %v1475_v6 = vld [vmem:[#allocation10 + $0xd0] sm:$0xff]  ;;  %v2802_v8 = vpack.c.bf16 %v1500_v2, %v1499_v0 }
 0x128   : > { %v2798_v56 = vpack.c.bf16 %v1498_v54, %v1497_v53  ;;  %v1481_v57 = vld [vmem:[#allocation10 + $0x100] sm:$0xff]  ;;  %2777 = vmatpush3.bf16.msra.mxu0 %v2776_v46  ;;  %v1458_v61 = vld [vmem:[#allocation10 + $0x48] sm:$0xff]  ;;  %v1476_v11 = vld [vmem:[#allocation10 + $0xd8] sm:$0xff] }
 0x129   : > { %v1457_v60 = vld [vmem:[#allocation10 + $0x40] sm:$0xff]  ;;  %v2800_v62 = vpack.c.bf16 %v1482_v58, %v1481_v57  ;;  %v574_v63 = vld [vmem:[%s3834_s30 + $0xc] sm:$0xff]  ;;  %2779 = vmatprep.subr.bf16.mxu0 %v2778_v51  ;;  %v1484_v15 = vld [vmem:[#allocation10 + $0x118] sm:$0xff]  ;;  %v2786_v36 = vpack.c.bf16 %v1476_v11, %v1475_v6 }
 0x12a   : > { %975 = vrot.lane.b32.xlu1 %v3880_v7, %s3429_s20  ;;  %v3988_v3 = vld [vmem:[%s3834_s30 + $0x48] sm:$0xff]  ;;  %2799 = vmatprep.subr.bf16.mxu1 %v2798_v56  ;;  %582 = vst.msk [vmem:[#allocation2 + $0x40] sm:$0xff] %vm417_vm1, %v574_v63  ;;  %v1459_v12 = vld [vmem:[#allocation10 + $0x50] sm:$0xff]  ;;  %v2784_v28 = vpack.c.bf16 %v1458_v61, %v1457_v60  ;;  %v1460_v29 = vld [vmem:[#allocation10 + $0x58] sm:$0xff] }
 0x12b   : > { %766 = vrot.lane.b32.xlu0 %v3886_v9, %s3430_s15  ;;  %v1483_v9 = vld [vmem:[#allocation10 + $0x110] sm:$0xff]  ;;  %2801 = vmatpush3.bf16.msra.mxu1 %v2800_v62  ;;  %v410_v31 = vld [vmem:[%s3834_s30 + $0x8] sm:$0xff]  ;;  %v1501_v32 = vld [vmem:[#allocation10 + $0x1a0] sm:$0xff] }
 0x12c   : > { %v3992_v24 = vld [vmem:[%s3834_s30 + $0x31] sm:$0xff]  ;;  %2781 = vmatpush3.bf16.msra.mxu0 %v2780_v59  ;;  %2803 = vmatprep.subr.bf16.mxu1 %v2802_v8  ;;  %v2804_v30 = vpack.c.bf16 %v1484_v15, %v1483_v9  ;;  %419 = vst.msk [vmem:[#allocation2 + $0x38] sm:$0xff] %vm417_vm1, %v410_v31  ;;  %v1502_v33 = vld [vmem:[#allocation10 + $0x1a8] sm:$0xff]  ;;  %v1485_v34 = vld [vmem:[#allocation10 + $0x120] sm:$0xff] }
 0x12d   : > { %v525_v27 = vld [vmem:[%s3834_s30 + $0xb] sm:$0xff]  ;;  %2783 = vmatprep.subr.bf16.mxu0 %v2782_v4  ;;  %v2806_v37 = vpack.c.bf16 %v1502_v33, %v1501_v32  ;;  %v1504_v40 = vld [vmem:[#allocation10 + $0x1b8] sm:$0xff]  ;;  %v1477_v41 = vld [vmem:[#allocation10 + $0xe0] sm:$0xff] }
 0x12e   : > { %704 = vrot.lane.b32.xlu1 %v3969_v44, %s3431_s21  ;;  %v1486_v35 = vld [vmem:[#allocation10 + $0x128] sm:$0xff]  ;;  %v1503_v39 = vld [vmem:[#allocation10 + $0x1b0] sm:$0xff]  ;;  %v1461_v46 = vld [vmem:[#allocation10 + $0x60] sm:$0xff] }
 0x12f   : > { %493 = vrot.lane.b32.xlu0 %v476_v45, %s3429_s20  ;;  %v4002_v38 = vld [vmem:[%s3834_s30 + $0x6b] sm:$0xff]  ;;  %2805 = vmatpush3.bf16.msra.mxu1 %v2804_v30  ;;  %v2808_v43 = vpack.c.bf16 %v1486_v35, %v1485_v34  ;;  %v2788_v45 = vpack.c.bf16 %v1460_v29, %v1459_v12  ;;  %v2810_v47 = vpack.c.bf16 %v1504_v40, %v1503_v39  ;;  %v1488_v49 = vld [vmem:[#allocation10 + $0x138] sm:$0xff]  ;;  %v1505_v52 = vld [vmem:[#allocation10 + $0x1c0] sm:$0xff] }
 0x130   : > { %v1478_v42 = vld [vmem:[#allocation10 + $0xe8] sm:$0xff]  ;;  %749 = vst.msk [vmem:[#allocation2 + $0x198] sm:$0xff] %vm417_vm1, %v4002_v38  ;;  %2785 = vmatpush3.bf16.msra.mxu0 %v2784_v28  ;;  %2807 = vmatprep.subr.bf16.mxu1 %v2806_v37  ;;  %v1487_v48 = vld [vmem:[#allocation10 + $0x130] sm:$0xff]  ;;  %v1480_v57 = vld [vmem:[#allocation10 + $0xf8] sm:$0xff] }
 0x131   : > { %v1462_v51 = vld [vmem:[#allocation10 + $0x68] sm:$0xff]  ;;  %2787 = vmatprep.subr.bf16.mxu0 %v2786_v36  ;;  %v2790_v54 = vpack.c.bf16 %v1478_v42, %v1477_v41  ;;  %v1479_v56 = vld [vmem:[#allocation10 + $0xf0] sm:$0xff]  ;;  %v2812_v58 = vpack.c.bf16 %v1488_v49, %v1487_v48  ;;  %v1489_v62 = vld [vmem:[#allocation10 + $0x140] sm:$0xff] }
 0x132   : > { %1024 = vrot.lane.b32.xlu1 %v3988_v3, %s3431_s21  ;;  %v1506_v53 = vld [vmem:[#allocation10 + $0x1c8] sm:$0xff]  ;;  %v2792_v59 = vpack.c.bf16 %v1462_v51, %v1461_v46  ;;  %v1463_v60 = vld [vmem:[#allocation10 + $0x70] sm:$0xff]  ;;  %v1464_v0 = vld [vmem:[#allocation10 + $0x78] sm:$0xff]  ;;  %v2794_v6 = vpack.c.bf16 %v1480_v57, %v1479_v56 }
 0x133   : > { %815 = vrot.lane.b32.xlu0 %v3893_v10, %s3429_s20  ;;  %v4010_v55 = vld [vmem:[%s3834_s30 + $0x62] sm:$0xff]  ;;  %2809 = vmatpush3.bf16.msra.mxu1 %v2808_v43  ;;  %v2814_v61 = vpack.c.bf16 %v1506_v53, %v1505_v52  ;;  %v1507_v2 = vld [vmem:[#allocation10 + $0x1d0] sm:$0xff]  ;;  %v1508_v4 = vld [vmem:[#allocation10 + $0x1d8] sm:$0xff]  ;;  %v2796_v9 = vpack.c.bf16 %v1464_v0, %v1463_v60 }
 0x134   : > { %907 = vst.msk [vmem:[#allocation2 + $0xf8] sm:$0xff] %vm417_vm1, %v4010_v55  ;;  %2789 = vmatpush3.bf16.msra.mxu0 %v2788_v45  ;;  %2811 = vmatprep.subr.bf16.mxu1 %v2810_v47  ;;  %v1490_v63 = vld [vmem:[#allocation10 + $0x148] sm:$0xff]  ;;  %v2818_v11 = vpack.c.bf16 %v1508_v4, %v1507_v2  ;;  %v1491_v12 = vld [vmem:[#allocation10 + $0x150] sm:$0xff]  ;;  %v1492_v15 = vld [vmem:[#allocation10 + $0x158] sm:$0xff] }
 0x135   : > { %2791 = vmatprep.subr.bf16.mxu0 %v2790_v54  ;;  %v2816_v8 = vpack.c.bf16 %v1490_v63, %v1489_v62  ;;  %v1510_v28 = vld [vmem:[#allocation10 + $0x1e8] sm:$0xff]  ;;  %v2820_v29 = vpack.c.bf16 %v1492_v15, %v1491_v12  ;;  %v1493_v31 = vld [vmem:[#allocation10 + $0x160] sm:$0xff]  ;;  %v1512_v33 = vld [vmem:[#allocation10 + $0x1f8] sm:$0xff] }
 0x136   : > { %863 = vrot.lane.b32.xlu1 %v3992_v24, %s3431_s21  ;;  %v1494_v32 = vld [vmem:[#allocation10 + $0x168] sm:$0xff]  ;;  %v1495_v36 = vld [vmem:[#allocation10 + $0x170] sm:$0xff]  ;;  %v1496_v37 = vld [vmem:[#allocation10 + $0x178] sm:$0xff] }
 0x137   : > { %542 = vrot.lane.b32.xlu0 %v525_v27, %s3431_s21  ;;  %2813 = vmatpush3.bf16.msra.mxu1 %v2812_v58  ;;  %v4019_v27 = vld [vmem:[%s3834_s30 + $0x6a] sm:$0xff]  ;;  %v2824_v34 = vpack.c.bf16 %v1494_v32, %v1493_v31  ;;  %v2828_v40 = vpack.c.bf16 %v1496_v37, %v1495_v36  ;;  %v4142_v46 = vld [vmem:[%s3834_s30 + $0x9c] sm:$0xff]  ;;  %v2417_v54 = vld [vmem:[%s3834_s30 + $0x53] sm:$0xff] }
 0x138   : > { %2793 = vmatpush3.bf16.msra.mxu0 %v2792_v59  ;;  %2815 = vmatprep.subr.bf16.mxu1 %v2814_v61  ;;  %908 = vst.msk [vmem:[#allocation2 + $0x130] sm:$0xff] %vm417_vm1, %v4019_v27  ;;  %v2469_v39 = vld [vmem:[%s3834_s30 + $0x50] sm:$0xff]  ;;  %1390 = vst.msk [vmem:[#allocation2 + $0x148] sm:$0xff] %vm417_vm1, %v4142_v46  ;;  %v4152_v47 = vld [vmem:[%s3834_s30 + $0x78] sm:$0xff] }
 0x139   : > { %2795 = vmatprep.subr.bf16.mxu0 %v2794_v6  ;;  %v579_v45 = vld [vmem:[%s3834_s30 + $0x4c] sm:$0xff]  ;;  %747 = vst.msk [vmem:[#allocation2 + $0x128] sm:$0xff] %vm417_vm1, %v2417_v54  ;;  %v4170_v56 = vld [vmem:[%s3834_s30 + $0x82] sm:$0xff] }
 0x13a   : > { %929 = vrot.lane.b32.xlu1 %v3902_v14, %s3430_s15  ;;  %587 = vst.msk [vmem:[#allocation2 + $0x158] sm:$0xff] %vm417_vm1, %v579_v45  ;;  %v415_v51 = vld [vmem:[%s3834_s30 + $0x48] sm:$0xff]  ;;  %910 = vst.msk [vmem:[#allocation2 + $0x1a0] sm:$0xff] %vm417_vm1, %v4170_v56  ;;  %v4187_v62 = vld [vmem:[%s3834_s30 + $0x91] sm:$0xff] }
 0x13b   : > { %610 = vrot.lane.b32.xlu0 %v3893_v10, %s3430_s15  ;;  %v1509_v10 = vld [vmem:[#allocation10 + $0x1e0] sm:$0xff]  ;;  %2817 = vmatpush3.bf16.msra.mxu1 %v2816_v8  ;;  %424 = vst.msk [vmem:[#allocation2 + $0x150] sm:$0xff] %vm417_vm1, %v415_v51  ;;  %1070 = vst.msk [vmem:[#allocation2 + $0x170] sm:$0xff] %vm417_vm1, %v4187_v62  ;;  %v4196_v63 = vld [vmem:[%s3834_s30 + $0x6c] sm:$0xff] }
 0x13c   : > { %2797 = vmatpush3.bf16.msra.mxu0 %v2796_v9  ;;  %2819 = vmatprep.subr.bf16.mxu1 %v2818_v11  ;;  %v2822_v30 = vpack.c.bf16 %v1510_v28, %v1509_v10  ;;  %v580_v8 = vld [vmem:[%s3834_s30 + $0x54] sm:$0xff]  ;;  %v4213_v9 = vld [vmem:[%s3834_s30 + $0x80] sm:$0xff] }
 0x13d   : > { %588 = vst.msk [vmem:[#allocation2 + $0x190] sm:$0xff] %vm417_vm1, %v580_v8  ;;  %v416_v10 = vld [vmem:[%s3834_s30 + $0x50] sm:$0xff]  ;;  %v4220_v28 = vld [vmem:[%s3834_s30 + $0x99] sm:$0xff]  ;;  %v1518_v8 = vld [vmem:[#allocation10 + $0x228] sm:$0xff] }
 0x13e   : > { %658 = vrot.lane.b32.xlu1 %v3992_v24, %s3429_s20  ;;  %425 = vst.msk [vmem:[#allocation2 + $0x188] sm:$0xff] %vm417_vm1, %v416_v10  ;;  %1071 = vst.msk [vmem:[#allocation2 + $0x1a8] sm:$0xff] %vm417_vm1, %v4220_v28  ;;  %v1515_v54 = vld [vmem:[#allocation10 + $0x210] sm:$0xff]  ;;  %v1536_v10 = vld [vmem:[#allocation10 + $0x2b8] sm:$0xff] }
 0x13f   : > { %446 = vrot.lane.b32.xlu0 %v3866_v1, %s3430_s15  ;;  %v1511_v1 = vld [vmem:[#allocation10 + $0x1f0] sm:$0xff]  ;;  %2821 = vmatpush3.bf16.msra.mxu1 %v2820_v29 }
 0x140   : > { %2823 = vmatprep.subr.bf16.mxu1 %v2822_v30  ;;  %v2826_v35 = vpack.c.bf16 %v1512_v33, %v1511_v1  ;;  %v4229_v29 = vld [vmem:[%s3834_s30 + $0x69] sm:$0xff]  ;;  %v4240_v33 = vld [vmem:[%s3834_s30 + $0x7b] sm:$0xff] }
 0x141   : > { %v2418_v1 = vld [vmem:[%s3834_s30 + $0x63] sm:$0xff] }
 0x142   : > { %977 = vrot.lane.b32.xlu1 %v3907_v16, %s3429_s20  ;;  %748 = vst.msk [vmem:[#allocation2 + $0x160] sm:$0xff] %vm417_vm1, %v2418_v1  ;;  %v2476_v1 = vld [vmem:[%s3834_s30 + $0x49] sm:$0xff] }
 0x143   : > { %768 = vrot.lane.b32.xlu0 %v3910_v17, %s3430_s15  ;;  %2825 = vmatpush3.bf16.msra.mxu1 %v2824_v34  ;;  %v2437_v17 = vld [vmem:[%s3834_s30 + $0x39] sm:$0xff]  ;;  %1064 = vst.msk [vmem:[#allocation2 + $0x20] sm:$0xff] %vm417_vm1, %v2476_v1  ;;  %v1527_v1 = vld [vmem:[#allocation10 + $0x270] sm:$0xff] }
 0x144   : > { %2827 = vmatprep.subr.bf16.mxu1 %v2826_v35 }
 0x146   : > { %706 = vrot.lane.b32.xlu1 %v3913_v18, %s3431_s21 }
 0x147   : > { %495 = vrot.lane.b32.xlu0 %v3899_v13, %s3429_s20  ;;  %2829 = vmatpush3.bf16.msra.mxu1 %v2828_v40  ;;  %v4051_v13 = vld [vmem:[%s3834_s30 + $0x4c] sm:$0xff] }
 0x14a   : > { %1026 = vrot.lane.b32.xlu1 %v2469_v39, %s3431_s21 }
 0x14b   : > { %817 = vrot.lane.b32.xlu0 %v3918_v19, %s3429_s20 }
 0x14e   : > { %865 = vrot.lane.b32.xlu1 %v2437_v17, %s3431_s21 }
 0x14f   : > { %544 = vrot.lane.b32.xlu0 %v3930_v20, %s3431_s21  ;;  %v4069_v20 = vld [vmem:[%s3834_s30 + $0x49] sm:$0xff] }
 0x152   : > { %931 = vrot.lane.b32.xlu1 %v3933_v21, %s3430_s15 }
 0x153   : > { %612 = vrot.lane.b32.xlu0 %v3918_v19, %s3430_s15  ;;  %v4062_v19 = vld [vmem:[%s3834_s30 + $0x60] sm:$0xff] }
 0x156   : > { %660 = vrot.lane.b32.xlu1 %v2437_v17, %s3429_s20 }
 0x157   : > { %448 = vrot.lane.b32.xlu0 %v3950_v25, %s3430_s15  ;;  %v4087_v25 = vld [vmem:[%s3834_s30 + $0x54] sm:$0xff] }
 0x15a   : > { %979 = vrot.lane.b32.xlu1 %v4051_v13, %s3429_s20 }
 0x15b   : > { %770 = vrot.lane.b32.xlu0 %v3880_v7, %s3430_s15  ;;  %v4076_v7 = vld [vmem:[%s3834_s30 + $0x53] sm:$0xff] }
 0x15e   : > { %708 = vrot.lane.b32.xlu1 %v3938_v22, %s3431_s21 }
 0x15f   : > { %497 = vrot.lane.b32.xlu0 %v3969_v44, %s3429_s20  ;;  %v4103_v44 = vld [vmem:[%s3834_s30 + $0x68] sm:$0xff] }
 0x162   : > { %1028 = vrot.lane.b32.xlu1 %v4062_v19, %s3431_s21 }
 0x163   : > { %819 = vrot.lane.b32.xlu0 %v3988_v3, %s3429_s20 }
 0x166   : > { %867 = vrot.lane.b32.xlu1 %v4069_v20, %s3431_s21 }
 0x167   : > { %546 = vrot.lane.b32.xlu0 %v3945_v23, %s3431_s21  ;;  %v4094_v23 = vld [vmem:[%s3834_s30 + $0x94] sm:$0xff] }
 0x168   : > { %1389 = vst.msk [vmem:[#allocation2 + $0x110] sm:$0xff] %vm417_vm1, %v4094_v23 }
 0x16a   : > { %933 = vrot.lane.b32.xlu1 %v4076_v7, %s3430_s15 }
 0x16b   : > { %614 = vrot.lane.b32.xlu0 %v3988_v3, %s3430_s15  ;;  %v4122_v3 = vld [vmem:[%s3834_s30 + $0x7a] sm:$0xff] }
 0x16c   : > { %909 = vst.msk [vmem:[#allocation2 + $0x168] sm:$0xff] %vm417_vm1, %v4122_v3 }
 0x16e   : > { %662 = vrot.lane.b32.xlu1 %v4069_v20, %s3429_s20 }
 0x16f   : > { %450 = vrot.lane.b32.xlu0 %v3992_v24, %s3430_s15 }
 0x172   : > { %981 = vrot.lane.b32.xlu1 %v4087_v25, %s3429_s20 }
 0x173   : > { %772 = vrot.lane.b32.xlu0 %v3907_v16, %s3430_s15  ;;  %v4109_v16 = vld [vmem:[%s3834_s30 + $0x51] sm:$0xff] }
 0x176   : > { %710 = vrot.lane.b32.xlu1 %v3953_v26, %s3431_s21 }
 0x177   : > { %499 = vrot.lane.b32.xlu0 %v3913_v18, %s3429_s20  ;;  %v4116_v18 = vld [vmem:[%s3834_s30 + $0x63] sm:$0xff] }
 0x17a   : > { %1030 = vrot.lane.b32.xlu1 %v4103_v44, %s3431_s21 }
 0x17b   : > { %821 = vrot.lane.b32.xlu0 %v2469_v39, %s3429_s20 }
 0x17e   : > { %869 = vrot.lane.b32.xlu1 %v4109_v16, %s3431_s21 }
 0x17f   : > { %548 = vrot.lane.b32.xlu0 %v3875_v5, %s3431_s21  ;;  %v4130_v5 = vld [vmem:[%s3834_s30 + $0x64] sm:$0xff] }
 0x182   : > { %935 = vrot.lane.b32.xlu1 %v4116_v18, %s3430_s15 }
 0x183   : > { %616 = vrot.lane.b32.xlu0 %v2469_v39, %s3430_s15 }
 0x186   : > { %664 = vrot.lane.b32.xlu1 %v4109_v16, %s3429_s20 }
 0x187   : > { %452 = vrot.lane.b32.xlu0 %v2437_v17, %s3430_s15  ;;  %v4255_v17 = vld [vmem:[%s3834_s30 + $0x7c] sm:$0xff] }
 0x188   : > { %v655_v24 = vpop.permute.xlu1 %654 }
 0x189   : > { %v607_v41 = vpop.permute.xlu0 %606 }
 0x18a   : > { %630 = vst.msk [vmem:[#allocation2 + $0x8] sm:$0xff] %vm466_vm2, %v607_v41  ;;  %983 = vrot.lane.b32.xlu1 %v4130_v5, %s3429_s20 }
 0x18b   : > { %774 = vrot.lane.b32.xlu0 %v4051_v13, %s3430_s15  ;;  %678 = vst.msk [vmem:[#allocation2 + $0x8] sm:$0xff] %vm515_vm3, %v655_v24 }
 0x18c   : > { %v492_v42 = vpop.permute.xlu1 %491 }
 0x18d   : > { %v443_v43 = vpop.permute.xlu0 %442 }
 0x18e   : > { %467 = vst.msk [vmem:[#allocation2] sm:$0xff] %vm466_vm2, %v443_v43  ;;  %712 = vrot.lane.b32.xlu1 %v3979_v50, %s3431_s21  ;;  %v1514_v43 = vld [vmem:[#allocation10 + $0x208] sm:$0xff] }
 0x18f   : > { %501 = vrot.lane.b32.xlu0 %v3938_v22, %s3429_s20  ;;  %516 = vst.msk [vmem:[#allocation2] sm:$0xff] %vm515_vm3, %v492_v42  ;;  %v4163_v22 = vld [vmem:[%s3834_s30 + $0x61] sm:$0xff] }
 0x190   : > { %v541_v48 = vpop.permute.xlu1 %540  ;;  %v1513_v42 = vld [vmem:[#allocation10 + $0x200] sm:$0xff] }
 0x191   : > { %v703_v49 = vpop.permute.xlu0 %702  ;;  %565 = vst.msk [vmem:[#allocation2] sm:$0xff] %vm564_vm4, %v541_v48  ;;  %v2832_v45 = vpack.c.bf16 %v1514_v43, %v1513_v42  ;;  %v2508_v48 = vld [vmem:[%s3834_s30 + $0x60] sm:$0xff]  ;;  %v1522_v43 = vld [vmem:[#allocation10 + $0x248] sm:$0xff] }
 0x192   : > { %726 = vst.msk [vmem:[#allocation2 + $0x8] sm:$0xff] %vm564_vm4, %v703_v49  ;;  %1032 = vrot.lane.b32.xlu1 %v4152_v47, %s3431_s21  ;;  %v1532_v49 = vld [vmem:[#allocation10 + $0x298] sm:$0xff]  ;;  %v1521_v42 = vld [vmem:[#allocation10 + $0x240] sm:$0xff] }
 0x193   : > { %823 = vrot.lane.b32.xlu0 %v4062_v19, %s3429_s20  ;;  %1225 = vst.msk [vmem:[#allocation2 + $0x28] sm:$0xff] %vm417_vm1, %v2508_v48  ;;  %v4298_v48 = vld [vmem:[%s3834_s30 + $0x84] sm:$0xff] }
 0x194   : > { %v928_v52 = vpop.permute.xlu1 %927 }
 0x195   : > { %v609_v53 = vpop.permute.xlu0 %608  ;;  %951 = vst.msk [vmem:[#allocation2 + $0x18] sm:$0xff] %vm466_vm2, %v928_v52 }
 0x196   : > { %631 = vst.msk [vmem:[#allocation2 + $0x40] sm:$0xff] %vm466_vm2, %v609_v53  ;;  %871 = vrot.lane.b32.xlu1 %v4163_v22, %s3431_s21 }
 0x197   : > { %550 = vrot.lane.b32.xlu0 %v3902_v14, %s3431_s21 }
 0x198   : > { %v657_v57 = vpop.permute.xlu1 %656  ;;  %v1393_v60 = vld [vmem:[#allocation2] sm:$0xff] }
 0x199   : > { %v445_v58 = vpop.permute.xlu0 %444  ;;  %v1394_v59 = vld [vmem:[#allocation2 + $0x8] sm:$0xff]  ;;  %679 = vst.msk [vmem:[#allocation2 + $0x40] sm:$0xff] %vm515_vm3, %v657_v57  ;;  %v1516_v57 = vld [vmem:[#allocation10 + $0x218] sm:$0xff] }
 0x19a   : > { %468 = vst.msk [vmem:[#allocation2 + $0x38] sm:$0xff] %vm466_vm2, %v445_v58  ;;  %1637 = vmatprep.mubr.f32.mxu0 %v1394_v59  ;;  %937 = vrot.lane.b32.xlu1 %v4002_v38, %s3430_s15  ;;  %v2836_v58 = vpack.c.bf16 %v1516_v57, %v1515_v54  ;;  %v2474_v59 = vld [vmem:[%s3834_s30 + $0x90] sm:$0xff]  ;;  %v1524_v57 = vld [vmem:[#allocation10 + $0x258] sm:$0xff] }
 0x19b   : > { %618 = vrot.lane.b32.xlu0 %v4062_v19, %s3430_s15  ;;  %1638 = vmatmul.mubr.f32.vlgmr.msra.gmra.mrb[0].mxu0 %v1393_v60  ;;  %v1529_v19 = vld [vmem:[#allocation10 + $0x280] sm:$0xff]  ;;  %v1523_v54 = vld [vmem:[#allocation10 + $0x250] sm:$0xff] }
 0x19c   : > { %v976_v14 = vpop.permute.xlu1 %975  ;;  %v1533_v60 = vld [vmem:[#allocation10 + $0x2a0] sm:$0xff] }
 0x19d   : > { %v767_v61 = vpop.permute.xlu0 %766  ;;  %999 = vst.msk [vmem:[#allocation2 + $0x18] sm:$0xff] %vm515_vm3, %v976_v14  ;;  %v1534_v14 = vld [vmem:[#allocation10 + $0x2a8] sm:$0xff] }
 0x19e   : > { %790 = vst.msk [vmem:[#allocation2 + $0x10] sm:$0xff] %vm466_vm2, %v767_v61  ;;  %666 = vrot.lane.b32.xlu1 %v4163_v22, %s3429_s20 }
 0x19f   : > { %454 = vrot.lane.b32.xlu0 %v4069_v20, %s3430_s15  ;;  %v1530_v20 = vld [vmem:[#allocation10 + $0x288] sm:$0xff] }
 0x1a0   : > { %v705_v0 = vpop.permute.xlu1 %704 }
 0x1a1   : > { %v494_v2 = vpop.permute.xlu0 %493  ;;  %727 = vst.msk [vmem:[#allocation2 + $0x40] sm:$0xff] %vm564_vm4, %v705_v0 }
 0x1a2   : > { %517 = vst.msk [vmem:[#allocation2 + $0x38] sm:$0xff] %vm515_vm3, %v494_v2  ;;  %985 = vrot.lane.b32.xlu1 %v4196_v63, %s3429_s20 }
 0x1a3   : > { %776 = vrot.lane.b32.xlu0 %v4087_v25, %s3430_s15 }
 0x1a4   : > { %v1025_v4 = vpop.permute.xlu1 %1024 }
 0x1a5   : > { %v816_v6 = vpop.permute.xlu0 %815  ;;  %1048 = vst.msk [vmem:[#allocation2 + $0x18] sm:$0xff] %vm564_vm4, %v1025_v4  ;;  %v2838_v4 = vpack.c.bf16 %v1534_v14, %v1533_v60 }
 0x1a6   : > { %839 = vst.msk [vmem:[#allocation2 + $0x10] sm:$0xff] %vm515_vm3, %v816_v6  ;;  %714 = vrot.lane.b32.xlu1 %v4010_v55, %s3431_s21  ;;  %v1517_v6 = vld [vmem:[#allocation10 + $0x220] sm:$0xff] }
 0x1a7   : > { %503 = vrot.lane.b32.xlu0 %v3953_v26, %s3429_s20 }
 0x1a8   : > { %v864_v11 = vpop.permute.xlu1 %863  ;;  %v1401_v15 = vld [vmem:[#allocation2 + $0x40] sm:$0xff] }
 0x1a9   : > { %v543_v12 = vpop.permute.xlu0 %542  ;;  %887 = vst.msk [vmem:[#allocation2 + $0x10] sm:$0xff] %vm564_vm4, %v864_v11  ;;  %1642 = vmatprep.mubr.f32.mxu0 %v1401_v15  ;;  %v2840_v11 = vpack.c.bf16 %v1518_v8, %v1517_v6  ;;  %v1535_v15 = vld [vmem:[#allocation10 + $0x2b0] sm:$0xff]  ;;  %v2514_v6 = vld [vmem:[%s3834_s30 + $0xa8] sm:$0xff]  ;;  %v2475_v8 = vld [vmem:[%s3834_s30 + $0x98] sm:$0xff] }
 0x1aa   : > { %566 = vst.msk [vmem:[#allocation2 + $0x38] sm:$0xff] %vm564_vm4, %v543_v12  ;;  %1034 = vrot.lane.b32.xlu1 %v4213_v9, %s3431_s21  ;;  %v4278_v12 = vld [vmem:[%s3834_s30 + $0x79] sm:$0xff] }
 0x1ab   : > { %825 = vrot.lane.b32.xlu0 %v4103_v44, %s3429_s20  ;;  %1231 = vst.msk [vmem:[#allocation2 + $0x178] sm:$0xff] %vm417_vm1, %v2514_v6 }
 0x1ac   : > { %v930_v30 = vpop.permute.xlu1 %929  ;;  %v1396_v32 = vld [vmem:[#allocation2 + $0x18] sm:$0xff] }
 0x1ad   : > { %v611_v31 = vpop.permute.xlu0 %610  ;;  %952 = vst.msk [vmem:[#allocation2 + $0x50] sm:$0xff] %vm466_vm2, %v930_v30  ;;  %1742 = vmatprep.mubr.f32.mxu1 %v1396_v32 }
 0x1ae   : > { %632 = vst.msk [vmem:[#allocation2 + $0x78] sm:$0xff] %vm466_vm2, %v611_v31  ;;  %873 = vrot.lane.b32.xlu1 %v4229_v29, %s3431_s21 }
 0x1af   : > { %552 = vrot.lane.b32.xlu0 %v3933_v21, %s3431_s21 }
 0x1b0   : > { %v659_v34 = vpop.permute.xlu1 %658  ;;  %v1395_v37 = vld [vmem:[#allocation2 + $0x10] sm:$0xff] }
 0x1b1   : > { %v447_v35 = vpop.permute.xlu0 %446  ;;  %v1400_v36 = vld [vmem:[#allocation2 + $0x38] sm:$0xff]  ;;  %680 = vst.msk [vmem:[#allocation2 + $0x78] sm:$0xff] %vm515_vm3, %v659_v34  ;;  %1743 = vmatmul.mubr.f32.vlgmr.msra.gmra.mrb[0].mxu1 %v1395_v37  ;;  %v2842_v34 = vpack.c.bf16 %v1536_v10, %v1535_v15  ;;  %v4289_v37 = vld [vmem:[%s3834_s30 + $0x83] sm:$0xff] }
 0x1b2   : > { %469 = vst.msk [vmem:[#allocation2 + $0x70] sm:$0xff] %vm466_vm2, %v447_v35  ;;  %1643 = vmatmul.mubr.f32.gmra.mrb[2].mxu0 %v1400_v36  ;;  %939 = vrot.lane.b32.xlu1 %v4240_v33, %s3430_s15  ;;  %v1519_v35 = vld [vmem:[#allocation10 + $0x230] sm:$0xff]  ;;  %v1544_v15 = vld [vmem:[#allocation10 + $0x2f8] sm:$0xff] }
 0x1b3   : > { %620 = vrot.lane.b32.xlu0 %v4103_v44, %s3430_s15  ;;  %v2830_v44 = vpack.c.bf16 %v1530_v20, %v1529_v19 }
 0x1b4   : > { %v978_v39 = vpop.permute.xlu1 %977 }
 0x1b5   : > { %v769_v40 = vpop.permute.xlu0 %768  ;;  %1000 = vst.msk [vmem:[#allocation2 + $0x50] sm:$0xff] %vm515_vm3, %v978_v39  ;;  %2831 = vmatprep.subr.bf16.mxu0 %v2830_v44  ;;  %2870 = vmatprep.subr.bf16.mxu1 %v2830_v44  ;;  %v1537_v39 = vld [vmem:[#allocation10 + $0x2c0] sm:$0xff] }
 0x1b6   : > { %791 = vst.msk [vmem:[#allocation2 + $0x48] sm:$0xff] %vm466_vm2, %v769_v40  ;;  %668 = vrot.lane.b32.xlu1 %v4229_v29, %s3429_s20  ;;  %2833 = vmatpush3.bf16.msra.mxu0 %v2832_v45  ;;  %v1538_v40 = vld [vmem:[#allocation10 + $0x2c8] sm:$0xff] }
 0x1b7   : > { %456 = vrot.lane.b32.xlu0 %v4109_v16, %s3430_s15  ;;  %v1531_v16 = vld [vmem:[#allocation10 + $0x290] sm:$0xff]  ;;  %2878 = vmatpush3.bf16.msra.mxu1 %v2832_v45  ;;  %v2846_v44 = vpack.c.bf16 %v1538_v40, %v1537_v39  ;;  %v2848_v45 = vpack.c.bf16 %v1522_v43, %v1521_v42 }
 0x1b8   : > { %v707_v24 = vpop.permute.xlu1 %706  ;;  %v2834_v53 = vpack.c.bf16 %v1532_v49, %v1531_v16  ;;  %v1539_v16 = vld [vmem:[#allocation10 + $0x2d0] sm:$0xff]  ;;  %v1540_v49 = vld [vmem:[#allocation10 + $0x2d8] sm:$0xff] }
 0x1b9   : > { %v496_v41 = vpop.permute.xlu0 %495  ;;  %728 = vst.msk [vmem:[#allocation2 + $0x78] sm:$0xff] %vm564_vm4, %v707_v24  ;;  %v2477_v39 = vld [vmem:[%s3834_s30 + $0x51] sm:$0xff] }
 0x1ba   : > { %518 = vst.msk [vmem:[#allocation2 + $0x70] sm:$0xff] %vm515_vm3, %v496_v41  ;;  %987 = vrot.lane.b32.xlu1 %v4255_v17, %s3429_s20  ;;  %2835 = vmatprep.subr.bf16.mxu0 %v2834_v53 }
 0x1bb   : > { %778 = vrot.lane.b32.xlu0 %v4130_v5, %s3430_s15  ;;  %2871 = vmatprep.subr.bf16.mxu1 %v2834_v53  ;;  %v2850_v53 = vpack.c.bf16 %v1540_v49, %v1539_v16  ;;  %1065 = vst.msk [vmem:[#allocation2 + $0x58] sm:$0xff] %vm417_vm1, %v2477_v39  ;;  %v2530_v16 = vld [vmem:[%s3834_s30 + $0xaa] sm:$0xff]  ;;  %v2539_v39 = vld [vmem:[%s3834_s30 + $0xb3] sm:$0xff] }
 0x1bc   : > { %v1027_v51 = vpop.permute.xlu1 %1026  ;;  %2837 = vmatpush3.bf16.msra.mxu0 %v2836_v58  ;;  %2879 = vmatpush3.bf16.msra.mxu1 %v2836_v58  ;;  %v1541_v58 = vld [vmem:[#allocation10 + $0x2e0] sm:$0xff] }
 0x1bd   : > { %v818_v52 = vpop.permute.xlu0 %817  ;;  %1049 = vst.msk [vmem:[#allocation2 + $0x50] sm:$0xff] %vm564_vm4, %v1027_v51  ;;  %2839 = vmatprep.subr.bf16.mxu0 %v2838_v4  ;;  %2872 = vmatprep.subr.bf16.mxu1 %v2838_v4 }
 0x1be   : > { %840 = vst.msk [vmem:[#allocation2 + $0x48] sm:$0xff] %vm515_vm3, %v818_v52  ;;  %716 = vrot.lane.b32.xlu1 %v4019_v27, %s3431_s21 }
 0x1bf   : > { %505 = vrot.lane.b32.xlu0 %v3979_v50, %s3429_s20 }
 0x1c0   : > { %v866_v61 = vpop.permute.xlu1 %865  ;;  %v1408_v2 = vld [vmem:[#allocation2 + $0x78] sm:$0xff]  ;;  %2841 = vmatpush3.bf16.msra.mxu0 %v2840_v11  ;;  %2880 = vmatpush3.bf16.msra.mxu1 %v2840_v11 }
 0x1c1   : > { %v545_v0 = vpop.permute.xlu0 %544  ;;  %888 = vst.msk [vmem:[#allocation2 + $0x48] sm:$0xff] %vm564_vm4, %v866_v61  ;;  %1647 = vmatprep.mubr.f32.mxu0 %v1408_v2  ;;  %2843 = vmatprep.subr.bf16.mxu0 %v2842_v34  ;;  %v1526_v2 = vld [vmem:[#allocation10 + $0x268] sm:$0xff]  ;;  %v1543_v11 = vld [vmem:[#allocation10 + $0x2f0] sm:$0xff] }
 0x1c2   : > { %567 = vst.msk [vmem:[#allocation2 + $0x70] sm:$0xff] %vm564_vm4, %v545_v0  ;;  %1036 = vrot.lane.b32.xlu1 %v2474_v59, %s3431_s21  ;;  %2873 = vmatprep.subr.bf16.mxu1 %v2842_v34  ;;  %v1542_v59 = vld [vmem:[#allocation10 + $0x2e8] sm:$0xff]  ;;  %v1525_v0 = vld [vmem:[#allocation10 + $0x260] sm:$0xff]  ;;  %v1528_v34 = vld [vmem:[#allocation10 + $0x278] sm:$0xff] }
 0x1c3   : > { %827 = vrot.lane.b32.xlu0 %v4152_v47, %s3429_s20  ;;  %v1520_v47 = vld [vmem:[#allocation10 + $0x238] sm:$0xff]  ;;  %v2854_v61 = vpack.c.bf16 %v1542_v59, %v1541_v58  ;;  %v2856_v4 = vpack.c.bf16 %v1526_v2, %v1525_v0 }
 0x1c4   : > { %v932_v30 = vpop.permute.xlu1 %931  ;;  %v1403_v32 = vld [vmem:[#allocation2 + $0x50] sm:$0xff]  ;;  %v2844_v36 = vpack.c.bf16 %v1520_v47, %v1519_v35 }
 0x1c5   : > { %v613_v31 = vpop.permute.xlu0 %612  ;;  %953 = vst.msk [vmem:[#allocation2 + $0x88] sm:$0xff] %vm466_vm2, %v932_v30  ;;  %1747 = vmatprep.mubr.f32.mxu1 %v1403_v32  ;;  %v2858_v32 = vpack.c.bf16 %v1544_v15, %v1543_v11  ;;  %v2523_v0 = vld [vmem:[%s3834_s30 + $0xb1] sm:$0xff] }
 0x1c6   : > { %633 = vst.msk [vmem:[#allocation2 + $0xb0] sm:$0xff] %vm466_vm2, %v613_v31  ;;  %875 = vrot.lane.b32.xlu1 %v4278_v12, %s3431_s21  ;;  %2845 = vmatpush3.bf16.msra.mxu0 %v2844_v36  ;;  %v2509_v31 = vld [vmem:[%s3834_s30 + $0x68] sm:$0xff]  ;;  %v2531_v15 = vld [vmem:[%s3834_s30 + $0xb2] sm:$0xff] }
 0x1c7   : > { %554 = vrot.lane.b32.xlu0 %v4076_v7, %s3431_s21  ;;  %2881 = vmatpush3.bf16.msra.mxu1 %v2844_v36  ;;  %1226 = vst.msk [vmem:[#allocation2 + $0x60] sm:$0xff] %vm417_vm1, %v2509_v31  ;;  %v4411_v31 = vld [vmem:[%s3834_s30 + $0x9b] sm:$0xff] }
 0x1c8   : > { %v661_v19 = vpop.permute.xlu1 %660  ;;  %v1402_v41 = vld [vmem:[#allocation2 + $0x48] sm:$0xff]  ;;  %2847 = vmatprep.subr.bf16.mxu0 %v2846_v44  ;;  %2874 = vmatprep.subr.bf16.mxu1 %v2846_v44 }
 0x1c9   : > { %v449_v20 = vpop.permute.xlu0 %448  ;;  %v1407_v24 = vld [vmem:[#allocation2 + $0x70] sm:$0xff]  ;;  %681 = vst.msk [vmem:[#allocation2 + $0xb0] sm:$0xff] %vm515_vm3, %v661_v19  ;;  %1748 = vmatmul.mubr.f32.gmra.mrb[2].mxu1 %v1402_v41 }
 0x1ca   : > { %470 = vst.msk [vmem:[#allocation2 + $0xa8] sm:$0xff] %vm466_vm2, %v449_v20  ;;  %1648 = vmatmul.mubr.f32.gmra.mrb[4].mxu0 %v1407_v24  ;;  %1249 = vrot.lane.b32.xlu1 %v4163_v22, %s3430_s15  ;;  %v2852_v22 = vpack.c.bf16 %v1524_v57, %v1523_v54  ;;  %v2522_v24 = vld [vmem:[%s3834_s30 + $0xa9] sm:$0xff]  ;;  %v2510_v54 = vld [vmem:[%s3834_s30 + $0x78] sm:$0xff] }
 0x1cb   : > { %941 = vrot.lane.b32.xlu0 %v4289_v37, %s3430_s15  ;;  %2849 = vmatpush3.bf16.msra.mxu0 %v2848_v45  ;;  %1227 = vst.msk [vmem:[#allocation2 + $0x98] sm:$0xff] %vm417_vm1, %v2510_v54  ;;  %v2538_v57 = vld [vmem:[%s3834_s30 + $0xab] sm:$0xff] }
 0x1cc   : > { %v980_v51 = vpop.permute.xlu1 %979  ;;  %2882 = vmatpush3.bf16.msra.mxu1 %v2848_v45  ;;  %2851 = vmatprep.subr.bf16.mxu0 %v2850_v53 }
 0x1cd   : > { %v771_v52 = vpop.permute.xlu0 %770  ;;  %1001 = vst.msk [vmem:[#allocation2 + $0x88] sm:$0xff] %vm515_vm3, %v980_v51  ;;  %2875 = vmatprep.subr.bf16.mxu1 %v2850_v53 }
 0x1ce   : > { %792 = vst.msk [vmem:[#allocation2 + $0x80] sm:$0xff] %vm466_vm2, %v771_v52  ;;  %989 = vrot.lane.b32.xlu1 %v4298_v48, %s3429_s20  ;;  %v4363_v52 = vld [vmem:[%s3834_s30 + $0x93] sm:$0xff] }
 0x1cf   : > { %780 = vrot.lane.b32.xlu0 %v4196_v63, %s3430_s15  ;;  %2853 = vmatpush3.bf16.msra.mxu0 %v2852_v22 }
 0x1d0   : > { %v709_v60 = vpop.permute.xlu1 %708  ;;  %2883 = vmatpush3.bf16.msra.mxu1 %v2852_v22  ;;  %2855 = vmatprep.subr.bf16.mxu0 %v2854_v61 }
 0x1d1   : > { %v498_v14 = vpop.permute.xlu0 %497  ;;  %729 = vst.msk [vmem:[#allocation2 + $0xb0] sm:$0xff] %vm564_vm4, %v709_v60  ;;  %2876 = vmatprep.subr.bf16.mxu1 %v2854_v61  ;;  %v2478_v60 = vld [vmem:[%s3834_s30 + $0x61] sm:$0xff] }
 0x1d2   : > { %519 = vst.msk [vmem:[#allocation2 + $0xa8] sm:$0xff] %vm515_vm3, %v498_v14  ;;  %1297 = vrot.lane.b32.xlu1 %v4010_v55, %s3429_s20 }
 0x1d3   : > { %1088 = vrot.lane.b32.xlu0 %v3953_v26, %s3430_s15  ;;  %2857 = vmatpush3.bf16.msra.mxu0 %v2856_v4  ;;  %v2860_v26 = vpack.c.bf16 %v1528_v34, %v1527_v1  ;;  %1066 = vst.msk [vmem:[#allocation2 + $0x90] sm:$0xff] %vm417_vm1, %v2478_v60 }
 0x1d4   : > { %v1029_v10 = vpop.permute.xlu1 %1028  ;;  %2884 = vmatpush3.bf16.msra.mxu1 %v2856_v4  ;;  %2859 = vmatprep.subr.bf16.mxu0 %v2858_v32 }
 0x1d5   : > { %v820_v30 = vpop.permute.xlu0 %819  ;;  %1050 = vst.msk [vmem:[#allocation2 + $0x88] sm:$0xff] %vm564_vm4, %v1029_v10  ;;  %2877 = vmatprep.subr.bf16.mxu1 %v2858_v32  ;;  %v1546_v32 = vld [vmem:[#allocation10 + $0x308] sm:$0xff] }
 0x1d6   : > { %841 = vst.msk [vmem:[#allocation2 + $0x80] sm:$0xff] %vm515_vm3, %v820_v30  ;;  %1038 = vrot.lane.b32.xlu1 %v2475_v8, %s3431_s21 }
 0x1d7   : > { %829 = vrot.lane.b32.xlu0 %v4213_v9, %s3429_s20  ;;  %2861 = vmatpush3.bf16.msra.mxu0 %v2860_v26  ;;  %v4331_v9 = vld [vmem:[%s3834_s30 + $0x81] sm:$0xff] }
 0x1d8   : > { %v868_v35 = vpop.permute.xlu1 %867  ;;  %v1415_v36 = vld [vmem:[#allocation2 + $0xb0] sm:$0xff]  ;;  %2885 = vmatpush3.bf16.msra.mxu1 %v2860_v26 }
 0x1d9   : > { %v547_v47 = vpop.permute.xlu0 %546  ;;  %889 = vst.msk [vmem:[#allocation2 + $0x80] sm:$0xff] %vm564_vm4, %v868_v35  ;;  %1652 = vmatprep.mubr.f32.mxu0 %v1415_v36  ;;  %v2540_v35 = vld [vmem:[%s3834_s30 + $0x64] sm:$0xff]  ;;  %v2541_v36 = vld [vmem:[%s3834_s30 + $0x6c] sm:$0xff] }
 0x1da   : > { %568 = vst.msk [vmem:[#allocation2 + $0xa8] sm:$0xff] %vm564_vm4, %v547_v47  ;;  %1345 = vrot.lane.b32.xlu1 %v4116_v18, %s3431_s21  ;;  %v2479_v47 = vld [vmem:[%s3834_s30 + $0x69] sm:$0xff] }
 0x1db   : > { %1136 = vrot.lane.b32.xlu0 %v3933_v21, %s3429_s20  ;;  %1385 = vst.msk [vmem:[#allocation2 + $0x30] sm:$0xff] %vm417_vm1, %v2540_v35  ;;  %1067 = vst.msk [vmem:[#allocation2 + $0xc8] sm:$0xff] %vm417_vm1, %v2479_v47 }
 0x1dc   : > { %v934_v40 = vpop.permute.xlu1 %933  ;;  %v1410_v20 = vld [vmem:[#allocation2 + $0x88] sm:$0xff]  ;;  %1386 = vst.msk [vmem:[#allocation2 + $0x68] sm:$0xff] %vm417_vm1, %v2541_v36 }
 0x1dd   : > { %v615_v19 = vpop.permute.xlu0 %614  ;;  %954 = vst.msk [vmem:[#allocation2 + $0xc0] sm:$0xff] %vm466_vm2, %v934_v40  ;;  %1752 = vmatprep.mubr.f32.mxu1 %v1410_v20 }
 0x1de   : > { %634 = vst.msk [vmem:[#allocation2 + $0xe8] sm:$0xff] %vm466_vm2, %v615_v19  ;;  %1184 = vrot.lane.b32.xlu1 %v4051_v13, %s3431_s21  ;;  %v4346_v13 = vld [vmem:[%s3834_s30 + $0x92] sm:$0xff] }
 0x1df   : > { %877 = vrot.lane.b32.xlu0 %v4331_v9, %s3431_s21 }
 0x1e0   : > { %v663_v41 = vpop.permute.xlu1 %662  ;;  %v1409_v42 = vld [vmem:[#allocation2 + $0x80] sm:$0xff] }
 0x1e1   : > { %v451_v21 = vpop.permute.xlu0 %450  ;;  %v1414_v44 = vld [vmem:[#allocation2 + $0xa8] sm:$0xff]  ;;  %682 = vst.msk [vmem:[#allocation2 + $0xe8] sm:$0xff] %vm515_vm3, %v663_v41  ;;  %1753 = vmatmul.mubr.f32.gmra.mrb[4].mxu1 %v1409_v42  ;;  %v2512_v42 = vld [vmem:[%s3834_s30 + $0x90] sm:$0xff] }
 0x1e2   : > { %471 = vst.msk [vmem:[#allocation2 + $0xe0] sm:$0xff] %vm466_vm2, %v451_v21  ;;  %1653 = vmatmul.mubr.f32.gmra.mrb[6].mxu0 %v1414_v44  ;;  %1261 = vrot.lane.b32.xlu1 %v2522_v24, %s3430_s15  ;;  %v2542_v24 = vld [vmem:[%s3834_s30 + $0x7c] sm:$0xff] }
 0x1e3   : > { %1251 = vrot.lane.b32.xlu0 %v4229_v29, %s3430_s15  ;;  %v2515_v29 = vld [vmem:[%s3834_s30 + $0xb0] sm:$0xff]  ;;  %1387 = vst.msk [vmem:[#allocation2 + $0xa0] sm:$0xff] %vm417_vm1, %v2542_v24  ;;  %1229 = vst.msk [vmem:[#allocation2 + $0x108] sm:$0xff] %vm417_vm1, %v2512_v42 }
 0x1e4   : > { %v982_v43 = vpop.permute.xlu1 %981  ;;  %1232 = vst.msk [vmem:[#allocation2 + $0x1b0] sm:$0xff] %vm417_vm1, %v2515_v29  ;;  %v2546_v29 = vld [vmem:[%s3834_s30 + $0xac] sm:$0xff] }
 0x1e5   : > { %v773_v45 = vpop.permute.xlu0 %772  ;;  %1002 = vst.msk [vmem:[#allocation2 + $0xc0] sm:$0xff] %vm515_vm3, %v982_v43 }
 0x1e6   : > { %793 = vst.msk [vmem:[#allocation2 + $0xb8] sm:$0xff] %vm466_vm2, %v773_v45  ;;  %1100 = vrot.lane.b32.xlu1 %v4346_v13, %s3430_s15 }
 0x1e7   : > { %1090 = vrot.lane.b32.xlu0 %v3979_v50, %s3430_s15  ;;  %1391 = vst.msk [vmem:[#allocation2 + $0x180] sm:$0xff] %vm417_vm1, %v2546_v29 }
 0x1e8   : > { %v711_v49 = vpop.permute.xlu1 %710 }
 0x1e9   : > { %v500_v51 = vpop.permute.xlu0 %499  ;;  %730 = vst.msk [vmem:[#allocation2 + $0xe8] sm:$0xff] %vm564_vm4, %v711_v49 }
 0x1ea   : > { %520 = vst.msk [vmem:[#allocation2 + $0xe0] sm:$0xff] %vm515_vm3, %v500_v51  ;;  %1309 = vrot.lane.b32.xlu1 %v2530_v16, %s3429_s20  ;;  %v2480_v51 = vld [vmem:[%s3834_s30 + $0x79] sm:$0xff] }
 0x1eb   : > { %1299 = vrot.lane.b32.xlu0 %v4019_v27, %s3429_s20  ;;  %1068 = vst.msk [vmem:[#allocation2 + $0x100] sm:$0xff] %vm417_vm1, %v2480_v51 }
 0x1ec   : > { %v1031_v50 = vpop.permute.xlu1 %1030 }
 0x1ed   : > { %v822_v53 = vpop.permute.xlu0 %821  ;;  %1051 = vst.msk [vmem:[#allocation2 + $0xc0] sm:$0xff] %vm564_vm4, %v1031_v50 }
 0x1ee   : > { %842 = vst.msk [vmem:[#allocation2 + $0xb8] sm:$0xff] %vm515_vm3, %v822_v53  ;;  %1148 = vrot.lane.b32.xlu1 %v4363_v52, %s3429_s20  ;;  %v2513_v53 = vld [vmem:[%s3834_s30 + $0x98] sm:$0xff] }
 0x1ef   : > { %1138 = vrot.lane.b32.xlu0 %v4076_v7, %s3429_s20  ;;  %1230 = vst.msk [vmem:[#allocation2 + $0x140] sm:$0xff] %vm417_vm1, %v2513_v53 }
 0x1f0   : > { %v870_v22 = vpop.permute.xlu1 %869  ;;  %v1422_v59 = vld [vmem:[#allocation2 + $0xe8] sm:$0xff] }
 0x1f1   : > { %v549_v58 = vpop.permute.xlu0 %548  ;;  %890 = vst.msk [vmem:[#allocation2 + $0xb8] sm:$0xff] %vm564_vm4, %v870_v22  ;;  %1657 = vmatprep.mubr.f32.mxu0 %v1422_v59 }
 0x1f2   : > { %569 = vst.msk [vmem:[#allocation2 + $0xe0] sm:$0xff] %vm564_vm4, %v549_v58  ;;  %1357 = vrot.lane.b32.xlu1 %v2538_v57, %s3431_s21 }
 0x1f3   : > { %1347 = vrot.lane.b32.xlu0 %v4002_v38, %s3431_s21 }
 0x1f4   : > { %v936_v14 = vpop.permute.xlu1 %935  ;;  %v1417_v61 = vld [vmem:[#allocation2 + $0xc0] sm:$0xff] }
 0x1f5   : > { %v617_v7 = vpop.permute.xlu0 %616  ;;  %955 = vst.msk [vmem:[#allocation2 + $0xf8] sm:$0xff] %vm466_vm2, %v936_v14  ;;  %1757 = vmatprep.mubr.f32.mxu1 %v1417_v61 }
 0x1f6   : > { %635 = vst.msk [vmem:[#allocation2 + $0x120] sm:$0xff] %vm466_vm2, %v617_v7  ;;  %1196 = vrot.lane.b32.xlu1 %v4094_v23, %s3431_s21  ;;  %v4394_v23 = vld [vmem:[%s3834_s30 + $0x9a] sm:$0xff] }
 0x1f7   : > { %1186 = vrot.lane.b32.xlu0 %v4087_v25, %s3431_s21 }
 0x1f8   : > { %v665_v2 = vpop.permute.xlu1 %664  ;;  %v1416_v8 = vld [vmem:[#allocation2 + $0xb8] sm:$0xff] }
 0x1f9   : > { %v453_v4 = vpop.permute.xlu0 %452  ;;  %v1421_v6 = vld [vmem:[#allocation2 + $0xe0] sm:$0xff]  ;;  %683 = vst.msk [vmem:[#allocation2 + $0x120] sm:$0xff] %vm515_vm3, %v665_v2  ;;  %1758 = vmatmul.mubr.f32.gmra.mrb[6].mxu1 %v1416_v8 }
 0x1fa   : > { %472 = vst.msk [vmem:[#allocation2 + $0x118] sm:$0xff] %vm466_vm2, %v453_v4  ;;  %1658 = vmatmul.mubr.f32.gmra.mrb[8].mxu0 %v1421_v6  ;;  %1263 = vrot.lane.b32.xlu1 %v2523_v0, %s3430_s15 }
 0x1fb   : > { %1253 = vrot.lane.b32.xlu0 %v4278_v12, %s3430_s15  ;;  %v2511_v12 = vld [vmem:[%s3834_s30 + $0x80] sm:$0xff] }
 0x1fc   : > { %v984_v25 = vpop.permute.xlu1 %983  ;;  %1228 = vst.msk [vmem:[#allocation2 + $0xd0] sm:$0xff] %vm417_vm1, %v2511_v12 }
 0x1fd   : > { %v775_v11 = vpop.permute.xlu0 %774  ;;  %1003 = vst.msk [vmem:[#allocation2 + $0xf8] sm:$0xff] %vm515_vm3, %v984_v25 }
 0x1fe   : > { %794 = vst.msk [vmem:[#allocation2 + $0xf0] sm:$0xff] %vm466_vm2, %v775_v11  ;;  %1102 = vrot.lane.b32.xlu1 %v4394_v23, %s3430_s15 }
 0x1ff   : > { %1092 = vrot.lane.b32.xlu0 %v4010_v55, %s3430_s15  ;;  %v1545_v55 = vld [vmem:[#allocation10 + $0x300] sm:$0xff] }
 0x200   : > { %v713_v10 = vpop.permute.xlu1 %712  ;;  %v4413_v26 = vpack.c.bf16 %v1546_v32, %v1545_v55 }
 0x201   : > { %v502_v30 = vpop.permute.xlu0 %501  ;;  %731 = vst.msk [vmem:[#allocation2 + $0x120] sm:$0xff] %vm564_vm4, %v713_v10 }
 0x202   : > { %521 = vst.msk [vmem:[#allocation2 + $0x118] sm:$0xff] %vm515_vm3, %v502_v30  ;;  %1311 = vrot.lane.b32.xlu1 %v2531_v15, %s3429_s20  ;;  %2863 = vmatprep.subr.bf16.mxu1 %v4413_v26 }
 0x203   : > { %1301 = vrot.lane.b32.xlu0 %v4122_v3, %s3429_s20 }
 0x204   : > { %v1033_v1 = vpop.permute.xlu1 %1032 }
 0x205   : > { %v824_v34 = vpop.permute.xlu0 %823  ;;  %1052 = vst.msk [vmem:[#allocation2 + $0xf8] sm:$0xff] %vm564_vm4, %v1033_v1 }
 0x206   : > { %843 = vst.msk [vmem:[#allocation2 + $0xf0] sm:$0xff] %vm515_vm3, %v824_v34  ;;  %1150 = vrot.lane.b32.xlu1 %v4411_v31, %s3429_s20 }
 0x207   : > { %1140 = vrot.lane.b32.xlu0 %v4116_v18, %s3429_s20  ;;  %v2543_v18 = vld [vmem:[%s3834_s30 + $0x84] sm:$0xff] }
 0x208   : > { %v872_v40 = vpop.permute.xlu1 %871  ;;  %v1429_v20 = vld [vmem:[#allocation2 + $0x120] sm:$0xff]  ;;  %1388 = vst.msk [vmem:[#allocation2 + $0xd8] sm:$0xff] %vm417_vm1, %v2543_v18 }
 0x209   : > { %v551_v19 = vpop.permute.xlu0 %550  ;;  %891 = vst.msk [vmem:[#allocation2 + $0xf0] sm:$0xff] %vm564_vm4, %v872_v40  ;;  %1662 = vmatprep.mubr.f32.mxu0 %v1429_v20 }
 0x20a   : > { %570 = vst.msk [vmem:[#allocation2 + $0x118] sm:$0xff] %vm564_vm4, %v551_v19  ;;  %1359 = vrot.lane.b32.xlu1 %v2539_v39, %s3431_s21 }
 0x20b   : > { %1349 = vrot.lane.b32.xlu0 %v4240_v33, %s3431_s21 }
 0x20c   : > { %v938_v41 = vpop.permute.xlu1 %937  ;;  %v1424_v44 = vld [vmem:[#allocation2 + $0xf8] sm:$0xff] }
 0x20d   : > { %v619_v21 = vpop.permute.xlu0 %618  ;;  %956 = vst.msk [vmem:[#allocation2 + $0x130] sm:$0xff] %vm466_vm2, %v938_v41  ;;  %1762 = vmatprep.mubr.f32.mxu1 %v1424_v44 }
 0x20e   : > { %636 = vst.msk [vmem:[#allocation2 + $0x158] sm:$0xff] %vm466_vm2, %v619_v21  ;;  %1198 = vrot.lane.b32.xlu1 %v4142_v46, %s3431_s21 }
 0x20f   : > { %1188 = vrot.lane.b32.xlu0 %v4130_v5, %s3431_s21  ;;  %v2547_v5 = vld [vmem:[%s3834_s30 + $0xb4] sm:$0xff] }
 0x210   : > { %v667_v43 = vpop.permute.xlu1 %666  ;;  %v1423_v49 = vld [vmem:[#allocation2 + $0xf0] sm:$0xff]  ;;  %1392 = vst.msk [vmem:[#allocation2 + $0x1b8] sm:$0xff] %vm417_vm1, %v2547_v5 }
 0x211   : > { %v455_v45 = vpop.permute.xlu0 %454  ;;  %v1428_v16 = vld [vmem:[#allocation2 + $0x118] sm:$0xff]  ;;  %684 = vst.msk [vmem:[#allocation2 + $0x158] sm:$0xff] %vm515_vm3, %v667_v43  ;;  %1763 = vmatmul.mubr.f32.gmra.mrb[8].mxu1 %v1423_v49 }
 0x212   : > { %473 = vst.msk [vmem:[#allocation2 + $0x150] sm:$0xff] %vm466_vm2, %v455_v45  ;;  %1663 = vmatmul.mubr.f32.gmra.mrb[10].mxu0 %v1428_v16  ;;  %1094 = vrot.lane.b32.xlu1 %v4019_v27, %s3430_s15  ;;  %v1547_v16 = vld [vmem:[#allocation10 + $0x310] sm:$0xff] }
 0x213   : > { %1255 = vrot.lane.b32.xlu0 %v4331_v9, %s3430_s15 }
 0x214   : > { %v986_v46 = vpop.permute.xlu1 %985 }
 0x215   : > { %v777_v50 = vpop.permute.xlu0 %776  ;;  %1004 = vst.msk [vmem:[#allocation2 + $0x130] sm:$0xff] %vm515_vm3, %v986_v46  ;;  %v1548_v46 = vld [vmem:[#allocation10 + $0x318] sm:$0xff] }
 0x216   : > { %795 = vst.msk [vmem:[#allocation2 + $0x128] sm:$0xff] %vm466_vm2, %v777_v50  ;;  %1142 = vrot.lane.b32.xlu1 %v4002_v38, %s3429_s20  ;;  %v2481_v38 = vld [vmem:[%s3834_s30 + $0x81] sm:$0xff] }
 0x217   : > { %1303 = vrot.lane.b32.xlu0 %v4170_v56, %s3429_s20  ;;  %1069 = vst.msk [vmem:[#allocation2 + $0x138] sm:$0xff] %vm417_vm1, %v2481_v38 }
 0x218   : > { %v715_v27 = vpop.permute.xlu1 %714 }
 0x219   : > { %v504_v9 = vpop.permute.xlu0 %503  ;;  %732 = vst.msk [vmem:[#allocation2 + $0x158] sm:$0xff] %vm564_vm4, %v715_v27 }
 0x21a   : > { %522 = vst.msk [vmem:[#allocation2 + $0x150] sm:$0xff] %vm515_vm3, %v504_v9  ;;  %1190 = vrot.lane.b32.xlu1 %v4196_v63, %s3431_s21  ;;  %v2866_v9 = vpack.c.bf16 %v1548_v46, %v1547_v16 }
 0x21b   : > { %1351 = vrot.lane.b32.xlu0 %v4289_v37, %s3431_s21 }
 0x21c   : > { %v1035_v54 = vpop.permute.xlu1 %1034 }
 0x21d   : > { %v826_v57 = vpop.permute.xlu0 %825  ;;  %1053 = vst.msk [vmem:[#allocation2 + $0x130] sm:$0xff] %vm564_vm4, %v1035_v54 }
 0x21e   : > { %844 = vst.msk [vmem:[#allocation2 + $0x128] sm:$0xff] %vm515_vm3, %v826_v57  ;;  %1096 = vrot.lane.b32.xlu1 %v4122_v3, %s3430_s15 }
 0x21f   : > { %1257 = vrot.lane.b32.xlu0 %v4187_v62, %s3430_s15 }
 0x220   : > { %v874_v22 = vpop.permute.xlu1 %873  ;;  %v1436_v58 = vld [vmem:[#allocation2 + $0x158] sm:$0xff] }
 0x221   : > { %v553_v63 = vpop.permute.xlu0 %552  ;;  %892 = vst.msk [vmem:[#allocation2 + $0x128] sm:$0xff] %vm564_vm4, %v874_v22  ;;  %1667 = vmatprep.mubr.f32.mxu0 %v1436_v58 }
 0x222   : > { %571 = vst.msk [vmem:[#allocation2 + $0x150] sm:$0xff] %vm564_vm4, %v553_v63  ;;  %1144 = vrot.lane.b32.xlu1 %v4240_v33, %s3429_s20 }
 0x223   : > { %1305 = vrot.lane.b32.xlu0 %v4346_v13, %s3429_s20 }
 0x224   : > { %v940_v62 = vpop.permute.xlu1 %939  ;;  %v1431_v60 = vld [vmem:[#allocation2 + $0x130] sm:$0xff] }
 0x225   : > { %v621_v59 = vpop.permute.xlu0 %620  ;;  %957 = vst.msk [vmem:[#allocation2 + $0x168] sm:$0xff] %vm466_vm2, %v940_v62  ;;  %1767 = vmatprep.mubr.f32.mxu1 %v1431_v60 }
 0x226   : > { %637 = vst.msk [vmem:[#allocation2 + $0x190] sm:$0xff] %vm466_vm2, %v621_v59  ;;  %1192 = vrot.lane.b32.xlu1 %v4255_v17, %s3431_s21 }
 0x227   : > { %1353 = vrot.lane.b32.xlu0 %v4363_v52, %s3431_s21 }
 0x228   : > { %v669_v3 = vpop.permute.xlu1 %668  ;;  %v1430_v7 = vld [vmem:[#allocation2 + $0x128] sm:$0xff] }
 0x229   : > { %v457_v14 = vpop.permute.xlu0 %456  ;;  %v1435_v13 = vld [vmem:[#allocation2 + $0x150] sm:$0xff]  ;;  %685 = vst.msk [vmem:[#allocation2 + $0x190] sm:$0xff] %vm515_vm3, %v669_v3  ;;  %1768 = vmatmul.mubr.f32.gmra.mrb[10].mxu1 %v1430_v7 }
 0x22a   : > { %474 = vst.msk [vmem:[#allocation2 + $0x188] sm:$0xff] %vm466_vm2, %v457_v14  ;;  %1668 = vmatmul.mubr.f32.gmra.mrb[12].mxu0 %v1435_v13  ;;  %1098 = vrot.lane.b32.xlu1 %v4170_v56, %s3430_s15 }
 0x22b   : > { %1259 = vrot.lane.b32.xlu0 %v4220_v28, %s3430_s15 }
 0x22c   : > { %v988_v33 = vpop.permute.xlu1 %987 }
 0x22d   : > { %v779_v52 = vpop.permute.xlu0 %778  ;;  %1005 = vst.msk [vmem:[#allocation2 + $0x168] sm:$0xff] %vm515_vm3, %v988_v33 }
 0x22e   : > { %796 = vst.msk [vmem:[#allocation2 + $0x160] sm:$0xff] %vm466_vm2, %v779_v52  ;;  %1146 = vrot.lane.b32.xlu1 %v4289_v37, %s3429_s20 }
 0x22f   : > { %1307 = vrot.lane.b32.xlu0 %v4394_v23, %s3429_s20 }
 0x230   : > { %v717_v17 = vpop.permute.xlu1 %716 }
 0x231   : > { %v506_v61 = vpop.permute.xlu0 %505  ;;  %733 = vst.msk [vmem:[#allocation2 + $0x190] sm:$0xff] %vm564_vm4, %v717_v17 }
 0x232   : > { %523 = vst.msk [vmem:[#allocation2 + $0x188] sm:$0xff] %vm515_vm3, %v506_v61  ;;  %1194 = vrot.lane.b32.xlu1 %v4298_v48, %s3431_s21 }
 0x233   : > { %1355 = vrot.lane.b32.xlu0 %v4411_v31, %s3431_s21 }
 0x234   : > { %v1037_v56 = vpop.permute.xlu1 %1036 }
 0x235   : > { %v828_v28 = vpop.permute.xlu0 %827  ;;  %1054 = vst.msk [vmem:[#allocation2 + $0x168] sm:$0xff] %vm564_vm4, %v1037_v56 }
 0x236   : > { %845 = vst.msk [vmem:[#allocation2 + $0x160] sm:$0xff] %vm515_vm3, %v828_v28 }
 0x238   : > { %v876_v0 = vpop.permute.xlu1 %875  ;;  %v1443_v2 = vld [vmem:[#allocation2 + $0x190] sm:$0xff] }
 0x239   : > { %v555_v37 = vpop.permute.xlu0 %554  ;;  %893 = vst.msk [vmem:[#allocation2 + $0x160] sm:$0xff] %vm564_vm4, %v876_v0  ;;  %1672 = vmatprep.mubr.f32.mxu0 %v1443_v2  ;;  %v1399_v2 = vld [vmem:[#allocation2 + $0x30] sm:$0xff] }
 0x23a   : > { %572 = vst.msk [vmem:[#allocation2 + $0x188] sm:$0xff] %vm564_vm4, %v555_v37 }
 0x23c   : > { %v1250_v4 = vpop.permute.xlu1 %1249  ;;  %v1438_v8 = vld [vmem:[#allocation2 + $0x168] sm:$0xff] }
 0x23d   : > { %v942_v6 = vpop.permute.xlu0 %941  ;;  %1273 = vst.msk [vmem:[#allocation2 + $0x28] sm:$0xff] %vm466_vm2, %v1250_v4  ;;  %1772 = vmatprep.mubr.f32.mxu1 %v1438_v8 }
 0x23e   : > { %958 = vst.msk [vmem:[#allocation2 + $0x1a0] sm:$0xff] %vm466_vm2, %v942_v6 }
 0x240   : > { %v990_v48 = vpop.permute.xlu1 %989  ;;  %v1437_v11 = vld [vmem:[#allocation2 + $0x160] sm:$0xff] }
 0x241   : > { %v781_v23 = vpop.permute.xlu0 %780  ;;  %v1442_v25 = vld [vmem:[#allocation2 + $0x188] sm:$0xff]  ;;  %1006 = vst.msk [vmem:[#allocation2 + $0x1a0] sm:$0xff] %vm515_vm3, %v990_v48  ;;  %1773 = vmatmul.mubr.f32.gmra.mrb[12].mxu1 %v1437_v11  ;;  %v1413_v11 = vld [vmem:[#allocation2 + $0xa0] sm:$0xff] }
 0x242   : > { %797 = vst.msk [vmem:[#allocation2 + $0x198] sm:$0xff] %vm466_vm2, %v781_v23  ;;  %1673 = vmatmul.mubr.f32.gmra.mrb[14].mxu0 %v1442_v25  ;;  %v1406_v25 = vld [vmem:[#allocation2 + $0x68] sm:$0xff] }
 0x244   : > { %v1298_v15 = vpop.permute.xlu1 %1297 }
 0x245   : > { %v1089_v10 = vpop.permute.xlu0 %1088  ;;  %1321 = vst.msk [vmem:[#allocation2 + $0x28] sm:$0xff] %vm515_vm3, %v1298_v15 }
 0x246   : > { %1112 = vst.msk [vmem:[#allocation2 + $0x20] sm:$0xff] %vm466_vm2, %v1089_v10 }
 0x248   : > { %v1039_v30 = vpop.permute.xlu1 %1038 }
 0x249   : > { %v830_v12 = vpop.permute.xlu0 %829  ;;  %1055 = vst.msk [vmem:[#allocation2 + $0x1a0] sm:$0xff] %vm564_vm4, %v1039_v30  ;;  %v1420_v30 = vld [vmem:[#allocation2 + $0xd8] sm:$0xff] }
 0x24a   : > { %846 = vst.msk [vmem:[#allocation2 + $0x198] sm:$0xff] %vm515_vm3, %v830_v12  ;;  %v1427_v12 = vld [vmem:[#allocation2 + $0x110] sm:$0xff] }
 0x24c   : > { %v1346_v31 = vpop.permute.xlu1 %1345 }
 0x24d   : > { %v1137_v55 = vpop.permute.xlu0 %1136  ;;  %1369 = vst.msk [vmem:[#allocation2 + $0x28] sm:$0xff] %vm564_vm4, %v1346_v31 }
 0x24e   : > { %1160 = vst.msk [vmem:[#allocation2 + $0x20] sm:$0xff] %vm515_vm3, %v1137_v55 }
 0x250   : > { %v1185_v32 = vpop.permute.xlu1 %1184  ;;  %v1445_v34 = vld [vmem:[#allocation2 + $0x1a0] sm:$0xff] }
 0x251   : > { %v878_v1 = vpop.permute.xlu0 %877  ;;  %1208 = vst.msk [vmem:[#allocation2 + $0x20] sm:$0xff] %vm564_vm4, %v1185_v32  ;;  %1777 = vmatprep.mubr.f32.mxu1 %v1445_v34  ;;  %v1434_v32 = vld [vmem:[#allocation2 + $0x148] sm:$0xff] }
 0x252   : > { %894 = vst.msk [vmem:[#allocation2 + $0x198] sm:$0xff] %vm564_vm4, %v878_v1  ;;  %v1441_v1 = vld [vmem:[#allocation2 + $0x180] sm:$0xff] }
 0x254   : > { %v1262_v35 = vpop.permute.xlu1 %1261  ;;  %v1398_v36 = vld [vmem:[#allocation2 + $0x28] sm:$0xff] }
 0x255   : > { %v1252_v47 = vpop.permute.xlu0 %1251  ;;  %1279 = vst.msk [vmem:[#allocation2 + $0x178] sm:$0xff] %vm466_vm2, %v1262_v35  ;;  %1847 = vmatprep.mubr.f32.mxu0 %v1398_v36 }
 0x256   : > { %1274 = vst.msk [vmem:[#allocation2 + $0x60] sm:$0xff] %vm466_vm2, %v1252_v47 }
 0x258   : > { %v1101_v39 = vpop.permute.xlu1 %1100  ;;  %v1397_v20 = vld [vmem:[#allocation2 + $0x20] sm:$0xff] }
 0x259   : > { %v1091_v40 = vpop.permute.xlu0 %1090  ;;  %v1444_v19 = vld [vmem:[#allocation2 + $0x198] sm:$0xff]  ;;  %1118 = vst.msk [vmem:[#allocation2 + $0x170] sm:$0xff] %vm466_vm2, %v1101_v39  ;;  %1848 = vmatmul.mubr.f32.vlgmr.msra.gmra.mrb[16].mxu0 %v1397_v20 }
 0x25a   : > { %1113 = vst.msk [vmem:[#allocation2 + $0x58] sm:$0xff] %vm466_vm2, %v1091_v40  ;;  %1778 = vmatmul.mubr.f32.gmra.mrb[14].mxu1 %v1444_v19  ;;  %v1448_v39 = vld [vmem:[#allocation2 + $0x1b8] sm:$0xff] }
 0x25c   : > { %v1310_v24 = vpop.permute.xlu1 %1309 }
 0x25d   : > { %v1300_v18 = vpop.permute.xlu0 %1299  ;;  %1327 = vst.msk [vmem:[#allocation2 + $0x178] sm:$0xff] %vm515_vm3, %v1310_v24 }
 0x25e   : > { %1322 = vst.msk [vmem:[#allocation2 + $0x60] sm:$0xff] %vm515_vm3, %v1300_v18 }
 0x260   : > { %v1149_v41 = vpop.permute.xlu1 %1148 }
 0x261   : > { %v1139_v21 = vpop.permute.xlu0 %1138  ;;  %1166 = vst.msk [vmem:[#allocation2 + $0x170] sm:$0xff] %vm515_vm3, %v1149_v41 }
 0x262   : > { %1161 = vst.msk [vmem:[#allocation2 + $0x58] sm:$0xff] %vm515_vm3, %v1139_v21 }
 0x264   : > { %v1358_v44 = vpop.permute.xlu1 %1357 }
 0x265   : > { %v1348_v42 = vpop.permute.xlu0 %1347  ;;  %1375 = vst.msk [vmem:[#allocation2 + $0x178] sm:$0xff] %vm564_vm4, %v1358_v44 }
 0x266   : > { %1370 = vst.msk [vmem:[#allocation2 + $0x60] sm:$0xff] %vm564_vm4, %v1348_v42 }
 0x268   : > { %v1197_v43 = vpop.permute.xlu1 %1196 }
 0x269   : > { %v1187_v45 = vpop.permute.xlu0 %1186  ;;  %1214 = vst.msk [vmem:[#allocation2 + $0x170] sm:$0xff] %vm564_vm4, %v1197_v43 }
 0x26a   : > { %1209 = vst.msk [vmem:[#allocation2 + $0x58] sm:$0xff] %vm564_vm4, %v1187_v45 }
 0x26c   : > { %v1264_v49 = vpop.permute.xlu1 %1263  ;;  %v1440_v5 = vld [vmem:[#allocation2 + $0x178] sm:$0xff] }
 0x26d   : > { %v1254_v51 = vpop.permute.xlu0 %1253  ;;  %v1405_v29 = vld [vmem:[#allocation2 + $0x60] sm:$0xff]  ;;  %1280 = vst.msk [vmem:[#allocation2 + $0x1b0] sm:$0xff] %vm466_vm2, %v1264_v49  ;;  %1877 = vmatprep.mubr.f32.mxu1 %v1440_v5 }
 0x26e   : > { %1275 = vst.msk [vmem:[#allocation2 + $0x98] sm:$0xff] %vm466_vm2, %v1254_v51  ;;  %1852 = vmatprep.mubr.f32.mxu0 %v1405_v29  ;;  %v2598_v50 = vpop.f32.mrb[0].mxu0 }
 0x26f   : > { %v2599_v27 = vpop.f32.mrb[1].mxu0 }
 0x270   : > { %v2600_v53 = vadd.f32 %v2599_v27, %v2598_v50  ;;  %v1103_v54 = vpop.permute.xlu1 %1102  ;;  %v1439_v22 = vld [vmem:[#allocation2 + $0x170] sm:$0xff] }
 0x271   : > { %v1093_v57 = vpop.permute.xlu0 %1092  ;;  %v1404_v38 = vld [vmem:[#allocation2 + $0x58] sm:$0xff]  ;;  %1119 = vst.msk [vmem:[#allocation2 + $0x1a8] sm:$0xff] %vm466_vm2, %v1103_v54  ;;  %1878 = vmatmul.mubr.f32.vlgmr.msra.gmra.mrb[16].mxu1 %v1439_v22 }
 0x272   : > { %1114 = vst.msk [vmem:[#allocation2 + $0x90] sm:$0xff] %vm466_vm2, %v1093_v57  ;;  %1853 = vmatmul.mubr.f32.gmra.mrb[18].mxu0 %v1404_v38  ;;  %2865 = vmatpush3.bf16.msra.mxu1 %v4413_v26 }
 0x273   : > { %2867 = vmatprep.subr.bf16.mxu1 %v2866_v9 }
 0x274   : > { %v1312_v63 = vpop.permute.xlu1 %1311 }
 0x275   : > { %v1302_v58 = vpop.permute.xlu0 %1301  ;;  %1328 = vst.msk [vmem:[#allocation2 + $0x1b0] sm:$0xff] %vm515_vm3, %v1312_v63 }
 0x276   : > { %1323 = vst.msk [vmem:[#allocation2 + $0x98] sm:$0xff] %vm515_vm3, %v1302_v58  ;;  %2869 = vmatpush3.bf16.msra.mxu1 %v2866_v9 }
 0x278   : > { %v1151_v62 = vpop.permute.xlu1 %1150 }
 0x279   : > { %v1141_v59 = vpop.permute.xlu0 %1140  ;;  %1167 = vst.msk [vmem:[#allocation2 + $0x1a8] sm:$0xff] %vm515_vm3, %v1151_v62 }
 0x27a   : > { %1162 = vst.msk [vmem:[#allocation2 + $0x90] sm:$0xff] %vm515_vm3, %v1141_v59 }
 0x27c   : > { %v1360_v60 = vpop.permute.xlu1 %1359 }
 0x27d   : > { %v1350_v3 = vpop.permute.xlu0 %1349  ;;  %1376 = vst.msk [vmem:[#allocation2 + $0x1b0] sm:$0xff] %vm564_vm4, %v1360_v60 }
 0x27e   : > { %1371 = vst.msk [vmem:[#allocation2 + $0x98] sm:$0xff] %vm564_vm4, %v1350_v3 }
 0x280   : > { %v1199_v26 = vpop.permute.xlu1 %1198 }
 0x281   : > { %v1189_v14 = vpop.permute.xlu0 %1188  ;;  %1215 = vst.msk [vmem:[#allocation2 + $0x1a8] sm:$0xff] %vm564_vm4, %v1199_v26 }
 0x282   : > { %1210 = vst.msk [vmem:[#allocation2 + $0x90] sm:$0xff] %vm564_vm4, %v1189_v14 }
 0x284   : > { %v1447_v52 = vld [vmem:[#allocation2 + $0x1b0] sm:$0xff]  ;;  %v2654_v17 = vpop.f32.mrb[0].mxu1  ;;  %v1095_v61 = vpop.permute.xlu1 %1094 }
 0x285   : > { %v1256_v13 = vpop.permute.xlu0 %1255  ;;  %v2601_v7 = vpop.f32.mrb[2].mxu0  ;;  %v1412_v33 = vld [vmem:[#allocation2 + $0x98] sm:$0xff]  ;;  %1882 = vmatprep.mubr.f32.mxu1 %v1447_v52  ;;  %1115 = vst.msk [vmem:[#allocation2 + $0xc8] sm:$0xff] %vm466_vm2, %v1095_v61 }
 0x286   : > { %1276 = vst.msk [vmem:[#allocation2 + $0xd0] sm:$0xff] %vm466_vm2, %v1256_v13  ;;  %1857 = vmatprep.mubr.f32.mxu0 %v1412_v33  ;;  %v2602_v56 = vpop.f32.mrb[3].mxu0  ;;  %v2655_v28 = vpop.f32.mrb[1].mxu1 }
 0x287   : > { %v2603_v0 = vadd.f32 %v2602_v56, %v2601_v7  ;;  %v2656_v37 = vadd.f32 %v2655_v28, %v2654_v17 }
 0x288   : > { %v1446_v8 = vld [vmem:[#allocation2 + $0x1a8] sm:$0xff]  ;;  %v1143_v23 = vpop.permute.xlu1 %1142 }
 0x289   : > { %v1304_v4 = vpop.permute.xlu0 %1303  ;;  %v1411_v6 = vld [vmem:[#allocation2 + $0x90] sm:$0xff]  ;;  %v4553_v48 = vadd.f32 %v2656_v37, %v2600_v53  ;;  %1883 = vmatmul.mubr.f32.gmra.mrb[18].mxu1 %v1446_v8  ;;  %1163 = vst.msk [vmem:[#allocation2 + $0xc8] sm:$0xff] %vm515_vm3, %v1143_v23 }
 0x28a   : > { %1324 = vst.msk [vmem:[#allocation2 + $0xd0] sm:$0xff] %vm515_vm3, %v1304_v4  ;;  %1858 = vmatmul.mubr.f32.gmra.mrb[20].mxu0 %v1411_v6  ;;  %2754 = vmatprep.mubr.msk.f32.mxu1 %vm417_vm1, %v1399_v2 }
 0x28c   : > { %v1191_v10 = vpop.permute.xlu1 %1190 }
 0x28d   : > { %v1352_v15 = vpop.permute.xlu0 %1351  ;;  %2755 = vmatmul.mubr.msk.f32.vlgmr.msra.gmra.mrb[20].mxu1 %vm417_vm1, %v1406_v25  ;;  %1211 = vst.msk [vmem:[#allocation2 + $0xc8] sm:$0xff] %vm564_vm4, %v1191_v10 }
 0x28e   : > { %1372 = vst.msk [vmem:[#allocation2 + $0xd0] sm:$0xff] %vm564_vm4, %v1352_v15  ;;  %2757 = vmatprep.mubr.msk.f32.mxu1 %vm417_vm1, %v1413_v11 }
 0x290   : > { %v1097_v55 = vpop.permute.xlu1 %1096 }
 0x291   : > { %v1258_v31 = vpop.permute.xlu0 %1257  ;;  %2758 = vmatmul.mubr.msk.f32.gmra.mrb[22].mxu1 %vm417_vm1, %v1420_v30  ;;  %1116 = vst.msk [vmem:[#allocation2 + $0x100] sm:$0xff] %vm466_vm2, %v1097_v55 }
 0x292   : > { %1277 = vst.msk [vmem:[#allocation2 + $0x108] sm:$0xff] %vm466_vm2, %v1258_v31  ;;  %2760 = vmatprep.mubr.msk.f32.mxu1 %vm417_vm1, %v1427_v12 }
 0x294   : > { %v1145_v47 = vpop.permute.xlu1 %1144  ;;  %v1418_v36 = vld [vmem:[#allocation2 + $0xc8] sm:$0xff] }
 0x295   : > { %v1306_v34 = vpop.permute.xlu0 %1305  ;;  %v1419_v35 = vld [vmem:[#allocation2 + $0xd0] sm:$0xff]  ;;  %2761 = vmatmul.mubr.msk.f32.gmra.mrb[24].mxu1 %vm417_vm1, %v1434_v32  ;;  %1164 = vst.msk [vmem:[#allocation2 + $0x100] sm:$0xff] %vm515_vm3, %v1145_v47 }
 0x296   : > { %1325 = vst.msk [vmem:[#allocation2 + $0x108] sm:$0xff] %vm515_vm3, %v1306_v34  ;;  %1862 = vmatprep.mubr.f32.mxu0 %v1419_v35  ;;  %2763 = vmatprep.mubr.msk.f32.mxu1 %vm417_vm1, %v1441_v1 }
 0x297   : > { %1863 = vmatmul.mubr.f32.gmra.mrb[22].mxu0 %v1418_v36 }
 0x298   : > { %v1193_v19 = vpop.permute.xlu1 %1192 }
 0x299   : > { %v1354_v40 = vpop.permute.xlu0 %1353  ;;  %2764 = vmatmul.mubr.msk.f32.gmra.mrb[26].mxu1 %vm417_vm1, %v1448_v39  ;;  %1212 = vst.msk [vmem:[#allocation2 + $0x100] sm:$0xff] %vm564_vm4, %v1193_v19 }
 0x29a   : > { %1373 = vst.msk [vmem:[#allocation2 + $0x108] sm:$0xff] %vm564_vm4, %v1354_v40 }
 0x29c   : > { %v2657_v18 = vpop.f32.mrb[2].mxu1  ;;  %v1099_v41 = vpop.permute.xlu1 %1098 }
 0x29d   : > { %v1260_v20 = vpop.permute.xlu0 %1259  ;;  %v2604_v24 = vpop.f32.mrb[4].mxu0  ;;  %1117 = vst.msk [vmem:[#allocation2 + $0x138] sm:$0xff] %vm466_vm2, %v1099_v41 }
 0x29e   : > { %1278 = vst.msk [vmem:[#allocation2 + $0x140] sm:$0xff] %vm466_vm2, %v1260_v20  ;;  %v2605_v21 = vpop.f32.mrb[5].mxu0  ;;  %v2658_v44 = vpop.f32.mrb[3].mxu1 }
 0x29f   : > { %v2606_v42 = vadd.f32 %v2605_v21, %v2604_v24  ;;  %v2659_v43 = vadd.f32 %v2658_v44, %v2657_v18 }
 0x2a0   : > { %v1147_v51 = vpop.permute.xlu1 %1146  ;;  %v1425_v29 = vld [vmem:[#allocation2 + $0x100] sm:$0xff] }
 0x2a1   : > { %v1308_v45 = vpop.permute.xlu0 %1307  ;;  %v1426_v16 = vld [vmem:[#allocation2 + $0x108] sm:$0xff]  ;;  %v4575_v49 = vadd.f32 %v2659_v43, %v2603_v0  ;;  %1165 = vst.msk [vmem:[#allocation2 + $0x138] sm:$0xff] %vm515_vm3, %v1147_v51 }
 0x2a2   : > { %1326 = vst.msk [vmem:[#allocation2 + $0x140] sm:$0xff] %vm515_vm3, %v1308_v45  ;;  %1867 = vmatprep.mubr.f32.mxu0 %v1426_v16 }
 0x2a3   : > { %1868 = vmatmul.mubr.f32.gmra.mrb[24].mxu0 %v1425_v29 }
 0x2a4   : > { %v1195_v46 = vpop.permute.xlu1 %1194 }
 0x2a5   : > { %v1356_v5 = vpop.permute.xlu0 %1355  ;;  %1213 = vst.msk [vmem:[#allocation2 + $0x138] sm:$0xff] %vm564_vm4, %v1195_v46 }
 0x2a6   : > { %1374 = vst.msk [vmem:[#allocation2 + $0x140] sm:$0xff] %vm564_vm4, %v1356_v5 }
 0x2ac   : > { %v1432_v27 = vld [vmem:[#allocation2 + $0x138] sm:$0xff] }
 0x2ad   : > { %v1433_v50 = vld [vmem:[#allocation2 + $0x140] sm:$0xff] }
 0x2ae   : > { %1872 = vmatprep.mubr.f32.mxu0 %v1433_v50 }
 0x2af   : > { %1873 = vmatmul.mubr.f32.gmra.mrb[26].mxu0 %v1432_v27 }
 0x2b4   : > { %v2660_v53 = vpop.f32.mrb[4].mxu1 }
 0x2b5   : > { %v2607_v9 = vpop.f32.mrb[6].mxu0  ;;  %v2661_v57 = vpop.f32.mrb[5].mxu1 }
 0x2b6   : > { %v2608_v54 = vpop.f32.mrb[7].mxu0  ;;  %v2662_v22 = vadd.f32 %v2661_v57, %v2660_v53 }
 0x2b7   : > { %v2609_v38 = vadd.f32 %v2608_v54, %v2607_v9 }
 0x2b8   : > { %v1755_v63 = vadd.f32 %v2662_v22, %v2606_v42 }
 0x2cc   : > { %v2663_v62 = vpop.f32.mrb[6].mxu1 }
 0x2cd   : > { %v2610_v58 = vpop.f32.mrb[8].mxu0  ;;  %v2664_v60 = vpop.f32.mrb[7].mxu1 }
 0x2ce   : > { %v2611_v59 = vpop.f32.mrb[9].mxu0  ;;  %v2665_v26 = vadd.f32 %v2664_v60, %v2663_v62 }
 0x2cf   : > { %v2612_v3 = vadd.f32 %v2611_v59, %v2610_v58 }
 0x2d0   : > { %v1760_v14 = vadd.f32 %v2665_v26, %v2609_v38 }
 0x2e4   : > { %v2666_v7 = vpop.f32.mrb[8].mxu1 }
 0x2e5   : > { %v2613_v13 = vpop.f32.mrb[10].mxu0  ;;  %v2667_v52 = vpop.f32.mrb[9].mxu1 }
 0x2e6   : > { %v2614_v33 = vpop.f32.mrb[11].mxu0  ;;  %v2668_v61 = vadd.f32 %v2667_v52, %v2666_v7 }
 0x2e7   : > { %v2615_v17 = vadd.f32 %v2614_v33, %v2613_v13 }
 0x2e8   : > { %v1765_v56 = vadd.f32 %v2668_v61, %v2612_v3 }
 0x2fc   : > { %v2669_v0 = vpop.f32.mrb[10].mxu1 }
 0x2fd   : > { %v2616_v28 = vpop.f32.mrb[12].mxu0  ;;  %v2670_v2 = vpop.f32.mrb[11].mxu1 }
 0x2fe   : > { %v2617_v37 = vpop.f32.mrb[13].mxu0  ;;  %v2671_v6 = vadd.f32 %v2670_v2, %v2669_v0 }
 0x2ff   : > { %v2618_v4 = vadd.f32 %v2617_v37, %v2616_v28 }
 0x300   : > { %v1770_v8 = vadd.f32 %v2671_v6, %v2615_v17 }
 0x314   : > { %v2672_v25 = vpop.f32.mrb[12].mxu1 }
 0x315   : > { %v2619_v23 = vpop.f32.mrb[14].mxu0  ;;  %v2673_v15 = vpop.f32.mrb[13].mxu1 }
 0x316   : > { %v2620_v11 = vpop.f32.mrb[15].mxu0  ;;  %v2674_v30 = vadd.f32 %v2673_v15, %v2672_v25 }
 0x317   : > { %v2621_v10 = vadd.f32 %v2620_v11, %v2619_v23 }
 0x318   : > { %v1775_v12 = vadd.f32 %v2674_v30, %v2618_v4 }
 0x32c   : > { %v2710_v55 = vpop.f32.mrb[16].mxu0 }
 0x32d   : > { %v2675_v31 = vpop.f32.mrb[14].mxu1  ;;  %v2711_v1 = vpop.f32.mrb[17].mxu0 }
 0x32e   : > { %v2676_v32 = vpop.f32.mrb[15].mxu1  ;;  %v2712_v35 = vadd.f32 %v2711_v1, %v2710_v55 }
 0x32f   : > { %v2677_v34 = vadd.f32 %v2676_v32, %v2675_v31 }
 0x330   : > { %v1850_v36 = vadd.f32 %v2712_v35, %v4553_v48 }
 0x331   : > { %v1780_v47 = vadd.f32 %v2677_v34, %v2621_v10 }
 0x344   : > { %v2728_v40 = vpop.f32.mrb[16].mxu1 }
 0x345   : > { %v2713_v39 = vpop.f32.mrb[18].mxu0  ;;  %v2729_v20 = vpop.f32.mrb[17].mxu1 }
 0x346   : > { %v2714_v19 = vpop.f32.mrb[19].mxu0  ;;  %v2730_v18 = vadd.f32 %v2729_v20, %v2728_v40 }
 0x347   : > { %v2715_v24 = vadd.f32 %v2714_v19, %v2713_v39 }
 0x348   : > { %v1880_v21 = vadd.f32 %v2730_v18, %v1775_v12 }
 0x349   : > { %v1855_v41 = vadd.f32 %v2715_v24, %v4575_v49 }
 0x35c   : > { %v2731_v42 = vpop.f32.mrb[18].mxu1 }
 0x35d   : > { %v2716_v44 = vpop.f32.mrb[20].mxu0  ;;  %v2732_v45 = vpop.f32.mrb[19].mxu1 }
 0x35e   : > { %v2717_v43 = vpop.f32.mrb[21].mxu0  ;;  %v2733_v51 = vadd.f32 %v2732_v45, %v2731_v42 }
 0x35f   : > { %v2718_v16 = vadd.f32 %v2717_v43, %v2716_v44 }
 0x360   : > { %v2756_v29 = vpop.f32.mrb[20].mxu1  ;;  %v1885_v46 = vadd.f32 %v2733_v51, %v1780_v47 }
 0x361   : > { %v1860_v5 = vadd.f32 %v2718_v16, %v1755_v63  ;;  %v4583_v50 = vadd.f32 %v2756_v29, %v1855_v41  ;;  %v1954_v48 = vpop.f32.mrb[21].mxu1 }
 0x362   : > { %v4585_v27 = vadd.f32 %v1954_v48, %v1850_v36 }
 0x363   : > { %v1998_v4 = vsel (!%p2556_p6), %vm417_vm1, %v4583_v50, 0.0  ;;  %v2023_v25 = vmul.f32 (!%p2556_p6), %v4583_v50, %v4583_v50 }
 0x364   : > { %v2759_v9 = vpop.f32.mrb[22].mxu1 }
 0x365   : > { %v1964_v53 = vpop.f32.mrb[23].mxu1  ;;  %v2031_v32 = vsel (!%p2556_p6), %vm417_vm1, %v2023_v25, 0.0 }
 0x366   : > { %v4587_v54 = vadd.f32 %v1964_v53, %v1860_v5 }
 0x368   : > { %v2762_v49 = vpop.f32.mrb[24].mxu1  ;;  %v2024_v15 = vmul.f32 (!%p2556_p6), %v4587_v54, %v4587_v54 }
 0x369   : > { %v1974_v38 = vpop.f32.mrb[25].mxu1 }
 0x36a   : > { %v2719_v57 = vpop.f32.mrb[22].mxu0  ;;  %v2033_v1 = vsel (!%p2556_p6), %vm417_vm1, %v2024_v15, 0.0 }
 0x36b   : > { %v2720_v22 = vpop.f32.mrb[23].mxu0 }
 0x36c   : > { %v2721_v58 = vadd.f32 %v2720_v22, %v2719_v57  ;;  %v2765_v62 = vpop.f32.mrb[26].mxu1 }
 0x36d   : > { %v4589_v60 = vadd.f32 %v2765_v62, %v1885_v46  ;;  %v1984_v63 = vpop.f32.mrb[27].mxu1  ;;  %v1996_v62 = vld [vmem:[#allocation3] sm:$0x1] (!%p2556_p6) }
 0x36e   : > { %v1865_v59 = vadd.f32 %v2721_v58, %v1760_v14  ;;  %v4591_v3 = vadd.f32 %v1984_v63, %v1880_v21  ;;  %v1997_v14 = vsel (!%p2556_p6), %vm417_vm1, %v4585_v27, 0.0 }
 0x36f   : > { %v1999_v6 = vadd.f32 (!%p2556_p6), %v1998_v4, %v1997_v14  ;;  %v2010_v41 = vsel (!%p2556_p6), %vm417_vm1, %v4589_v60, 0.0  ;;  %v2029_v42 = vmul.f32 (!%p2556_p6), %v4589_v60, %v4589_v60 }
 0x370   : > { %v4593_v26 = vadd.f32 %v2759_v9, %v1865_v59  ;;  %v2008_v40 = vsel (!%p2556_p6), %vm417_vm1, %v4591_v3, 0.0  ;;  %v2028_v24 = vmul.f32 (!%p2556_p6), %v4591_v3, %v4591_v3 }
 0x371   : > { %v2043_v46 = vsel (!%p2556_p6), %vm417_vm1, %v2029_v42, 0.0 }
 0x372   : > { %v2002_v23 = vsel (!%p2556_p6), %vm417_vm1, %v4593_v26, 0.0  ;;  %v2025_v10 = vmul.f32 (!%p2556_p6), %v4593_v26, %v4593_v26  ;;  %v2041_v51 = vsel (!%p2556_p6), %vm417_vm1, %v2028_v24, 0.0 }
 0x374   : > { %v2035_v39 = vsel (!%p2556_p6), %vm417_vm1, %v2025_v10, 0.0 }
 0x376   : > { %v2722_v13 = vpop.f32.mrb[24].mxu0 }
 0x377   : > { %v2723_v7 = vpop.f32.mrb[25].mxu0 }
 0x378   : > { %v2724_v33 = vadd.f32 %v2723_v7, %v2722_v13 }
 0x37a   : > { %v1870_v52 = vadd.f32 %v2724_v33, %v1765_v56  ;;  %v2000_v56 = vsel (!%p2556_p6), %vm417_vm1, %v4587_v54, 0.0 }
 0x37b   : > { %v2001_v11 = vadd.f32 (!%p2556_p6), %v2000_v56, %v1999_v6 }
 0x37c   : > { %v4595_v17 = vadd.f32 %v1974_v38, %v1870_v52  ;;  %v2021_v52 = vld [vmem:[#allocation4] sm:$0x1] (!%p2556_p6) }
 0x37d   : > { %v2003_v31 = vadd.f32 (!%p2556_p6), %v2002_v23, %v2001_v11 }
 0x37e   : > { %v2004_v30 = vsel (!%p2556_p6), %vm417_vm1, %v4595_v17, 0.0  ;;  %v2026_v55 = vmul.f32 (!%p2556_p6), %v4595_v17, %v4595_v17 }
 0x37f   : > { %v2005_v47 = vadd.f32 (!%p2556_p6), %v2004_v30, %v2003_v31 }
 0x380   : > { %v2037_v18 = vsel (!%p2556_p6), %vm417_vm1, %v2026_v55, 0.0 }
 0x382   : > { %v2725_v61 = vpop.f32.mrb[26].mxu0  ;;  %1995 = sbr.rel (%p2556_p6) target bundleno = 934 (0x3a6), region = 76 }
 0x383   : > { %v2726_v28 = vpop.f32.mrb[27].mxu0 }
 0x384   : > { %v2727_v0 = vadd.f32 %v2726_v28, %v2725_v61 }
 0x386   : > { %v1875_v37 = vadd.f32 %v2727_v0, %v1770_v8  ;;  %v2022_v8 = vmul.f32 (!%p2556_p6), %v4585_v27, %v4585_v27 }
 0x388   : > { %v4597_v2 = vadd.f32 %v2762_v49, %v1875_v37  ;;  %v2030_v12 = vsel (!%p2556_p6), %vm417_vm1, %v2022_v8, 0.0 }
 0x389   : > { %v2032_v35 = vadd.f32 %v2031_v32, %v2030_v12 }
 0x38a   : > { %v2006_v34 = vsel %vm417_vm1, %v4597_v2, 0.0  ;;  %v2027_v36 = vmul.f32 %v4597_v2, %v4597_v2 }
 0x38b   : > { %v2034_v19 = vadd.f32 %v2033_v1, %v2032_v35  ;;  %v2007_v20 = vadd.f32 %v2006_v34, %v2005_v47 }
 0x38c   : > { %v2039_v43 = vsel %vm417_vm1, %v2027_v36, 0.0 }
 0x38d   : > { %v2036_v21 = vadd.f32 %v2035_v39, %v2034_v19  ;;  %v2009_v44 = vadd.f32 %v2008_v40, %v2007_v20 }
 0x38f   : > { %v2038_v45 = vadd.f32 %v2037_v18, %v2036_v21  ;;  %v2011_v16 = vadd.f32 %v2010_v41, %v2009_v44 }
 0x391   : > { %v2040_v29 = vadd.f32 %v2039_v43, %v2038_v45  ;;  %v2012_v5 = vrot.slane %v2011_v16, 4 }
 0x393   : > { %v2042_v48 = vadd.f32 %v2041_v51, %v2040_v29  ;;  %v2013_v9 = vadd.f32 %v2012_v5, %v2011_v16 }
 0x395   : > { %v2044_v53 = vadd.f32 %v2043_v46, %v2042_v48  ;;  %v2014_v49 = vrot.slane %v2013_v9, 2 }
 0x397   : > { %v2045_v57 = vrot.slane %v2044_v53, 4  ;;  %v2015_v38 = vadd.f32 %v2014_v49, %v2013_v9 }
 0x399   : > { %v2046_v22 = vadd.f32 %v2045_v57, %v2044_v53  ;;  %v2016_v58 = vrot.slane %v2015_v38, 1 }
 0x39b   : > { %v2047_v59 = vrot.slane %v2046_v22, 2  ;;  %v2017_v63 = vadd.f32 %v2016_v58, %v2015_v38 }
 0x39d   : > { %v2048_v13 = vadd.f32 %v2047_v59, %v2046_v22  ;;  %v2018_v7 = vadd.f32 %v2017_v63, %v1996_v62 }
 0x39f   : > { %v2049_v33 = vrot.slane %v2048_v13, 1  ;;  %2020 = vst.msk [vmem:[#allocation3] sm:$0x1] %vm2019_vm5, %v2018_v7 }
 0x3a1   : > { %v2050_v61 = vadd.f32 %v2049_v33, %v2048_v13 }
 0x3a3   : > { %v2051_v28 = vadd.f32 %v2050_v61, %v2021_v52 }
 0x3a5   : > { %2052 = vst.msk [vmem:[#allocation4] sm:$0x1] %vm2019_vm5, %v2051_v28 }
 0x3a6 PF: > { %s4862_s0 = sld [smem:[#allocation25_spill]] }
 0x3ac   : > { %p2053_p1 = scmp.eq.s32.totalorder %s4862_s0, 3 }
 0x3ae   : > { %p2054_p2 = pnand %p2053_p1, %p400_p13 }
 0x3af   : > { %v2058_v0 = vld [vmem:[#allocation12] sm:$0x1] (!%p2054_p2)  ;;  %v2059_v37 = vld [vmem:[#allocation3] sm:$0x1] (!%p2054_p2)  ;;  %v2062_v6 = vld [vmem:[#allocation4] sm:$0x1] (!%p2054_p2) }
 0x3b0   : > { %2057 = sbr.rel (%p2054_p2) target bundleno = 976 (0x3d0), region = 80  ;;  %v2060_v14 = vmul.f32 (!%p2054_p2), 256.0, %v2058_v0  ;;  %v2063_v4 = vmul.f32 (!%p2054_p2), 2.0, %v2058_v0  ;;  %v2066_v56 = vmul.f32 (!%p2054_p2), %v2058_v0, %v2058_v0  ;;  %v2076_v32 = vld [vmem:[#allocation13] sm:$0x1] (!%p2054_p2)  ;;  %vm2078_vm6 = vcmask (!%p2054_p2), 253952  }
 0x3b1   : > { %v2080_v47 = vld [vmem:[#allocation15] sm:$0x1] (!%p2054_p2) }
 0x3b2   : > { %v2061_v23 = vadd.f32 (!%p2054_p2), %v2060_v14, %v2059_v37  ;;  %v2064_v8 = vmul.f32 (!%p2054_p2), %v2063_v4, %v2059_v37  ;;  %v2067_v25 = vmul.f32 (!%p2054_p2), 256.0, %v2066_v56 }
 0x3b4   : > { %v2065_v11 = vadd.f32 (!%p2054_p2), %v2064_v8, %v2062_v6  ;;  %v2070_v15 = vmul.f32 (!%p2054_p2), 0.00390625, %v2061_v23 }
 0x3b6   : > { %v2068_v10 = vadd.f32 (!%p2054_p2), %v2067_v25, %v2065_v11  ;;  %v2072_v30 = vmul.f32 (!%p2054_p2), %v2070_v15, %v2070_v15  ;;  %v2081_v1 = vsub.f32 (!%p2054_p2), %v2058_v0, %v2070_v15 }
 0x3b8   : > { %v2071_v12 = vmul.f32 0.00390625, %v2068_v10 }
 0x3ba   : > { %v2073_v31 = vsub.f32 %v2071_v12, %v2072_v30 }
 0x3bc   : > { %v2074_v55 = vadd.f32 1e-05, %v2073_v31 }
 0x3be   : > { %3062 = vrsqrt.f32 %v2074_v55 }
 0x3c8   : > { %v3063_v34 = vpop.eup %3062 }
 0x3c9   : > { %v2077_v35 = vmul.f32 %v3063_v34, %v2076_v32 }
 0x3cb   : > { %2079 = vst.msk [vmem:[#allocation5] sm:$0x1] %vm2078_vm6, %v2077_v35  ;;  %v2082_v36 = vmul.f32 %v2081_v1, %v2077_v35 }
 0x3cd   : > { %v2083_v39 = vadd.f32 %v2082_v36, %v2080_v47 }
 0x3cf   : > { %2084 = vst.msk [vmem:[#allocation6] sm:$0x1] %vm2078_vm6, %v2083_v39 }
 0x3d0 PF: > { %s4864_s29 = sld [smem:[#allocation26_spill]] }
 0x3d6   : > { %p2557_p5 = scmp.ne.s32.totalorder %s4864_s29, 1 }
 0x3d7   : > { %v2558_v40 = vld [vmem:[#allocation5] ss:$0 sm:$0xff] (!%p2557_p5)  ;;  %v2559_v19 = vld [vmem:[#allocation6] ss:$0 sm:$0xff] (!%p2557_p5)  ;;  %v2167_v15 = vld [vmem:[%s3853_s3] sm:$0xff] (!%p2557_p5) }
 0x3d8   : > { %2088 = sbr.rel (%p2557_p5) target bundleno = 1028 (0x404), region = 84  ;;  %v2096_v20 = vmul.f32 (!%p2557_p5), %v2558_v40, %v4585_v27  ;;  %v2097_v24 = vmul.f32 (!%p2557_p5), %v2558_v40, %v4583_v50  ;;  %v2098_v18 = vmul.f32 (!%p2557_p5), %v2558_v40, %v4587_v54  ;;  %v2099_v41 = vmul.f32 (!%p2557_p5), %v2558_v40, %v4593_v26  ;;  %v2168_v12 = vld [vmem:[%s3853_s3 + $0x8] sm:$0xff] (!%p2557_p5)  ;;  %v2169_v32 = vld [vmem:[%s3853_s3 + $0x10] sm:$0xff] (!%p2557_p5)  ;;  %v2170_v47 = vld [vmem:[%s3853_s3 + $0x18] sm:$0xff] (!%p2557_p5) }
 0x3d9   : > { %v2100_v21 = vmul.f32 (!%p2557_p5), %v2558_v40, %v4595_v17  ;;  %v2101_v44 = vmul.f32 (!%p2557_p5), %v2558_v40, %v4597_v2  ;;  %v2102_v42 = vmul.f32 (!%p2557_p5), %v2558_v40, %v4591_v3  ;;  %v2103_v43 = vmul.f32 (!%p2557_p5), %v2558_v40, %v4589_v60 }
 0x3da   : > { %v2111_v45 = vadd.f32 (!%p2557_p5), %v2559_v19, %v2096_v20  ;;  %v2112_v16 = vadd.f32 (!%p2557_p5), %v2559_v19, %v2097_v24  ;;  %v4652_v51 = vadd.f32 (!%p2557_p5), %v2559_v19, %v2098_v18  ;;  %v4654_v29 = vadd.f32 (!%p2557_p5), %v2559_v19, %v2099_v41  ;;  %v2172_v41 = vld [vmem:[%s3853_s3 + $0x28] sm:$0xff] (!%p2557_p5) }
 0x3db   : > { %v4656_v27 = vadd.f32 (!%p2557_p5), %v2559_v19, %v2100_v21  ;;  %v4658_v50 = vadd.f32 (!%p2557_p5), %v2559_v19, %v2101_v44  ;;  %v4660_v54 = vadd.f32 (!%p2557_p5), %v2559_v19, %v2102_v42  ;;  %v4662_v26 = vadd.f32 (!%p2557_p5), %v2559_v19, %v2103_v43  ;;  %v2171_v19 = vld [vmem:[%s3853_s3 + $0x20] sm:$0xff] (!%p2557_p5)  ;;  %v2173_v43 = vld [vmem:[%s3853_s3 + $0x30] sm:$0xff] (!%p2557_p5) }
 0x3dc   : > { %v2119_v17 = vsub.f32 (!%p2557_p5), 0.0, %v2111_v45  ;;  %v2120_v2 = vsub.f32 (!%p2557_p5), 0.0, %v2112_v16  ;;  %v2121_v3 = vsub.f32 (!%p2557_p5), 0.0, %v4652_v51  ;;  %v2122_v60 = vsub.f32 (!%p2557_p5), 0.0, %v4654_v29 }
 0x3dd   : > { %v2123_v5 = vsub.f32 (!%p2557_p5), 0.0, %v4656_v27  ;;  %v2124_v46 = vsub.f32 (!%p2557_p5), 0.0, %v4658_v50  ;;  %v2125_v48 = vsub.f32 (!%p2557_p5), 0.0, %v4660_v54  ;;  %v2126_v38 = vsub.f32 (!%p2557_p5), 0.0, %v4662_v26 }
 0x3de   : > { %v2127_v9 = vmul.f32 (!%p2557_p5), 1.442695, %v2119_v17  ;;  %v2129_v53 = vmul.f32 (!%p2557_p5), 1.442695, %v2120_v2  ;;  %v2131_v49 = vmul.f32 (!%p2557_p5), 1.442695, %v2121_v3 }
 0x3df   : > { %v2133_v57 = vmul.f32 1.442695, %v2122_v60  ;;  %v2135_v22 = vmul.f32 1.442695, %v2123_v5  ;;  %v2137_v58 = vmul.f32 1.442695, %v2124_v46 }
 0x3e0   : > { %3064 = vpow2.f32 %v2127_v9  ;;  %v2139_v62 = vmul.f32 1.442695, %v2125_v48  ;;  %v2141_v59 = vmul.f32 1.442695, %v2126_v38 }
 0x3e1   : > { %3066 = vpow2.f32 %v2129_v53 }
 0x3e2   : > { %3068 = vpow2.f32 %v2131_v49 }
 0x3e3   : > { %3070 = vpow2.f32 %v2133_v57 }
 0x3e4   : > { %3072 = vpow2.f32 %v2135_v22 }
 0x3e5   : > { %3074 = vpow2.f32 %v2137_v58 }
 0x3e6   : > { %3076 = vpow2.f32 %v2139_v62 }
 0x3e7   : > { %3078 = vpow2.f32 %v2141_v59 }
 0x3ea   : > { %v3065_v63 = vpop.eup %3064 }
 0x3eb   : > { %v3067_v13 = vpop.eup %3066  ;;  %v2143_v7 = vadd.f32 1.0, %v3065_v63 }
 0x3ec   : > { %v3069_v33 = vpop.eup %3068  ;;  %v2144_v52 = vadd.f32 1.0, %v3067_v13 }
 0x3ed   : > { %v3071_v61 = vpop.eup %3070  ;;  %3080 = vrcp.f32 %v2143_v7  ;;  %v2145_v28 = vadd.f32 1.0, %v3069_v33 }
 0x3ee   : > { %v3073_v0 = vpop.eup %3072  ;;  %3082 = vrcp.f32 %v2144_v52  ;;  %v2146_v37 = vadd.f32 1.0, %v3071_v61 }
 0x3ef   : > { %v3075_v14 = vpop.eup %3074  ;;  %3084 = vrcp.f32 %v2145_v28  ;;  %v2147_v4 = vadd.f32 1.0, %v3073_v0 }
 0x3f0   : > { %v3077_v56 = vpop.eup %3076  ;;  %3086 = vrcp.f32 %v2146_v37  ;;  %v2148_v6 = vadd.f32 1.0, %v3075_v14 }
 0x3f1   : > { %v3079_v23 = vpop.eup %3078  ;;  %3088 = vrcp.f32 %v2147_v4  ;;  %v2149_v8 = vadd.f32 1.0, %v3077_v56 }
 0x3f2   : > { %3090 = vrcp.f32 %v2148_v6  ;;  %v2150_v25 = vadd.f32 1.0, %v3079_v23 }
 0x3f3   : > { %3092 = vrcp.f32 %v2149_v8 }
 0x3f4   : > { %3094 = vrcp.f32 %v2150_v25 }
 0x3f7   : > { %v3081_v11 = vpop.eup %3080 }
 0x3f8   : > { %v3083_v10 = vpop.eup %3082  ;;  %v2159_v30 = vmul.f32 %v3081_v11, %v2111_v45 }
 0x3f9   : > { %v3085_v31 = vpop.eup %3084  ;;  %v2160_v55 = vmul.f32 %v3083_v10, %v2112_v16 }
 0x3fa   : > { %v3087_v1 = vpop.eup %3086  ;;  %v2175_v34 = vadd.f32 %v2167_v15, %v2159_v30  ;;  %v2161_v35 = vmul.f32 %v3085_v31, %v4652_v51 }
 0x3fb   : > { %v3089_v36 = vpop.eup %3088  ;;  %v2176_v39 = vadd.f32 %v2168_v12, %v2160_v55  ;;  %v2162_v40 = vmul.f32 %v3087_v1, %v4654_v29  ;;  %v2174_v29 = vld [vmem:[%s3853_s3 + $0x38] sm:$0xff] }
 0x3fc   : > { %v3091_v20 = vpop.eup %3090  ;;  %2183 = vst.msk [vmem:[%s3863_s11] sm:$0xff] %vm417_vm1, %v2175_v34  ;;  %v2177_v24 = vadd.f32 %v2169_v32, %v2161_v35  ;;  %v2163_v18 = vmul.f32 %v3089_v36, %v4656_v27 }
 0x3fd   : > { %v3093_v21 = vpop.eup %3092  ;;  %2184 = vst.msk [vmem:[%s3863_s11 + $0x8] sm:$0xff] %vm417_vm1, %v2176_v39  ;;  %v2178_v44 = vadd.f32 %v2170_v47, %v2162_v40  ;;  %v2164_v42 = vmul.f32 %v3091_v20, %v4658_v50 }
 0x3fe   : > { %v3095_v45 = vpop.eup %3094  ;;  %2185 = vst.msk [vmem:[%s3863_s11 + $0x10] sm:$0xff] %vm417_vm1, %v2177_v24  ;;  %v2179_v16 = vadd.f32 %v2171_v19, %v2163_v18  ;;  %v2165_v51 = vmul.f32 %v3093_v21, %v4660_v54 }
 0x3ff   : > { %2186 = vst.msk [vmem:[%s3863_s11 + $0x18] sm:$0xff] %vm417_vm1, %v2178_v44  ;;  %v2180_v27 = vadd.f32 %v2172_v41, %v2164_v42  ;;  %v2166_v17 = vmul.f32 %v3095_v45, %v4662_v26 }
 0x400   : > { %2187 = vst.msk [vmem:[%s3863_s11 + $0x20] sm:$0xff] %vm417_vm1, %v2179_v16  ;;  %v2181_v2 = vadd.f32 %v2173_v43, %v2165_v51 }
 0x401   : > { %2188 = vst.msk [vmem:[%s3863_s11 + $0x28] sm:$0xff] %vm417_vm1, %v2180_v27  ;;  %v2182_v3 = vadd.f32 %v2174_v29, %v2166_v17 }
 0x402   : > { %2189 = vst.msk [vmem:[%s3863_s11 + $0x30] sm:$0xff] %vm417_vm1, %v2181_v2 }
 0x403   : > { %2190 = vst.msk [vmem:[%s3863_s11 + $0x38] sm:$0xff] %vm417_vm1, %v2182_v3 }
 0x404 PF: > { %s4865_s4 = sld [smem:[#allocation26_spill]]  ;;  %s4866_s7 = sld [smem:[#allocation25_spill]] }
 0x405   : > { %s4867_s6 = sld [smem:[#allocation27_spill]]  ;;  %s2208_s14 = sshll.u32 %s3863_s11, 4  ;;  %s4704_s14 = int_to_ptr.vmem [resolvable:$true] %s2208_s14 }
 0x406   : > { %s4868_s15 = sld [smem:[#allocation40_spill]]  ;;  %s2192_s28 = scalar_lea.sflag [#allocation9], %s3849_s10 }
 0x407   : > { %s3268_s0 = scalar_lea.vmem %s4704_s14, 1024  ;;  %p4869_p8 = scmp.ne.s32.totalorder %s4844_s12, 0 }
 0x408   : > { %p3269_p9 = scmp.ne.s32.totalorder %s4704_s14, %s3268_s0  ;;  %s3432_s11 = smov [#allocation18]  }
 0x409   : > { %s3272_s1 = sshll.u32 %s3432_s11, 4  ;;  %s3273_s1 = int_to_ptr.vmem [resolvable:$false] %s3272_s1 }
 0x40a   : > { %s2199_s27 = smul.u32 %s4866_s7, %s4865_s4  ;;  %p3270_p4 = pnand %p3269_p9, %p4869_p8 }
 0x40b   : > { %s2562_s30 = sshll.u32 %s4867_s6, 5  ;;  %s3274_s29 = scalar_lea.vmem %s3273_s1, 2048 }
 0x40c   : > { %s2561_s5 = sshll.u32 %s2199_s27, 3  ;;  %p3271_p11 = pneg %p3270_p4 }
 0x40d   : > { %s2205_s3 = sadd.s32 %s2562_s30, %s2561_s5  ;;  %p3275_p7 = scmp.lt.s32.totalorder %s4704_s14, %s3273_s1 }
 0x40e   : > { %s2563_s2 = sshll.u32 %s2205_s3, 7  ;;  %p3276_p0 = scmp.lt.s32.totalorder %s3274_s29, %s3268_s0 }
 0x40f   : > { %s4709_s21 = scalar_lea.hbm %s4868_s15, %s2563_s2 }
 0x410   : > { %p3277_p12 = por %p3276_p0, %p3275_p7 }
 0x412   : > { %p3278_p13 = pnand %p3277_p12, %p3271_p11 }
 0x414   : > { %3281 = shalt.err (!%p3278_p13)
}
 0x415   : > { %s3282_s4 = scalar_lea.hbm %s4709_s21, 1024  ;;  %s3286_s27 = scalar_lea.hbm %s4868_s15, 8192 }
 0x416   : > { %p3283_p10 = scmp.ne.s32.totalorder %s4709_s21, %s3282_s4  ;;  %p3287_p1 = scmp.lt.u32.totalorder %s4709_s21, %s4868_s15 }
 0x417   : > { %p3288_p2 = scmp.lt.u32.totalorder %s3286_s27, %s3282_s4  ;;  %p3290_p9 = scmp.lt.u32.totalorder %s3282_s4, %s4709_s21 }
 0x418   : > { %p3284_p3 = pnand %p3283_p10, %p4869_p8 }
 0x419   : > { %p3289_p5 = por %p3288_p2, %p3287_p1 }
 0x41a   : > { %p3285_p6 = pneg %p3284_p3 }
 0x41b   : > { %p3291_p4 = por %p3290_p9, %p3289_p5 }
 0x41d   : > { %p3292_p11 = pnand %p3291_p4, %p3285_p6 }
 0x41f   : > { %3295 = shalt.err (!%p3292_p11)
}
 0x420   : > { %s3433_s3 = smov 128   ;;  %s3434_s2 = smov 8  }
 0x421   : > { %2910 = dma.vmem_to_hbm [thread:$0]  (%p4869_p8), %s4704_s14, 1024, %s4709_s21, %s2192_s28, %s3433_s3, %s3433_s3, %s3434_s2  }
 0x422 PF: > { %s4870_s16 = sld [smem:[#allocation24_spill]]  ;;  %p2945_p7 = scmp.ge.s32.totalorder %s3418_s9, 2 }
 0x423   : > { %p4871_p0 = scmp.ne.s32.totalorder %s4847_s19, 0 }
 0x425   : > { %p2933_p12 = pnand %p2945_p7, %p4871_p0 }
 0x428   : > { %s2223_s20 = sand.u32 1, %s4870_s16  }
 0x429   : > { %s2224_s0 = scalar_lea.sflag [#allocation9], %s2223_s20 }
 0x42a   : > { %3365 = dma.done.wait (!%p2933_p12), %s2224_s0, 1024  }
 0x42b   : > { %3367 = vsyncadd (!%p2933_p12), %s2224_s0, 4294966272  ;;  %s27_s9 = sadd.s32 1, %s3418_s9   ;;  %s4873_s27 = sld [smem:[#allocation28_spill]] }
 0x42c   : > { %p4740_p13 = scmp.ge.s32.totalorder %s27_s9, 18   ;;  %s4874_s28 = sld [smem:[#allocation29_spill]] }
 0x42d   : > { %s4875_s30 = sld [smem:[#allocation32_spill]]  ;;  %s4876_s7 = sld [smem:[#allocation33_spill]] }
 0x42e   : > { %s4877_s12 = smov %s4895_s24  ;;  %s4878_s21 = smov %s3374_s22 }
 0x42f   : > { %s4879_s22 = smov %s3378_s23  ;;  %s4880_s23 = smov %s3782_s13 }
 0x430   : > { %s4881_s24 = smov %s3386_s25  ;;  %s4882_s25 = smov %s3390_s26 }
 0x431   : > { %s4883_s26 = smov %s3779_s17  ;;  %s4884_s29 = smov %s3414_s8 }
 0x432   : > { %s4885_s8 = smov %s4877_s12  ;;  %26 = sbr.rel (!%p4740_p13) target bundleno = 22 (0x16), region = 138 }
 0x439   :  { %2229 = vsyncpa [#allocation8], 1 }
 0x43a   :  { %2231 = vsyncpa [#allocation8 + $0x1], 1 }
 0x43b   :  { %2232 = vsyncpa [#allocation11], 1 }
 0x43c   :  { %2233 = vsyncpa [#allocation14], 1 }
 0x43d   :  { %2234 = vsyncpa [#allocation17], 1 }
 0x43e   :  { %2236 = vsyncpa [#allocation17 + $0x1], 1 }
 0x43f   :  { %2237 = vsyncpa [#allocation9], 1 }
 0x440   :  { %2239 = vsyncpa [#allocation9 + $0x1], 1 }

</bundles_post_ra>
